<compile_context>
chip_gen: v6e
topology: v6e:2x2x1
jax: 0.10.0
libtpu: 0.0.40
codegen_flags: <defaults>
</compile_context>

<pallas_src>
import functools
import math

import jax
import jax.numpy as jnp
from jax import lax
from jax.experimental import pallas as pl
from jax.experimental.pallas import tpu as pltpu

LN_EPS = 1e-5


# --------------------------------------------------------------------------- #
# tiling / compiler-params helpers
# --------------------------------------------------------------------------- #
def _vmem_capacity_bytes():
    try:
        return int(pltpu.get_tpu_info().vmem_capacity_bytes)
    except Exception:
        return 64 << 20  # conservative (v7x per-core VMEM)


def _pick_tile(m, target, mults=(8,)):
    """Largest divisor of m that is a multiple of one of `mults` and <= target."""
    target = min(target, m)
    if target >= m:
        return m
    for mult in mults:
        t = target - target % mult
        while t >= mult:
            if m % t == 0:
                return t
            t -= mult
    return m  # no clean divisor -> single full block (only hit at small shapes)


def _mosaic_params(semantics, est_bytes):
    # Explicit scoped-VMEM limit: at least 32 MiB (raises the v5e 16 MiB
    # default), at most 64 MiB (safe on every generation incl. v7x).
    limit = int(min(64 << 20, max(32 << 20, 4 * est_bytes)))
    return pltpu.CompilerParams(dimension_semantics=semantics,
                                vmem_limit_bytes=limit)


# --------------------------------------------------------------------------- #
# Kernel 1: reducer conv (patch matmul) + LayerNorm + fused K/V projection
# --------------------------------------------------------------------------- #
def _reduce_kv_kernel(p_ref, rw_ref, rb_ref, g_ref, b_ref, wkv_ref,
                      bk_ref, bv_ref, k_ref, v_ref, *, eps):
    C = k_ref.shape[-1]
    # reducer conv (kernel==stride => pure patch matmul); f32 accumulation
    red = jnp.dot(p_ref[...], rw_ref[...],
                  preferred_element_type=jnp.float32) + rb_ref[...]
    # LayerNorm over channels, statistics in f32
    mu = jnp.mean(red, axis=-1, keepdims=True)
    var = jnp.mean(jnp.square(red - mu), axis=-1, keepdims=True)
    ln = ((red - mu) * lax.rsqrt(var + eps) * g_ref[...] + b_ref[...])
    ln = ln.astype(jnp.bfloat16)
    # fused K/V projection with one (C, 2C) weight; split while in registers
    kv = jnp.dot(ln, wkv_ref[...], preferred_element_type=jnp.float32)
    k_ref[...] = (kv[:, :C] + bk_ref[...]).astype(k_ref.dtype)
    v_ref[...] = (kv[:, C:] + bv_ref[...]).astype(v_ref.dtype)


def reduce_kv(patches_bf16, prm):
    """patches: (Mk, rr*rr*C) bf16 -> (K, V): two (Mk, C) bf16 arrays."""
    Mk, Kp = patches_bf16.shape
    C = prm["red_w"].shape[1]
    vmem = _vmem_capacity_bytes()
    row_cap = 2048 if vmem >= (96 << 20) else 1024      # v5e/v6e vs v7x
    # >=4 grid steps: keeps both v7x TensorCores busy and the pipeline overlapped
    tm = _pick_tile(Mk, min(row_cap, max(8, Mk // 4)), mults=(8,))
    grid = (Mk // tm,)
    est = (2 * tm * Kp * 2            # bf16 input block, double-buffered
           + 2 * 2 * tm * C * 2       # two bf16 output blocks, double-buffered
           + Kp * C * 2 + 2 * C * C * 2 + 6 * C * 4   # weights / biases
           + 2 * tm * 2 * C * 4)      # f32 intermediates headroom
    kv_spec = pl.BlockSpec((tm, C), lambda i: (i, 0))
    return pl.pallas_call(
        functools.partial(_reduce_kv_kernel, eps=LN_EPS),
        out_shape=(jax.ShapeDtypeStruct((Mk, C), jnp.bfloat16),
                   jax.ShapeDtypeStruct((Mk, C), jnp.bfloat16)),
        grid=grid,
        in_specs=[
            pl.BlockSpec((tm, Kp), lambda i: (i, 0)),
            pl.BlockSpec((Kp, C), lambda i: (0, 0)),
            pl.BlockSpec((1, C), lambda i: (0, 0)),
            pl.BlockSpec((1, C), lambda i: (0, 0)),
            pl.BlockSpec((1, C), lambda i: (0, 0)),
            pl.BlockSpec((C, 2 * C), lambda i: (0, 0)),
            pl.BlockSpec((1, C), lambda i: (0, 0)),
            pl.BlockSpec((1, C), lambda i: (0, 0)),
        ],
        out_specs=(kv_spec, kv_spec),
        compiler_params=_mosaic_params(("parallel",), est),
    )(patches_bf16, prm["red_w"], prm["red_b"], prm["ln_g"], prm["ln_b"],
      prm["wkv"], prm["bk"], prm["bv"])


# --------------------------------------------------------------------------- #
# Kernel 2: Q projection (scale pre-folded) + per-head attention with the
#           P.V matmul fused into the output projection; lane-dense (C, tq) store
# --------------------------------------------------------------------------- #
def _attn_kernel(x_ref, k_ref, v_ref, wq_ref, bq_ref, wo_ref, bo_ref, o_ref,
                 *, num_heads, dh):
    xq = x_ref[0]                              # (tq, C)  bf16
    k = k_ref[0]                               # (Lk, C)  bf16
    v = v_ref[0]                               # (Lk, C)  bf16
    wo = wo_ref[...]                           # (C, C)   bf16
    # Q projection; 1/sqrt(dh) already folded into wq/bq
    q = jnp.dot(xq, wq_ref[...], preferred_element_type=jnp.float32) + bq_ref[...]
    q = q.astype(jnp.bfloat16)
    tq = xq.shape[0]
    C = num_heads * dh
    o_acc = jnp.zeros((tq, C), jnp.float32)
    for h in range(num_heads):
        sl = slice(h * dh, (h + 1) * dh)
        qh = q[:, sl]                          # (tq, dh)
        kh = k[:, sl]                          # (Lk, dh)
        vh = v[:, sl]                          # (Lk, dh)
        s = lax.dot_general(qh, kh, (((1,), (1,)), ((), ())),
                            preferred_element_type=jnp.float32)   # (tq, Lk) f32
        m = jnp.max(s, axis=-1, keepdims=True)
        p = jnp.exp(s - m)
        denom = jnp.sum(p, axis=-1, keepdims=True)
        p = (p * pl.reciprocal(denom, approx=True)).astype(jnp.bfloat16)
        # fuse V_h with the output projection: (Lk, dh) @ (dh, C) -> lane-dense
        vo = jnp.dot(vh, wo[sl, :],
                     preferred_element_type=jnp.float32).astype(jnp.bfloat16)
        o_acc = o_acc + jnp.dot(p, vo, preferred_element_type=jnp.float32)
    o = o_acc + bo_ref[...]                    # (tq, C) f32
    # lane-dense store: (tq, C) -> (C, tq) rides the XLU, output last dim = tq
    o_ref[0] = jnp.transpose(o, (1, 0)).astype(o_ref.dtype)


def attention(xq_bf16, k_bf16, v_bf16, prm, num_heads):
    """xq: (B, Lq, C) bf16, k/v: (B, Lk, C) bf16 -> (B, C, Lq) bf16."""
    B, Lq, C = xq_bf16.shape
    Lk = k_bf16.shape[1]
    dh = C // num_heads
    vmem = _vmem_capacity_bytes()
    q_cap = 1024 if vmem >= (96 << 20) else 512          # v5e/v6e vs v7x
    min_q_steps = max(1, -(-4 // B))                     # ceil(4 / B)
    tq = _pick_tile(Lq, min(q_cap, max(128, Lq // min_q_steps)), mults=(128, 8))
    grid = (B, Lq // tq)
    est = (2 * tq * C * 2                # q blocks (bf16, double-buffered)
           + 2 * 2 * Lk * C * 2          # k and v blocks
           + 2 * C * tq * 2              # output blocks
           + 2 * C * C * 2 + 2 * C * 4   # weights / biases
           + tq * Lk * 4 + 3 * tq * C * 4)   # f32 score + accumulators
    return pl.pallas_call(
        functools.partial(_attn_kernel, num_heads=num_heads, dh=dh),
        out_shape=jax.ShapeDtypeStruct((B, C, Lq), jnp.bfloat16),
        grid=grid,
        in_specs=[
            pl.BlockSpec((1, tq, C), lambda b, qi: (b, qi, 0)),
            pl.BlockSpec((1, Lk, C), lambda b, qi: (b, 0, 0)),
            pl.BlockSpec((1, Lk, C), lambda b, qi: (b, 0, 0)),
            pl.BlockSpec((C, C), lambda b, qi: (0, 0)),
            pl.BlockSpec((1, C), lambda b, qi: (0, 0)),
            pl.BlockSpec((C, C), lambda b, qi: (0, 0)),
            pl.BlockSpec((1, C), lambda b, qi: (0, 0)),
        ],
        out_specs=pl.BlockSpec((1, C, tq), lambda b, qi: (b, 0, qi)),
        compiler_params=_mosaic_params(("parallel", "parallel"), est),
    )(xq_bf16, k_bf16, v_bf16, prm["wq"], prm["bq"], prm["wo"], prm["bo"])


# --------------------------------------------------------------------------- #
# Module forward (NCHW in / NCHW out); only bf16 layout plumbing stays outside
# --------------------------------------------------------------------------- #
def efficient_mha_forward(prm, x_nchw, *, rr, num_heads):
    B, C, H, W = x_nchw.shape
    # cast to bf16 BEFORE any layout work so no f32 copies hit HBM
    x = jnp.transpose(x_nchw, (0, 2, 3, 1)).astype(jnp.bfloat16)   # NHWC bf16
    Hr, Wr = H // rr, W // rr
    # reducer conv has kernel==stride, no padding -> non-overlapping patches,
    # so "im2col" is a pure reshape (no HBM inflation).
    patches = (x[:, :Hr * rr, :Wr * rr, :]
               .reshape(B, Hr, rr, Wr, rr, C)
               .transpose(0, 1, 3, 2, 4, 5)
               .reshape(B * Hr * Wr, rr * rr * C))
    Lq, Lk = H * W, Hr * Wr
    k, v = reduce_kv(patches, prm)                     # (B*Lk, C) bf16 each
    k = k.reshape(B, Lk, C)
    v = v.reshape(B, Lk, C)
    xq = x.reshape(B, Lq, C)                           # free reshape, bf16
    out = attention(xq, k, v, prm, num_heads)          # (B, C, Lq) bf16
    return out.reshape(B, C, H, W)                     # free reshape (NCHW)


# --------------------------------------------------------------------------- #
# Parameters: raw f32 (for the reference) + kernel-prepped (bf16, fused, scaled)
# --------------------------------------------------------------------------- #
def init_raw_params(key, C, rr):
    ks = jax.random.split(key, 12)

    def rnd(k, shape, scale=0.05):
        return jax.random.normal(k, shape, jnp.float32) * scale

    return {
        # reducer conv weight already flattened to (rr*rr*Cin, Cout), (kh,kw,cin) order
        "red_w": rnd(ks[0], (rr * rr * C, C)),
        "red_b": rnd(ks[1], (C,)),
        "ln_g": 1.0 + rnd(ks[2], (C,)),
        "ln_b": rnd(ks[3], (C,)),
        "wq": rnd(ks[4], (C, C)), "bq": rnd(ks[5], (C,)),
        "wk": rnd(ks[6], (C, C)), "bk": rnd(ks[7], (C,)),
        "wv": rnd(ks[8], (C, C)), "bv": rnd(ks[9], (C,)),
        "wo": rnd(ks[10], (C, C)), "bo": rnd(ks[11], (C,)),
    }


def prepare_params(raw, num_heads):
    C = raw["wq"].shape[0]
    dh = C // num_heads
    scale = 1.0 / math.sqrt(dh)
    return {
        "red_w": raw["red_w"].astype(jnp.bfloat16),
        "red_b": raw["red_b"].reshape(1, C).astype(jnp.float32),
        "ln_g": raw["ln_g"].reshape(1, C).astype(jnp.float32),
        "ln_b": raw["ln_b"].reshape(1, C).astype(jnp.float32),
        # fold attention scale into the Q projection (weight AND bias)
        "wq": (raw["wq"] * scale).astype(jnp.bfloat16),
        "bq": (raw["bq"] * scale).reshape(1, C).astype(jnp.float32),
        # fuse K and V projections into one (C, 2C) matmul; biases kept split
        "wkv": jnp.concatenate([raw["wk"], raw["wv"]], axis=1).astype(jnp.bfloat16),
        "bk": raw["bk"].reshape(1, C).astype(jnp.float32),
        "bv": raw["bv"].reshape(1, C).astype(jnp.float32),
        "wo": raw["wo"].astype(jnp.bfloat16),
        "bo": raw["bo"].reshape(1, C).astype(jnp.float32),
    }


# --------------------------------------------------------------------------- #
# Pure-JAX f32 reference (mirrors nn.MultiheadAttention semantics)
# --------------------------------------------------------------------------- #
def reference_forward(raw, x_nchw, rr, num_heads):
    B, C, H, W = x_nchw.shape
    x = jnp.transpose(x_nchw, (0, 2, 3, 1)).astype(jnp.float32)
    Hr, Wr = H // rr, W // rr
    patches = (x[:, :Hr * rr, :Wr * rr, :]
               .reshape(B, Hr, rr, Wr, rr, C)
               .transpose(0, 1, 3, 2, 4, 5)
               .reshape(B, Hr * Wr, rr * rr * C))
    red = patches @ raw["red_w"] + raw["red_b"]
    mu = red.mean(-1, keepdims=True)
    var = ((red - mu) ** 2).mean(-1, keepdims=True)
    ln = (red - mu) / jnp.sqrt(var + LN_EPS) * raw["ln_g"] + raw["ln_b"]
    xq = x.reshape(B, H * W, C)
    dh = C // num_heads
    q = (xq @ raw["wq"] + raw["bq"]) * (1.0 / math.sqrt(dh))
    k = ln @ raw["wk"] + raw["bk"]
    v = ln @ raw["wv"] + raw["bv"]

    def split(t):
        return t.reshape(t.shape[0], t.shape[1], num_heads, dh).transpose(0, 2, 1, 3)

    qh, kh, vh = split(q), split(k), split(v)
    s = jnp.einsum('bhqd,bhkd->bhqk', qh, kh)
    p = jax.nn.softmax(s, axis=-1)
    o = jnp.einsum('bhqk,bhkd->bhqd', p, vh).transpose(0, 2, 1, 3).reshape(B, H * W, C)
    o = o @ raw["wo"] + raw["bo"]
    return jnp.transpose(o.reshape(B, H, W, C), (0, 3, 1, 2))


# ==================================== main ===================================
if __name__ == "__main__":
    B, C, H, W = 2, 32, 16, 16
    RR, NUM_HEADS = 2, 4          # head_dim = 8

    key = jax.random.PRNGKey(0)
    pkey, xkey = jax.random.split(key)
    raw = init_raw_params(pkey, C, RR)
    prm = prepare_params(raw, NUM_HEADS)
    x = jax.random.normal(xkey, (B, C, H, W), jnp.float32)

    fwd = jax.jit(functools.partial(efficient_mha_forward, rr=RR, num_heads=NUM_HEADS))
    out = jax.block_until_ready(fwd(prm, x))

    assert out.shape == (B, C, H, W), out.shape
    out_f32 = out.astype(jnp.float32)
    assert bool(jnp.all(jnp.isfinite(out_f32)))

    # sanity-check against a pure f32 JAX reference (bf16 path => loose tol)
    ref = reference_forward(raw, x, RR, NUM_HEADS)
    max_err = float(jnp.max(jnp.abs(out_f32 - ref)))
    assert max_err < 5e-2, f"max abs error {max_err}"

    print("KERNEL_OK")
</pallas_src>

<mosaic_0001>
module attributes {stable_mosaic.version = 11 : i64} {
  func.func @_reduce_kv_kernel(%arg0: i32, %arg1: memref<32x128xbf16, #tpu.memory_space<vmem>>, %arg2: memref<128x32xbf16, #tpu.memory_space<vmem>>, %arg3: memref<1x32xf32, #tpu.memory_space<vmem>>, %arg4: memref<1x32xf32, #tpu.memory_space<vmem>>, %arg5: memref<1x32xf32, #tpu.memory_space<vmem>>, %arg6: memref<32x64xbf16, #tpu.memory_space<vmem>>, %arg7: memref<1x32xf32, #tpu.memory_space<vmem>>, %arg8: memref<1x32xf32, #tpu.memory_space<vmem>>, %arg9: memref<32x32xbf16, #tpu.memory_space<vmem>>, %arg10: memref<32x32xbf16, #tpu.memory_space<vmem>>) attributes {dimension_semantics = [#tpu.dimension_semantics<parallel>], iteration_bounds = array<i64: 4>, scalar_prefetch = 0 : i64, scratch_operands = 0 : i64, tpu.core_type = #tpu.core_type<tc>, window_params = [{transform_indices = @transform_0, window_bounds = array<i64: 32, 128>}, {pipeline_mode = #tpu.pipeline_mode<synchronous>, transform_indices = @transform_1, window_bounds = array<i64: 128, 32>}, {pipeline_mode = #tpu.pipeline_mode<synchronous>, transform_indices = @transform_2, window_bounds = array<i64: 1, 32>}, {pipeline_mode = #tpu.pipeline_mode<synchronous>, transform_indices = @transform_3, window_bounds = array<i64: 1, 32>}, {pipeline_mode = #tpu.pipeline_mode<synchronous>, transform_indices = @transform_4, window_bounds = array<i64: 1, 32>}, {pipeline_mode = #tpu.pipeline_mode<synchronous>, transform_indices = @transform_5, window_bounds = array<i64: 32, 64>}, {pipeline_mode = #tpu.pipeline_mode<synchronous>, transform_indices = @transform_6, window_bounds = array<i64: 1, 32>}, {pipeline_mode = #tpu.pipeline_mode<synchronous>, transform_indices = @transform_7, window_bounds = array<i64: 1, 32>}, {transform_indices = @transform_8, window_bounds = array<i64: 32, 32>}, {transform_indices = @transform_9, window_bounds = array<i64: 32, 32>}]} {
    %c0 = arith.constant 0 : index
    %c0_0 = arith.constant 0 : index
    %0 = vector.load %arg1[%c0, %c0_0] : memref<32x128xbf16, #tpu.memory_space<vmem>>, vector<32x128xbf16>
    %c0_1 = arith.constant 0 : index
    %c0_2 = arith.constant 0 : index
    %1 = vector.load %arg2[%c0_1, %c0_2] : memref<128x32xbf16, #tpu.memory_space<vmem>>, vector<128x32xbf16>
    %cst = arith.constant dense<0.000000e+00> : vector<32x32xf32>
    %2 = tpu.matmul %0, %1, %cst {dimension_numbers = #tpu.dot_dimension_numbers<[1], [0], [0], [1], [0, 0, 1, 1], [], []>} : vector<32x128xbf16>, vector<128x32xbf16>, vector<32x32xf32> -> vector<32x32xf32>
    %c0_3 = arith.constant 0 : index
    %c0_4 = arith.constant 0 : index
    %3 = vector.load %arg3[%c0_3, %c0_4] : memref<1x32xf32, #tpu.memory_space<vmem>>, vector<1x32xf32>
    %4 = vector.broadcast %3 : vector<1x32xf32> to vector<32x32xf32>
    %5 = arith.addf %2, %4 : vector<32x32xf32>
    %cst_5 = arith.constant dense<0.000000e+00> : vector<32xf32>
    %6 = vector.multi_reduction <add>, %5, %cst_5 [1] : vector<32x32xf32> to vector<32xf32>
    %7 = vector.shape_cast %6 : vector<32xf32> to vector<32x1xf32>
    %cst_6 = arith.constant 3.200000e+01 : f32
    %8 = vector.broadcast %cst_6 : f32 to vector<32x1xf32>
    %9 = arith.divf %7, %8 : vector<32x1xf32>
    %10 = vector.broadcast %9 : vector<32x1xf32> to vector<32x32xf32>
    %11 = arith.subf %5, %10 : vector<32x32xf32>
    %12 = arith.mulf %11, %11 : vector<32x32xf32>
    %cst_7 = arith.constant dense<0.000000e+00> : vector<32xf32>
    %13 = vector.multi_reduction <add>, %12, %cst_7 [1] : vector<32x32xf32> to vector<32xf32>
    %14 = vector.shape_cast %13 : vector<32xf32> to vector<32x1xf32>
    %cst_8 = arith.constant 3.200000e+01 : f32
    %15 = vector.broadcast %cst_8 : f32 to vector<32x1xf32>
    %16 = arith.divf %14, %15 : vector<32x1xf32>
    %17 = vector.broadcast %9 : vector<32x1xf32> to vector<32x32xf32>
    %18 = arith.subf %5, %17 : vector<32x32xf32>
    %cst_9 = arith.constant 9.99999974E-6 : f32
    %19 = vector.broadcast %cst_9 : f32 to vector<32x1xf32>
    %20 = arith.addf %16, %19 : vector<32x1xf32>
    %21 = math.rsqrt %20 : vector<32x1xf32>
    %22 = vector.broadcast %21 : vector<32x1xf32> to vector<32x32xf32>
    %23 = arith.mulf %18, %22 : vector<32x32xf32>
    %c0_10 = arith.constant 0 : index
    %c0_11 = arith.constant 0 : index
    %24 = vector.load %arg4[%c0_10, %c0_11] : memref<1x32xf32, #tpu.memory_space<vmem>>, vector<1x32xf32>
    %25 = vector.broadcast %24 : vector<1x32xf32> to vector<32x32xf32>
    %26 = arith.mulf %23, %25 : vector<32x32xf32>
    %c0_12 = arith.constant 0 : index
    %c0_13 = arith.constant 0 : index
    %27 = vector.load %arg5[%c0_12, %c0_13] : memref<1x32xf32, #tpu.memory_space<vmem>>, vector<1x32xf32>
    %28 = vector.broadcast %27 : vector<1x32xf32> to vector<32x32xf32>
    %29 = arith.addf %26, %28 : vector<32x32xf32>
    %30 = arith.truncf %29 : vector<32x32xf32> to vector<32x32xbf16>
    %c0_14 = arith.constant 0 : index
    %c0_15 = arith.constant 0 : index
    %31 = vector.load %arg6[%c0_14, %c0_15] : memref<32x64xbf16, #tpu.memory_space<vmem>>, vector<32x64xbf16>
    %cst_16 = arith.constant dense<0.000000e+00> : vector<32x64xf32>
    %32 = tpu.matmul %30, %31, %cst_16 {dimension_numbers = #tpu.dot_dimension_numbers<[1], [0], [0], [1], [0, 0, 1, 1], [], []>} : vector<32x32xbf16>, vector<32x64xbf16>, vector<32x64xf32> -> vector<32x64xf32>
    %33 = vector.extract_strided_slice %32 {offsets = [0, 0], sizes = [32, 32], strides = [1, 1]} : vector<32x64xf32> to vector<32x32xf32>
    %c0_17 = arith.constant 0 : index
    %c0_18 = arith.constant 0 : index
    %34 = vector.load %arg7[%c0_17, %c0_18] : memref<1x32xf32, #tpu.memory_space<vmem>>, vector<1x32xf32>
    %35 = vector.broadcast %34 : vector<1x32xf32> to vector<32x32xf32>
    %36 = arith.addf %33, %35 : vector<32x32xf32>
    %37 = arith.truncf %36 : vector<32x32xf32> to vector<32x32xbf16>
    %c0_19 = arith.constant 0 : index
    %c0_20 = arith.constant 0 : index
    %38 = vector.load %arg9[%c0_19, %c0_20] : memref<32x32xbf16, #tpu.memory_space<vmem>>, vector<32x32xbf16>
    tpu.vector_store %arg9[%c0_19, %c0_20], %37 {strides = array<i32>} : memref<32x32xbf16, #tpu.memory_space<vmem>>, vector<32x32xbf16>,
    %39 = vector.extract_strided_slice %32 {offsets = [0, 32], sizes = [32, 32], strides = [1, 1]} : vector<32x64xf32> to vector<32x32xf32>
    %c0_21 = arith.constant 0 : index
    %c0_22 = arith.constant 0 : index
    %40 = vector.load %arg8[%c0_21, %c0_22] : memref<1x32xf32, #tpu.memory_space<vmem>>, vector<1x32xf32>
    %41 = vector.broadcast %40 : vector<1x32xf32> to vector<32x32xf32>
    %42 = arith.addf %39, %41 : vector<32x32xf32>
    %43 = arith.truncf %42 : vector<32x32xf32> to vector<32x32xbf16>
    %c0_23 = arith.constant 0 : index
    %c0_24 = arith.constant 0 : index
    %44 = vector.load %arg10[%c0_23, %c0_24] : memref<32x32xbf16, #tpu.memory_space<vmem>>, vector<32x32xbf16>
    tpu.vector_store %arg10[%c0_23, %c0_24], %43 {strides = array<i32>} : memref<32x32xbf16, #tpu.memory_space<vmem>>, vector<32x32xbf16>,
    return
  }
  func.func @transform_0(%arg0: i32) -> (i32, i32) {
    %c0_i32 = arith.constant 0 : i32
    %c0_i32_0 = arith.constant 0 : i32
    return %arg0, %c0_i32 : i32, i32
  }
  func.func @transform_1(%arg0: i32) -> (i32, i32) {
    %c0_i32 = arith.constant 0 : i32
    %c0_i32_0 = arith.constant 0 : i32
    %c0_i32_1 = arith.constant 0 : i32
    return %c0_i32, %c0_i32_0 : i32, i32
  }
  func.func @transform_2(%arg0: i32) -> (i32, i32) {
    %c0_i32 = arith.constant 0 : i32
    %c0_i32_0 = arith.constant 0 : i32
    %c0_i32_1 = arith.constant 0 : i32
    return %c0_i32, %c0_i32_0 : i32, i32
  }
  func.func @transform_3(%arg0: i32) -> (i32, i32) {
    %c0_i32 = arith.constant 0 : i32
    %c0_i32_0 = arith.constant 0 : i32
    %c0_i32_1 = arith.constant 0 : i32
    return %c0_i32, %c0_i32_0 : i32, i32
  }
  func.func @transform_4(%arg0: i32) -> (i32, i32) {
    %c0_i32 = arith.constant 0 : i32
    %c0_i32_0 = arith.constant 0 : i32
    %c0_i32_1 = arith.constant 0 : i32
    return %c0_i32, %c0_i32_0 : i32, i32
  }
  func.func @transform_5(%arg0: i32) -> (i32, i32) {
    %c0_i32 = arith.constant 0 : i32
    %c0_i32_0 = arith.constant 0 : i32
    %c0_i32_1 = arith.constant 0 : i32
    return %c0_i32, %c0_i32_0 : i32, i32
  }
  func.func @transform_6(%arg0: i32) -> (i32, i32) {
    %c0_i32 = arith.constant 0 : i32
    %c0_i32_0 = arith.constant 0 : i32
    %c0_i32_1 = arith.constant 0 : i32
    return %c0_i32, %c0_i32_0 : i32, i32
  }
  func.func @transform_7(%arg0: i32) -> (i32, i32) {
    %c0_i32 = arith.constant 0 : i32
    %c0_i32_0 = arith.constant 0 : i32
    %c0_i32_1 = arith.constant 0 : i32
    return %c0_i32, %c0_i32_0 : i32, i32
  }
  func.func @transform_8(%arg0: i32) -> (i32, i32) {
    %c0_i32 = arith.constant 0 : i32
    %c0_i32_0 = arith.constant 0 : i32
    return %arg0, %c0_i32 : i32, i32
  }
  func.func @transform_9(%arg0: i32) -> (i32, i32) {
    %c0_i32 = arith.constant 0 : i32
    %c0_i32_0 = arith.constant 0 : i32
    return %arg0, %c0_i32 : i32, i32
  }
}

module attributes {stable_mosaic.version = 11 : i64} {
  func.func @_attn_kernel(%arg0: i32, %arg1: i32, %arg2: memref<1x128x32xbf16, #tpu.memory_space<vmem>>, %arg3: memref<1x64x32xbf16, #tpu.memory_space<vmem>>, %arg4: memref<1x64x32xbf16, #tpu.memory_space<vmem>>, %arg5: memref<32x32xbf16, #tpu.memory_space<vmem>>, %arg6: memref<1x32xf32, #tpu.memory_space<vmem>>, %arg7: memref<32x32xbf16, #tpu.memory_space<vmem>>, %arg8: memref<1x32xf32, #tpu.memory_space<vmem>>, %arg9: memref<1x32x128xbf16, #tpu.memory_space<vmem>>) attributes {dimension_semantics = [#tpu.dimension_semantics<parallel>, #tpu.dimension_semantics<parallel>], iteration_bounds = array<i64: 2, 2>, scalar_prefetch = 0 : i64, scratch_operands = 0 : i64, tpu.core_type = #tpu.core_type<tc>, window_params = [{transform_indices = @transform_0, window_bounds = array<i64: 1, 128, 32>}, {transform_indices = @transform_1, window_bounds = array<i64: 1, 64, 32>}, {transform_indices = @transform_2, window_bounds = array<i64: 1, 64, 32>}, {pipeline_mode = #tpu.pipeline_mode<synchronous>, transform_indices = @transform_3, window_bounds = array<i64: 32, 32>}, {pipeline_mode = #tpu.pipeline_mode<synchronous>, transform_indices = @transform_4, window_bounds = array<i64: 1, 32>}, {pipeline_mode = #tpu.pipeline_mode<synchronous>, transform_indices = @transform_5, window_bounds = array<i64: 32, 32>}, {pipeline_mode = #tpu.pipeline_mode<synchronous>, transform_indices = @transform_6, window_bounds = array<i64: 1, 32>}, {transform_indices = @transform_7, window_bounds = array<i64: 1, 32, 128>}]} {
    %c0 = arith.constant 0 : index
    %c0_0 = arith.constant 0 : index
    %c0_1 = arith.constant 0 : index
    %0 = vector.load %arg2[%c0, %c0_0, %c0_1] : memref<1x128x32xbf16, #tpu.memory_space<vmem>>, vector<1x128x32xbf16>
    %1 = vector.shape_cast %0 : vector<1x128x32xbf16> to vector<128x32xbf16>
    %c0_2 = arith.constant 0 : index
    %c0_3 = arith.constant 0 : index
    %c0_4 = arith.constant 0 : index
    %2 = vector.load %arg3[%c0_2, %c0_3, %c0_4] : memref<1x64x32xbf16, #tpu.memory_space<vmem>>, vector<1x64x32xbf16>
    %3 = vector.shape_cast %2 : vector<1x64x32xbf16> to vector<64x32xbf16>
    %c0_5 = arith.constant 0 : index
    %c0_6 = arith.constant 0 : index
    %c0_7 = arith.constant 0 : index
    %4 = vector.load %arg4[%c0_5, %c0_6, %c0_7] : memref<1x64x32xbf16, #tpu.memory_space<vmem>>, vector<1x64x32xbf16>
    %5 = vector.shape_cast %4 : vector<1x64x32xbf16> to vector<64x32xbf16>
    %c0_8 = arith.constant 0 : index
    %c0_9 = arith.constant 0 : index
    %6 = vector.load %arg7[%c0_8, %c0_9] : memref<32x32xbf16, #tpu.memory_space<vmem>>, vector<32x32xbf16>
    %c0_10 = arith.constant 0 : index
    %c0_11 = arith.constant 0 : index
    %7 = vector.load %arg5[%c0_10, %c0_11] : memref<32x32xbf16, #tpu.memory_space<vmem>>, vector<32x32xbf16>
    %cst = arith.constant dense<0.000000e+00> : vector<128x32xf32>
    %8 = tpu.matmul %1, %7, %cst {dimension_numbers = #tpu.dot_dimension_numbers<[1], [0], [0], [1], [0, 0, 1, 1], [], []>} : vector<128x32xbf16>, vector<32x32xbf16>, vector<128x32xf32> -> vector<128x32xf32>
    %c0_12 = arith.constant 0 : index
    %c0_13 = arith.constant 0 : index
    %9 = vector.load %arg6[%c0_12, %c0_13] : memref<1x32xf32, #tpu.memory_space<vmem>>, vector<1x32xf32>
    %10 = vector.broadcast %9 : vector<1x32xf32> to vector<128x32xf32>
    %11 = arith.addf %8, %10 : vector<128x32xf32>
    %12 = arith.truncf %11 : vector<128x32xf32> to vector<128x32xbf16>
    %cst_14 = arith.constant 0.000000e+00 : f32
    %13 = vector.broadcast %cst_14 : f32 to vector<128x32xf32>
    %14 = vector.extract_strided_slice %12 {offsets = [0, 0], sizes = [128, 8], strides = [1, 1]} : vector<128x32xbf16> to vector<128x8xbf16>
    %15 = vector.extract_strided_slice %3 {offsets = [0, 0], sizes = [64, 8], strides = [1, 1]} : vector<64x32xbf16> to vector<64x8xbf16>
    %16 = vector.extract_strided_slice %5 {offsets = [0, 0], sizes = [64, 8], strides = [1, 1]} : vector<64x32xbf16> to vector<64x8xbf16>
    %cst_15 = arith.constant dense<0.000000e+00> : vector<128x64xf32>
    %17 = tpu.matmul %14, %15, %cst_15 {dimension_numbers = #tpu.dot_dimension_numbers<[1], [1], [0], [0], [0, 0, 1, 0], [], []>} : vector<128x8xbf16>, vector<64x8xbf16>, vector<128x64xf32> -> vector<128x64xf32>
    %cst_16 = arith.constant dense<0xFF800000> : vector<128xf32>
    %18 = vector.multi_reduction <maximumf>, %17, %cst_16 [1] : vector<128x64xf32> to vector<128xf32>
    %19 = vector.shape_cast %18 : vector<128xf32> to vector<128x1xf32>
    %20 = vector.broadcast %19 : vector<128x1xf32> to vector<128x64xf32>
    %21 = arith.subf %17, %20 : vector<128x64xf32>
    %22 = math.exp %21 : vector<128x64xf32>
    %cst_17 = arith.constant dense<0.000000e+00> : vector<128xf32>
    %23 = vector.multi_reduction <add>, %22, %cst_17 [1] : vector<128x64xf32> to vector<128xf32>
    %24 = vector.shape_cast %23 : vector<128xf32> to vector<128x1xf32>
    %25 = tpu.reciprocal %24 {approx = true} : vector<128x1xf32> -> vector<128x1xf32>
    %26 = vector.broadcast %25 : vector<128x1xf32> to vector<128x64xf32>
    %27 = arith.mulf %22, %26 : vector<128x64xf32>
    %28 = arith.truncf %27 : vector<128x64xf32> to vector<128x64xbf16>
    %29 = vector.extract_strided_slice %6 {offsets = [0, 0], sizes = [8, 32], strides = [1, 1]} : vector<32x32xbf16> to vector<8x32xbf16>
    %cst_18 = arith.constant dense<0.000000e+00> : vector<64x32xf32>
    %30 = tpu.matmul %16, %29, %cst_18 {dimension_numbers = #tpu.dot_dimension_numbers<[1], [0], [0], [1], [0, 0, 1, 1], [], []>} : vector<64x8xbf16>, vector<8x32xbf16>, vector<64x32xf32> -> vector<64x32xf32>
    %31 = arith.truncf %30 : vector<64x32xf32> to vector<64x32xbf16>
    %cst_19 = arith.constant dense<0.000000e+00> : vector<128x32xf32>
    %32 = tpu.matmul %28, %31, %cst_19 {dimension_numbers = #tpu.dot_dimension_numbers<[1], [0], [0], [1], [0, 0, 1, 1], [], []>} : vector<128x64xbf16>, vector<64x32xbf16>, vector<128x32xf32> -> vector<128x32xf32>
    %33 = arith.addf %13, %32 : vector<128x32xf32>
    %34 = vector.extract_strided_slice %12 {offsets = [0, 8], sizes = [128, 8], strides = [1, 1]} : vector<128x32xbf16> to vector<128x8xbf16>
    %35 = vector.extract_strided_slice %3 {offsets = [0, 8], sizes = [64, 8], strides = [1, 1]} : vector<64x32xbf16> to vector<64x8xbf16>
    %36 = vector.extract_strided_slice %5 {offsets = [0, 8], sizes = [64, 8], strides = [1, 1]} : vector<64x32xbf16> to vector<64x8xbf16>
    %cst_20 = arith.constant dense<0.000000e+00> : vector<128x64xf32>
    %37 = tpu.matmul %34, %35, %cst_20 {dimension_numbers = #tpu.dot_dimension_numbers<[1], [1], [0], [0], [0, 0, 1, 0], [], []>} : vector<128x8xbf16>, vector<64x8xbf16>, vector<128x64xf32> -> vector<128x64xf32>
    %cst_21 = arith.constant dense<0xFF800000> : vector<128xf32>
    %38 = vector.multi_reduction <maximumf>, %37, %cst_21 [1] : vector<128x64xf32> to vector<128xf32>
    %39 = vector.shape_cast %38 : vector<128xf32> to vector<128x1xf32>
    %40 = vector.broadcast %39 : vector<128x1xf32> to vector<128x64xf32>
    %41 = arith.subf %37, %40 : vector<128x64xf32>
    %42 = math.exp %41 : vector<128x64xf32>
    %cst_22 = arith.constant dense<0.000000e+00> : vector<128xf32>
    %43 = vector.multi_reduction <add>, %42, %cst_22 [1] : vector<128x64xf32> to vector<128xf32>
    %44 = vector.shape_cast %43 : vector<128xf32> to vector<128x1xf32>
    %45 = tpu.reciprocal %44 {approx = true} : vector<128x1xf32> -> vector<128x1xf32>
    %46 = vector.broadcast %45 : vector<128x1xf32> to vector<128x64xf32>
    %47 = arith.mulf %42, %46 : vector<128x64xf32>
    %48 = arith.truncf %47 : vector<128x64xf32> to vector<128x64xbf16>
    %49 = vector.extract_strided_slice %6 {offsets = [8, 0], sizes = [8, 32], strides = [1, 1]} : vector<32x32xbf16> to vector<8x32xbf16>
    %cst_23 = arith.constant dense<0.000000e+00> : vector<64x32xf32>
    %50 = tpu.matmul %36, %49, %cst_23 {dimension_numbers = #tpu.dot_dimension_numbers<[1], [0], [0], [1], [0, 0, 1, 1], [], []>} : vector<64x8xbf16>, vector<8x32xbf16>, vector<64x32xf32> -> vector<64x32xf32>
    %51 = arith.truncf %50 : vector<64x32xf32> to vector<64x32xbf16>
    %cst_24 = arith.constant dense<0.000000e+00> : vector<128x32xf32>
    %52 = tpu.matmul %48, %51, %cst_24 {dimension_numbers = #tpu.dot_dimension_numbers<[1], [0], [0], [1], [0, 0, 1, 1], [], []>} : vector<128x64xbf16>, vector<64x32xbf16>, vector<128x32xf32> -> vector<128x32xf32>
    %53 = arith.addf %33, %52 : vector<128x32xf32>
    %54 = vector.extract_strided_slice %12 {offsets = [0, 16], sizes = [128, 8], strides = [1, 1]} : vector<128x32xbf16> to vector<128x8xbf16>
    %55 = vector.extract_strided_slice %3 {offsets = [0, 16], sizes = [64, 8], strides = [1, 1]} : vector<64x32xbf16> to vector<64x8xbf16>
    %56 = vector.extract_strided_slice %5 {offsets = [0, 16], sizes = [64, 8], strides = [1, 1]} : vector<64x32xbf16> to vector<64x8xbf16>
    %cst_25 = arith.constant dense<0.000000e+00> : vector<128x64xf32>
    %57 = tpu.matmul %54, %55, %cst_25 {dimension_numbers = #tpu.dot_dimension_numbers<[1], [1], [0], [0], [0, 0, 1, 0], [], []>} : vector<128x8xbf16>, vector<64x8xbf16>, vector<128x64xf32> -> vector<128x64xf32>
    %cst_26 = arith.constant dense<0xFF800000> : vector<128xf32>
    %58 = vector.multi_reduction <maximumf>, %57, %cst_26 [1] : vector<128x64xf32> to vector<128xf32>
    %59 = vector.shape_cast %58 : vector<128xf32> to vector<128x1xf32>
    %60 = vector.broadcast %59 : vector<128x1xf32> to vector<128x64xf32>
    %61 = arith.subf %57, %60 : vector<128x64xf32>
    %62 = math.exp %61 : vector<128x64xf32>
    %cst_27 = arith.constant dense<0.000000e+00> : vector<128xf32>
    %63 = vector.multi_reduction <add>, %62, %cst_27 [1] : vector<128x64xf32> to vector<128xf32>
    %64 = vector.shape_cast %63 : vector<128xf32> to vector<128x1xf32>
    %65 = tpu.reciprocal %64 {approx = true} : vector<128x1xf32> -> vector<128x1xf32>
    %66 = vector.broadcast %65 : vector<128x1xf32> to vector<128x64xf32>
    %67 = arith.mulf %62, %66 : vector<128x64xf32>
    %68 = arith.truncf %67 : vector<128x64xf32> to vector<128x64xbf16>
    %69 = vector.extract_strided_slice %6 {offsets = [16, 0], sizes = [8, 32], strides = [1, 1]} : vector<32x32xbf16> to vector<8x32xbf16>
    %cst_28 = arith.constant dense<0.000000e+00> : vector<64x32xf32>
    %70 = tpu.matmul %56, %69, %cst_28 {dimension_numbers = #tpu.dot_dimension_numbers<[1], [0], [0], [1], [0, 0, 1, 1], [], []>} : vector<64x8xbf16>, vector<8x32xbf16>, vector<64x32xf32> -> vector<64x32xf32>
    %71 = arith.truncf %70 : vector<64x32xf32> to vector<64x32xbf16>
    %cst_29 = arith.constant dense<0.000000e+00> : vector<128x32xf32>
    %72 = tpu.matmul %68, %71, %cst_29 {dimension_numbers = #tpu.dot_dimension_numbers<[1], [0], [0], [1], [0, 0, 1, 1], [], []>} : vector<128x64xbf16>, vector<64x32xbf16>, vector<128x32xf32> -> vector<128x32xf32>
    %73 = arith.addf %53, %72 : vector<128x32xf32>
    %74 = vector.extract_strided_slice %12 {offsets = [0, 24], sizes = [128, 8], strides = [1, 1]} : vector<128x32xbf16> to vector<128x8xbf16>
    %75 = vector.extract_strided_slice %3 {offsets = [0, 24], sizes = [64, 8], strides = [1, 1]} : vector<64x32xbf16> to vector<64x8xbf16>
    %76 = vector.extract_strided_slice %5 {offsets = [0, 24], sizes = [64, 8], strides = [1, 1]} : vector<64x32xbf16> to vector<64x8xbf16>
    %cst_30 = arith.constant dense<0.000000e+00> : vector<128x64xf32>
    %77 = tpu.matmul %74, %75, %cst_30 {dimension_numbers = #tpu.dot_dimension_numbers<[1], [1], [0], [0], [0, 0, 1, 0], [], []>} : vector<128x8xbf16>, vector<64x8xbf16>, vector<128x64xf32> -> vector<128x64xf32>
    %cst_31 = arith.constant dense<0xFF800000> : vector<128xf32>
    %78 = vector.multi_reduction <maximumf>, %77, %cst_31 [1] : vector<128x64xf32> to vector<128xf32>
    %79 = vector.shape_cast %78 : vector<128xf32> to vector<128x1xf32>
    %80 = vector.broadcast %79 : vector<128x1xf32> to vector<128x64xf32>
    %81 = arith.subf %77, %80 : vector<128x64xf32>
    %82 = math.exp %81 : vector<128x64xf32>
    %cst_32 = arith.constant dense<0.000000e+00> : vector<128xf32>
    %83 = vector.multi_reduction <add>, %82, %cst_32 [1] : vector<128x64xf32> to vector<128xf32>
    %84 = vector.shape_cast %83 : vector<128xf32> to vector<128x1xf32>
    %85 = tpu.reciprocal %84 {approx = true} : vector<128x1xf32> -> vector<128x1xf32>
    %86 = vector.broadcast %85 : vector<128x1xf32> to vector<128x64xf32>
    %87 = arith.mulf %82, %86 : vector<128x64xf32>
    %88 = arith.truncf %87 : vector<128x64xf32> to vector<128x64xbf16>
    %89 = vector.extract_strided_slice %6 {offsets = [24, 0], sizes = [8, 32], strides = [1, 1]} : vector<32x32xbf16> to vector<8x32xbf16>
    %cst_33 = arith.constant dense<0.000000e+00> : vector<64x32xf32>
    %90 = tpu.matmul %76, %89, %cst_33 {dimension_numbers = #tpu.dot_dimension_numbers<[1], [0], [0], [1], [0, 0, 1, 1], [], []>} : vector<64x8xbf16>, vector<8x32xbf16>, vector<64x32xf32> -> vector<64x32xf32>
    %91 = arith.truncf %90 : vector<64x32xf32> to vector<64x32xbf16>
    %cst_34 = arith.constant dense<0.000000e+00> : vector<128x32xf32>
    %92 = tpu.matmul %88, %91, %cst_34 {dimension_numbers = #tpu.dot_dimension_numbers<[1], [0], [0], [1], [0, 0, 1, 1], [], []>} : vector<128x64xbf16>, vector<64x32xbf16>, vector<128x32xf32> -> vector<128x32xf32>
    %93 = arith.addf %73, %92 : vector<128x32xf32>
    %c0_35 = arith.constant 0 : index
    %c0_36 = arith.constant 0 : index
    %94 = vector.load %arg8[%c0_35, %c0_36] : memref<1x32xf32, #tpu.memory_space<vmem>>, vector<1x32xf32>
    %95 = vector.broadcast %94 : vector<1x32xf32> to vector<128x32xf32>
    %96 = arith.addf %93, %95 : vector<128x32xf32>
    %97 = tpu.transpose %96, [1, 0] : vector<128x32xf32> -> vector<32x128xf32>
    %98 = arith.truncf %97 : vector<32x128xf32> to vector<32x128xbf16>
    %c0_37 = arith.constant 0 : index
    %c0_38 = arith.constant 0 : index
    %c0_39 = arith.constant 0 : index
    %99 = vector.load %arg9[%c0_37, %c0_38, %c0_39] : memref<1x32x128xbf16, #tpu.memory_space<vmem>>, vector<1x32x128xbf16>
    %100 = vector.shape_cast %99 : vector<1x32x128xbf16> to vector<32x128xbf16>
    %101 = vector.shape_cast %98 : vector<32x128xbf16> to vector<1x32x128xbf16>
    tpu.vector_store %arg9[%c0_37, %c0_38, %c0_39], %101 {strides = array<i32>} : memref<1x32x128xbf16, #tpu.memory_space<vmem>>, vector<1x32x128xbf16>,
    return
  }
  func.func @transform_0(%arg0: i32, %arg1: i32) -> (i32, i32, i32) {
    %c0_i32 = arith.constant 0 : i32
    %c0_i32_0 = arith.constant 0 : i32
    return %arg0, %arg1, %c0_i32 : i32, i32, i32
  }
  func.func @transform_1(%arg0: i32, %arg1: i32) -> (i32, i32, i32) {
    %c0_i32 = arith.constant 0 : i32
    %c0_i32_0 = arith.constant 0 : i32
    %c0_i32_1 = arith.constant 0 : i32
    return %arg0, %c0_i32, %c0_i32_0 : i32, i32, i32
  }
  func.func @transform_2(%arg0: i32, %arg1: i32) -> (i32, i32, i32) {
    %c0_i32 = arith.constant 0 : i32
    %c0_i32_0 = arith.constant 0 : i32
    %c0_i32_1 = arith.constant 0 : i32
    return %arg0, %c0_i32, %c0_i32_0 : i32, i32, i32
  }
  func.func @transform_3(%arg0: i32, %arg1: i32) -> (i32, i32) {
    %c0_i32 = arith.constant 0 : i32
    %c0_i32_0 = arith.constant 0 : i32
    %c0_i32_1 = arith.constant 0 : i32
    return %c0_i32, %c0_i32_0 : i32, i32
  }
  func.func @transform_4(%arg0: i32, %arg1: i32) -> (i32, i32) {
    %c0_i32 = arith.constant 0 : i32
    %c0_i32_0 = arith.constant 0 : i32
    %c0_i32_1 = arith.constant 0 : i32
    return %c0_i32, %c0_i32_0 : i32, i32
  }
  func.func @transform_5(%arg0: i32, %arg1: i32) -> (i32, i32) {
    %c0_i32 = arith.constant 0 : i32
    %c0_i32_0 = arith.constant 0 : i32
    %c0_i32_1 = arith.constant 0 : i32
    return %c0_i32, %c0_i32_0 : i32, i32
  }
  func.func @transform_6(%arg0: i32, %arg1: i32) -> (i32, i32) {
    %c0_i32 = arith.constant 0 : i32
    %c0_i32_0 = arith.constant 0 : i32
    %c0_i32_1 = arith.constant 0 : i32
    return %c0_i32, %c0_i32_0 : i32, i32
  }
  func.func @transform_7(%arg0: i32, %arg1: i32) -> (i32, i32, i32) {
    %c0_i32 = arith.constant 0 : i32
    %c0_i32_0 = arith.constant 0 : i32
    return %arg0, %c0_i32, %arg1 : i32, i32, i32
  }
}

</mosaic_0001>

<bundles_post_ra>
// kernel: efficient_mha_forward.2
= control target key start
LH: loop header
LB: loop body
LE: loop exit
PB: predicated region body
PF: predicated region fallthrough
CT: control target
= control target key end

     0   :  { %s979_s30 = smov 0   ;;  %s1067_s0 = inlined_call_operand.vmem [shape: bf16[128,128], index: 0, kind: input, shape index: {}]   ;;  %s1068_s1 = inlined_call_operand.vmem [shape: bf16[128,32], index: 1, kind: input, shape index: {}]   ;;  %s1069_s2 = inlined_call_operand.vmem [shape: f32[1,32], index: 2, kind: input, shape index: {}]   ;;  %s1070_s3 = inlined_call_operand.vmem [shape: f32[1,32], index: 3, kind: input, shape index: {}]   ;;  %s1071_s4 = inlined_call_operand.vmem [shape: f32[1,32], index: 4, kind: input, shape index: {}]   ;;  %s1072_s5 = inlined_call_operand.vmem [shape: bf16[32,64], index: 5, kind: input, shape index: {}]   ;;  %s1073_s6 = inlined_call_operand.vmem [shape: f32[1,32], index: 6, kind: input, shape index: {}]   ;;  %s1074_s7 = inlined_call_operand.vmem [shape: f32[1,32], index: 7, kind: input, shape index: {}]   ;;  %s1075_s8 = inlined_call_operand.vmem [shape: bf16[128,32], index: 8, kind: output, shape index: {0}]   ;;  %s1076_s9 = inlined_call_operand.vmem [shape: bf16[128,32], index: 9, kind: output, shape index: {1}]  }
   0x1 LB: > { %s799_s10 = sadd.s32 4294967295, %s925_s30   ;;  %p803_p0 = scmp.ge.s32.totalorder %s925_s30, 1  ;;  %s925_s30 = sphi %s979_s30, %s20_s30  }
   0x2   : > { %p291_p1 = scmp.lt.s32.totalorder %s925_s30, 5 }
   0x4   : > { %p292_p2 = pnand %p803_p0, %p291_p1 }
   0x5   : > { %s804_s13 = sshll.u32 (!%p292_p2), %s799_s10, 2  ;;  %s928_s11 = smov (!%p292_p2), 96  }
   0x6   : > { %295 = sbr.rel (%p292_p2) target bundleno = 883 (0x373), region = 52  ;;  %p333_p3 = scmp.lt.s32.totalorder (!%p292_p2), %s804_s13, 15 }
   0xb   : > { %v899_v0 = vld [vmem:[%s1068_s1 + $0x38] sm:$0xff]   ;;  %v900_v1 = vld [vmem:[%s1068_s1 + $0x30] sm:$0xff]   ;;  %s1078_s13 = smov (!%p333_p3, %s804_s13), 15  ;;  %v901_v2 = vld [vmem:[%s1068_s1 + $0x28] sm:$0xff]   ;;  %vm487_vm0 = vcmask 261120   ;;  %vm663_vm1 = vcmask 257024  }
   0xc   : > { %861 = vmatprep.subr.bf16.mxu0 %v899_v0  ;;  %s996_s18 = sshll.u32 %s1078_s13, 2  ;;  %v902_v3 = vld [vmem:[%s1068_s1 + $0x20] sm:$0xff]   ;;  %v903_v5 = vld [vmem:[%s1068_s1 + $0x18] sm:$0xff]   ;;  %v904_v6 = vld [vmem:[%s1068_s1 + $0x10] sm:$0xff]  }
   0xd   : > { %862 = vmatpush3.bf16.msra.mxu0 %v899_v0  ;;  %s336_s21 = scalar_lea.vmem %s1067_s0, %s996_s18  ;;  %v905_v7 = vld [vmem:[%s1068_s1 + $0x8] sm:$0xff]   ;;  %v906_v8 = vld [vmem:[%s1068_s1] sm:$0xff]   ;;  %s342_s10 = scalar_lea.vmem %s1075_s8, %s996_s18 }
   0xe   : > { %863 = vmatprep.subr.bf16.mxu0 %v900_v1  ;;  %v907_v4 = vld [vmem:[%s336_s21] sm:$0xff]   ;;  %v908_v9 = vld [vmem:[%s336_s21 + $0x8] sm:$0xff]   ;;  %s927_s21 = smov 32   ;;  %s348_s14 = scalar_lea.vmem %s1076_s9, %s996_s18 }
   0xf   : > { %877 = vmatprep.mubr.bf16.mxu0 %v907_v4  ;;  %v810_v10 = vld [vmem:[%s1069_s2] ss:$0 sm:$0xff]  ;;  %v909_v43 = vld [vmem:[%s1072_s5 + $0x8] sm:$0xff]  }
  0x10   : > { %v910_v44 = vld [vmem:[%s1072_s5] sm:$0xff]   ;;  %881 = vmatprep.subr.bf16.mxu1 %v909_v43 }
  0x11   : > { %864 = vmatpush3.bf16.msra.mxu0 %v900_v1  ;;  %882 = vmatpush3.bf16.msra.mxu1 %v909_v43  ;;  %v832_v45 = vld [vmem:[%s1074_s7] ss:$0 sm:$0xff] }
  0x12   : > { %865 = vmatprep.subr.bf16.mxu0 %v901_v2  ;;  %883 = vmatprep.subr.bf16.mxu1 %v910_v44  ;;  %v821_v60 = vld [vmem:[%s1070_s3] ss:$0 sm:$0xff] }
  0x13   : > { %v822_v1 = vld [vmem:[%s1071_s4] ss:$0 sm:$0xff] }
  0x15   : > { %866 = vmatpush3.bf16.msra.mxu0 %v901_v2  ;;  %884 = vmatpush3.bf16.msra.mxu1 %v910_v44 }
  0x16   : > { %867 = vmatprep.subr.bf16.mxu0 %v902_v3 }
  0x19   : > { %868 = vmatpush3.bf16.msra.mxu0 %v902_v3 }
  0x1a   : > { %869 = vmatprep.subr.bf16.mxu0 %v903_v5 }
  0x1d   : > { %870 = vmatpush3.bf16.msra.mxu0 %v903_v5 }
  0x1e   : > { %871 = vmatprep.subr.bf16.mxu0 %v904_v6 }
  0x21   : > { %872 = vmatpush3.bf16.msra.mxu0 %v904_v6 }
  0x22   : > { %873 = vmatprep.subr.bf16.mxu0 %v905_v7 }
  0x25   : > { %874 = vmatpush3.bf16.msra.mxu0 %v905_v7 }
  0x26   : > { %875 = vmatprep.subr.bf16.mxu0 %v906_v8 }
  0x29   : > { %876 = vmatpush3.bf16.msra.mxu0 %v906_v8 }
  0x2c   : > { %878 = vmatmul.mubr.bf16.vlgmr.msra.gmra.mxu0 %v908_v9 }
  0xec   : > { %v879_v11 = vpop.f32.mrf.mxu0 }
  0xed   : > { %v481_v12 = vadd.f32 %v879_v11, %v810_v10 }
  0xee   : > { %v472_v13 = vpop.f32.mrf.mxu0 }
  0xef   : > { %v473_v14 = vadd.f32 %v810_v10, %v472_v13  ;;  %v494_v15 = vsel %vm487_vm0, %v481_v12, 0.0 }
  0xf0   : > { %495 = vadd.xlane.f32.xlu1 %v494_v15  ;;  %v880_v16 = vpop.f32.mrf.mxu0 }
  0xf1   : > { %v484_v17 = vadd.f32 %v880_v16, %v810_v10  ;;  %v488_v18 = vsel %vm487_vm0, %v473_v14, 0.0 }
  0xf2   : > { %v475_v19 = vpop.f32.mrf.mxu0  ;;  %489 = vadd.xlane.f32.xlu0 %v488_v18 }
  0xf3   : > { %v476_v20 = vadd.f32 %v810_v10, %v475_v19  ;;  %v497_v21 = vsel %vm487_vm0, %v484_v17, 0.0 }
  0xf4   : > { %498 = vadd.xlane.f32.xlu1 %v497_v21 }
  0xf5   : > { %v491_v22 = vsel %vm487_vm0, %v476_v20, 0.0 }
  0xf6   : > { %492 = vadd.xlane.f32.xlu0 %v491_v22 }
 0x179   : > { %v496_v23 = vpop.xlane.xlu1 %495 }
 0x17a   : > { %v503_v24 = vmul.f32 0.03125, %v496_v23 }
 0x17b   : > { %v490_v25 = vpop.xlane.xlu0 %489 }
 0x17c   : > { %v501_v26 = vmul.f32 0.03125, %v490_v25  ;;  %v507_v28 = vsub.f32 %v481_v12, %v503_v24 }
 0x17d   : > { %v499_v27 = vpop.xlane.xlu1 %498 }
 0x17e   : > { %v505_v29 = vsub.f32 %v473_v14, %v501_v26  ;;  %v504_v30 = vmul.f32 0.03125, %v499_v27  ;;  %v511_v37 = vmul.f32 %v507_v28, %v507_v28  ;;  %v827_v14 = vld [vmem:[%s1073_s6] ss:$0 sm:$0xff] }
 0x17f   : > { %v493_v31 = vpop.xlane.xlu0 %492 }
 0x180   : > { %v502_v32 = vmul.f32 0.03125, %v493_v31  ;;  %v509_v33 = vmul.f32 %v505_v29, %v505_v29  ;;  %v508_v34 = vsub.f32 %v484_v17, %v504_v30  ;;  %v519_v39 = vsel %vm487_vm0, %v511_v37, 0.0 }
 0x182   : > { %v506_v35 = vsub.f32 %v476_v20, %v502_v32  ;;  %v513_v36 = vsel %vm487_vm0, %v509_v33, 0.0  ;;  %v512_v41 = vmul.f32 %v508_v34, %v508_v34 }
 0x183   : > { %514 = vadd.xlane.f32.xlu0 %v513_v36 }
 0x184   : > { %v510_v38 = vmul.f32 %v506_v35, %v506_v35  ;;  %v522_v42 = vsel %vm487_vm0, %v512_v41, 0.0 }
 0x186   : > { %v516_v40 = vsel %vm487_vm0, %v510_v38, 0.0 }
 0x187   : > { %520 = vadd.xlane.f32.xlu0 %v519_v39  ;;  %517 = vadd.xlane.f32.xlu1 %v516_v40 }
 0x18b   : > { %523 = vadd.xlane.f32.xlu1 %v522_v42 }
 0x19d   : > { %674 = vrot.lane.b32.xlu0 %v832_v45, %s927_s21 }
 0x20c   : > { %v515_v46 = vpop.xlane.xlu0 %514 }
 0x20d   : > { %v525_v47 = vmul.f32 0.03125, %v515_v46 }
 0x20f   : > { %v529_v48 = vadd.f32 1e-05, %v525_v47 }
 0x210   : > { %v518_v49 = vpop.xlane.xlu1 %517  ;;  %v521_v50 = vpop.xlane.xlu0 %520 }
 0x211   : > { %911 = vrsqrt.f32 %v529_v48  ;;  %v526_v51 = vmul.f32 0.03125, %v518_v49  ;;  %v527_v52 = vmul.f32 0.03125, %v521_v50 }
 0x213   : > { %v530_v53 = vadd.f32 1e-05, %v526_v51  ;;  %v531_v54 = vadd.f32 1e-05, %v527_v52 }
 0x214   : > { %v524_v55 = vpop.xlane.xlu1 %523  ;;  %v675_v17 = vpop.permute.xlu0 %674 }
 0x215   : > { %913 = vrsqrt.f32 %v530_v53  ;;  %v528_v56 = vmul.f32 0.03125, %v524_v55 }
 0x216   : > { %915 = vrsqrt.f32 %v531_v54 }
 0x217   : > { %v532_v57 = vadd.f32 1e-05, %v528_v56 }
 0x219   : > { %917 = vrsqrt.f32 %v532_v57 }
 0x21e   : > { %v912_v58 = vpop.eup %911 }
 0x21f   : > { %v537_v59 = vmul.f32 %v912_v58, %v505_v29 }
 0x221   : > { %v548_v0 = vmul.f32 %v821_v60, %v537_v59 }
 0x222   : > { %v914_v61 = vpop.eup %913 }
 0x223   : > { %v916_v62 = vpop.eup %915  ;;  %v538_v63 = vmul.f32 %v914_v61, %v506_v35  ;;  %v559_v5 = vadd.f32 %v822_v1, %v548_v0 }
 0x224   : > { %v539_v2 = vmul.f32 %v916_v62, %v507_v28 }
 0x225   : > { %v549_v3 = vmul.f32 %v821_v60, %v538_v63 }
 0x226   : > { %v918_v4 = vpop.eup %917  ;;  %v550_v8 = vmul.f32 %v821_v60, %v539_v2 }
 0x227   : > { %v560_v6 = vadd.f32 %v822_v1, %v549_v3  ;;  %v540_v7 = vmul.f32 %v918_v4, %v508_v34 }
 0x228   : > { %v561_v11 = vadd.f32 %v822_v1, %v550_v8 }
 0x229   : > { %v563_v9 = vpack.c.bf16 %v560_v6, %v559_v5  ;;  %v551_v10 = vmul.f32 %v821_v60, %v540_v7 }
 0x22b   : > { %885 = vmatprep.mubr.msk.bf16.mxu1 %vm487_vm0, %v563_v9  ;;  %v562_v12 = vadd.f32 %v822_v1, %v551_v10 }
 0x22d   : > { %v564_v13 = vpack.c.bf16 %v562_v12, %v561_v11 }
 0x22f   : > { %886 = vmatmul.mubr.msk.bf16.vlgmr.msra.gmra.mxu1 %vm487_vm0, %v564_v13 }
 0x2ef   : > { %v887_v15 = vpop.f32.mrf.mxu1 }
 0x2f0   : > { %v645_v16 = vadd.f32 %v887_v15, %v827_v14  ;;  %v679_v34 = vadd.f32 %v887_v15, %v675_v17 }
 0x2f1   : > { %v621_v18 = vpop.f32.mrf.mxu1 }
 0x2f2   : > { %v841_v19 = vpack.c.bf16 %v645_v16, %v645_v16  ;;  %v643_v20 = vadd.f32 %v827_v14, %v621_v18  ;;  %v677_v21 = vadd.f32 %v675_v17, %v621_v18  ;;  %v845_v35 = vpack.c.bf16 %v679_v34, %v679_v34 }
 0x2f3   : > { %v888_v22 = vpop.f32.mrf.mxu1 }
 0x2f4   : > { %666 = vst.msk [vmem:[%s342_s10 + $0x8] sm:$0xf] %vm663_vm1, %v841_v19  ;;  %v839_v23 = vpack.c.bf16 %v643_v20, %v643_v20  ;;  %v843_v24 = vpack.c.bf16 %v677_v21, %v677_v21  ;;  %v646_v25 = vadd.f32 %v888_v22, %v827_v14  ;;  %v680_v26 = vadd.f32 %v888_v22, %v675_v17 }
 0x2f5   : > { %v624_v27 = vpop.f32.mrf.mxu1 }
 0x2f6   : > { %664 = vst.msk [vmem:[%s342_s10] sm:$0xf] %vm663_vm1, %v839_v23  ;;  %v842_v28 = vpack.c.bf16 %v646_v25, %v646_v25  ;;  %v846_v29 = vpack.c.bf16 %v680_v26, %v680_v26  ;;  %v644_v30 = vadd.f32 %v827_v14, %v624_v27  ;;  %v678_v31 = vadd.f32 %v675_v17, %v624_v27 }
 0x2f7   : > { %693 = vrot.lane.b32.xlu1 %v843_v24, %s928_s11 }
 0x2f8   : > { %667 = vst.msk [vmem:[%s342_s10 + $0xc] sm:$0xf] %vm663_vm1, %v842_v28  ;;  %v840_v32 = vpack.c.bf16 %v644_v30, %v644_v30  ;;  %v844_v33 = vpack.c.bf16 %v678_v31, %v678_v31  ;;  %699 = vrot.lane.b32.xlu0 %v846_v29, %s928_s11 }
 0x2fa   : > { %665 = vst.msk [vmem:[%s342_s10 + $0x4] sm:$0xf] %vm663_vm1, %v840_v32 }
 0x2fb   : > { %695 = vrot.lane.b32.xlu1 %v844_v33, %s928_s11 }
 0x2ff   : > { %697 = vrot.lane.b32.xlu1 %v845_v35, %s928_s11 }
 0x369   : > { %v694_v36 = vpop.permute.xlu1 %693 }
 0x36a   : > { %705 = vst.msk [vmem:[%s348_s14] sm:$0xf] %vm663_vm1, %v694_v36  ;;  %v700_v37 = vpop.permute.xlu0 %699 }
 0x36b   : > { %708 = vst.msk [vmem:[%s348_s14 + $0xc] sm:$0xf] %vm663_vm1, %v700_v37 }
 0x36d   : > { %v696_v38 = vpop.permute.xlu1 %695 }
 0x36e   : > { %706 = vst.msk [vmem:[%s348_s14 + $0x4] sm:$0xf] %vm663_vm1, %v696_v38 }
 0x371   : > { %v698_v39 = vpop.permute.xlu1 %697 }
 0x372   : > { %707 = vst.msk [vmem:[%s348_s14 + $0x8] sm:$0xf] %vm663_vm1, %v698_v39 }
 0x373 PF: > { %s20_s30 = sadd.s32 1, %s925_s30  }
 0x374   : > { %p17_p4 = scmp.ge.s32.totalorder %s20_s30, 6  }
 0x376   :  { %19 = sbr.rel (!%p17_p4) target bundleno = 1 (0x1), region = 94 }

// kernel: efficient_mha_forward.3
= control target key start
LH: loop header
LB: loop body
LE: loop exit
PB: predicated region body
PF: predicated region fallthrough
CT: control target
= control target key end

     0   :  { %s4070_s24 = smov 0   ;;  %s4072_s25 = smov 0   ;;  %s5352_s0 = inlined_call_operand.vmem [shape: bf16[2,256,32], index: 0, kind: input, shape index: {}]   ;;  %s5353_s1 = inlined_call_operand.vmem [shape: bf16[2,64,32], index: 1, kind: input, shape index: {}]   ;;  %s5354_s2 = inlined_call_operand.vmem [shape: bf16[2,64,32], index: 2, kind: input, shape index: {}]   ;;  %s5355_s3 = inlined_call_operand.vmem [shape: bf16[32,32], index: 3, kind: input, shape index: {}]   ;;  %s5356_s4 = inlined_call_operand.vmem [shape: f32[1,32], index: 4, kind: input, shape index: {}]   ;;  %s5357_s5 = inlined_call_operand.vmem [shape: bf16[32,32], index: 5, kind: input, shape index: {}]   ;;  %s5358_s6 = inlined_call_operand.vmem [shape: f32[1,32], index: 6, kind: input, shape index: {}]   ;;  %s5359_s7 = inlined_call_operand.vmem [shape: bf16[2,32,256], index: 7, kind: output, shape index: {}]  }
   0x1   :  { %s4074_s26 = smov 0   ;;  %s4076_s27 = smov 0  }
   0x2   :  { %s4078_s28 = smov 0   ;;  %s4080_s29 = smov 0  }
   0x3   :  { %s4082_s30 = smov 0  }
   0x4 LB: > { %s26_s8 = sadd.s32 1, %s4017_s28  ;;  %s29_s9 = sadd.s32 1, %s4021_s29  ;;  %s4025_s30 = sphi %s4082_s30, %s17_s30   ;;  %s4021_s29 = sphi %s4080_s29, %s5371_s29   ;;  %s4017_s28 = sphi %s4078_s28, %s5370_s28   ;;  %s4013_s27 = sphi %s4076_s27, %s5369_s27   ;;  %s4009_s26 = sphi %s4074_s26, %s5368_s26   ;;  %s4005_s25 = sphi %s4072_s25, %s5367_s25   ;;  %s4001_s24 = sphi %s4070_s24, %s5366_s24  }
   0x5   : > { %p27_p0 = scmp.ge.s32.totalorder %s26_s8, 2  ;;  %s3073_s10 = sadd.s32 4294967295, %s4025_s30  }
   0x6   : > { %p212_p1 = scmp.ne.s32.totalorder %s4005_s25, %s4001_s24  ;;  %p213_p2 = scmp.eq.s32.totalorder %s3073_s10, 3 }
   0x7   : > { %s5373_s8 = smov (%p27_p0, %s26_s8), 0  ;;  %s5375_s9 = smov (!%p27_p0, %s29_s9), %s4021_s29 }
   0x8   : > { %s198_s11 = ssub.s32 %s4017_s28, %s5373_s8  ;;  %p31_p3 = scmp.ge.s32.totalorder %s5375_s9, 2 }
   0x9   : > { %p3077_p4 = scmp.ge.s32.totalorder %s4025_s30, 1  ;;  %p4116_p5 = por %p213_p2, %p212_p1 }
   0xa   : > { %p278_p6 = scmp.lt.s32.totalorder %s4025_s30, 5  ;;  %s5377_s9 = smov (%p31_p3, %s5375_s9), 0 }
   0xb   : > { %s197_s13 = ssub.s32 %s4021_s29, %s5377_s9  ;;  %s202_s15 = sadd.s32 1, %s4005_s25 }
   0xc   : > { %p279_p7 = pnand %p3077_p4, %p278_p6  ;;  %s199_s14 = sor.u32 %s198_s11, %s197_s13 }
   0xd   : > { %p200_p8 = scmp.eq.s32.totalorder %s199_s14, 0 }
   0xe   : > { %282 = sbr.rel (%p279_p7) target bundleno = 2330 (0x91a), region = 48 }
   0xf   : > { %s4127_s16 = scalar_select %p200_p8, %s4005_s25, %s202_s15  }
  0x13   : > { %v3689_v0 = vld [vmem:[%s5355_s3 + $0x8] sm:$0xff]   ;;  %s3079_s19 = sshll.u32 %s4009_s26, 4  ;;  %v3690_v1 = vld [vmem:[%s5355_s3] sm:$0xff]   ;;  %p324_p9 = scmp.lt.s32.totalorder %s4013_s27, 1  ;;  %vm593_vm0 = vcmask 64512   ;;  %vm443_vm1 = vcmask 261120  }
  0x14   : > { %3346 = vmatprep.subr.bf16.mxu1 %v3689_v0  ;;  %p326_p10 = scmp.lt.s32.totalorder %s3079_s19, 31  ;;  %v4219_v21 = vld [vmem:[%s5356_s4] ss:$0 sm:$0xff]  ;;  %vm944_vm2 = vcmask 1043456   ;;  %vm727_vm3 = vcmask 523264   ;;  %s3199_s18 = sshll.u32 (%p4116_p5), %s4013_s27, 3 }
  0x15   : > { %3347 = vmatpush3.bf16.msra.mxu1 %v3689_v0  ;;  %s325_s22 = scalar_select %p324_p9, %s4013_s27, 1  ;;  %v376_v56 = vld [vmem:[%s5357_s5] sm:$0xf] }
  0x16   : > { %3348 = vmatprep.subr.bf16.mxu1 %v3690_v1  ;;  %s5379_s19 = smov (!%p326_p10, %s3079_s19), 31  ;;  %3610 = vmatprep.subr.msk.bf16.mxu0 %vm944_vm2, %v376_v56  ;;  %v946_v59 = vsel %vm944_vm2, %v376_v56, 0 }
  0x17   : > { %s4138_s23 = sshll.u32 %s325_s22, 5  ;;  %3391 = vmatpush3.bf16.msra.mxu0 %v946_v59  ;;  %s4029_s22 = smov 104  }
  0x18   : > { %s329_s10 = sadd.s32 %s4138_s23, %s5379_s19  ;;  %s4145_s14 = scalar_lea.vmem %s5353_s1, %s4138_s23 }
  0x19   : > { %3349 = vmatpush3.bf16.msra.mxu1 %v3690_v1  ;;  %s3081_s15 = sshll.u32 %s329_s10, 2  ;;  %v4148_v2 = vld [vmem:[%s4145_s14 + $0x18] sm:$0xff]   ;;  %v4156_v3 = vld [vmem:[%s4145_s14 + $0x10] sm:$0xff]   ;;  %s4027_s19 = smov 120   ;;  %v4177_v10 = vld [vmem:[%s4145_s14 + $0x8] sm:$0xff]  }
  0x1a   : > { %s4153_s20 = scalar_lea.vmem %s5352_s0, %s3081_s15  ;;  %1047 = vrot.lane.b32.xlu0 %v4148_v2, %s4027_s19  ;;  %3606 = vmatprep.subr.msk.bf16.mxu1 %vm593_vm0, %v4148_v2  ;;  %v628_v6 = vsel %vm593_vm0, %v4148_v2, 0  ;;  %v625_v11 = vsel %vm593_vm0, %v4156_v3, 0  ;;  %v622_v14 = vsel %vm593_vm0, %v4177_v10, 0  ;;  %v4196_v16 = vld [vmem:[%s4145_s14] sm:$0xff]   ;;  %s4208_s10 = scalar_lea.vmem %s5354_s2, %s4138_s23 }
  0x1b   : > { %v3691_v4 = vld [vmem:[%s4153_s20] sm:$0xff]   ;;  %v3692_v5 = vld [vmem:[%s4153_s20 + $0x8] sm:$0xff]   ;;  %v3693_v7 = vld [vmem:[%s4153_s20 + $0x10] sm:$0xff]   ;;  %1043 = vrot.lane.b32.xlu1 %v4177_v10, %s4027_s19  ;;  %v619_v17 = vsel %vm593_vm0, %v4196_v16, 0  ;;  %s320_s23 = sand.u32 1, %s4001_s24  }
  0x1c   : > { %3350 = vmatprep.mubr.msk.bf16.mxu1 %vm443_vm1, %v3691_v4  ;;  %v3694_v8 = vld [vmem:[%s4153_s20 + $0x18] sm:$0xff]   ;;  %v3695_v9 = vld [vmem:[%s4153_s20 + $0x20] sm:$0xff]   ;;  %v3696_v12 = vld [vmem:[%s4153_s20 + $0x28] sm:$0xff]   ;;  %s3078_s15 = sshll.u32 %s320_s23, 4 }
  0x1d   : > { %3351 = vmatmul.mubr.msk.bf16.vlgmr.msra.gmra.mxu1 %vm443_vm1, %v3692_v5  ;;  %v3697_v13 = vld [vmem:[%s4153_s20 + $0x30] sm:$0xff]   ;;  %v3698_v15 = vld [vmem:[%s4153_s20 + $0x38] sm:$0xff]   ;;  %v4211_v18 = vld [vmem:[%s4208_s10] sm:$0xff]   ;;  %s4028_s20 = smov 112   ;;  %s322_s17 = scalar_lea.vmem [#allocation2], %s3078_s15 }
  0x1e   : > { %3354 = vmatprep.mubr.msk.bf16.mxu1 %vm443_vm1, %v3693_v7  ;;  %3367 = vmatpush3.bf16.xpose.msra.mxu1 %v628_v6  ;;  %v3703_v0 = vld [vmem:[%s4208_s10 + $0x8] sm:$0xff]   ;;  %v3706_v4 = vld [vmem:[%s4208_s10 + $0x10] sm:$0xff]  }
  0x1f   : > { %1045 = vrot.lane.b32.xlu0 %v4156_v3, %s4027_s19  ;;  %3607 = vmatprep.subr.msk.bf16.mxu1 %vm593_vm0, %v4156_v3 }
  0x20   : > { %1041 = vrot.lane.b32.xlu1 %v4196_v16, %s4027_s19  ;;  %3392 = vmatprep.mubr.msk.bf16.mxu0 %vm593_vm0, %v4211_v18 }
  0x21   : > { %3393 = vmatmul.mubr.msk.bf16.vlgmr.msra.gmra.mxu0 %vm593_vm0, %v3703_v0 }
  0x22   : > { %3396 = vmatprep.mubr.msk.bf16.mxu0 %vm593_vm0, %v3706_v4 }
  0x25   : > { %3355 = vmatmul.mubr.msk.bf16.gmra.mxu1 %vm443_vm1, %v3694_v8 }
  0x26   : > { %3358 = vmatprep.mubr.msk.bf16.mxu1 %vm443_vm1, %v3695_v9  ;;  %3369 = vmatpush3.bf16.xpose.msra.mxu1 %v625_v11  ;;  %v3705_v11 = vld [vmem:[%s4208_s10 + $0x18] sm:$0xff]  }
  0x27   : > { %3608 = vmatprep.subr.msk.bf16.mxu1 %vm593_vm0, %v4177_v10 }
  0x29   : > { %3397 = vmatmul.mubr.msk.bf16.gmra.mxu0 %vm593_vm0, %v3705_v11 }
  0x2d   : > { %3359 = vmatmul.mubr.msk.bf16.gmra.mxu1 %vm443_vm1, %v3696_v12  ;;  %v377_v12 = vld [vmem:[%s5357_s5 + $0x4] sm:$0xf] }
  0x2e   : > { %3362 = vmatprep.mubr.msk.bf16.mxu1 %vm443_vm1, %v3697_v13  ;;  %3371 = vmatpush3.bf16.xpose.msra.mxu1 %v622_v14  ;;  %v1387_v13 = vsel %vm944_vm2, %v377_v12, 0 }
  0x2f   : > { %3609 = vmatprep.subr.msk.bf16.mxu1 %vm593_vm0, %v4196_v16  ;;  %3615 = vmatprep.subr.msk.bf16.mxu0 %vm944_vm2, %v377_v12 }
  0x30   : > { %3425 = vmatpush3.bf16.msra.mxu0 %v1387_v13 }
  0x35   : > { %3363 = vmatmul.mubr.msk.bf16.gmra.mxu1 %vm443_vm1, %v3698_v15 }
  0x36   : > { %3373 = vmatpush3.bf16.xpose.msra.mxu1 %v619_v17 }
  0x8c   : > { %v1048_v19 = vpop.permute.xlu0 %1047 }
  0x8d   : > { %3611 = vmatprep.subr.msk.bf16.mxu1 %vm593_vm0, %v1048_v19  ;;  %v1083_v33 = vsel %vm593_vm0, %v1048_v19, 0  ;;  %v1044_v47 = vpop.permute.xlu1 %1043 }
  0x8e   : > { %v1077_v58 = vsel %vm593_vm0, %v1044_v47, 0 }
  0x91   : > { %v1046_v35 = vpop.permute.xlu0 %1045 }
  0x92   : > { %v1080_v45 = vsel %vm593_vm0, %v1046_v35, 0  ;;  %v1042_v61 = vpop.permute.xlu1 %1041 }
  0x93   : > { %v1074_v9 = vsel %vm593_vm0, %v1042_v61, 0 }
  0xdd   : > { %v3352_v20 = vpop.f32.mrf.mxu1 }
  0xde   : > { %v511_v24 = vadd.f32 %v3352_v20, %v4219_v21 }
  0xdf   : > { %v502_v22 = vpop.f32.mrf.mxu1 }
  0xe0   : > { %v503_v27 = vadd.f32 %v4219_v21, %v502_v22 }
  0xe1   : > { %v3353_v23 = vpop.f32.mrf.mxu1 }
  0xe2   : > { %v514_v25 = vadd.f32 %v3353_v23, %v4219_v21 }
  0xe3   : > { %v505_v26 = vpop.f32.mrf.mxu1 }
  0xe4   : > { %v4224_v28 = vpack.c.bf16 %v514_v25, %v511_v24  ;;  %v506_v29 = vadd.f32 %v4219_v21, %v505_v26 }
  0xe5   : > { %v3356_v30 = vpop.f32.mrf.mxu1 }
  0xe6   : > { %v4227_v31 = vpack.c.bf16 %v506_v29, %v503_v27  ;;  %1027 = vrot.lane.b32.xlu1 %v4224_v28, %s4027_s19  ;;  %v527_v34 = vadd.f32 %v3356_v30, %v4219_v21 }
  0xe7   : > { %v518_v32 = vpop.f32.mrf.mxu1 }
  0xe8   : > { %1025 = vrot.lane.b32.xlu0 %v4227_v31, %s4027_s19  ;;  %3374 = vmatprep.mubr.msk.bf16.mxu1 %vm593_vm0, %v4227_v31  ;;  %v519_v39 = vadd.f32 %v4219_v21, %v518_v32 }
  0xe9   : > { %v3357_v36 = vpop.f32.mrf.mxu1  ;;  %3375 = vmatmul.mubr.msk.bf16.vlgmr.msra.gmra.mxu1 %vm593_vm0, %v4224_v28 }
  0xea   : > { %v530_v37 = vadd.f32 %v3357_v36, %v4219_v21  ;;  %3401 = vmatpush3.bf16.xpose.msra.mxu1 %v1083_v33  ;;  %v3394_v33 = vpop.f32.mrf.mxu0 }
  0xeb   : > { %v521_v38 = vpop.f32.mrf.mxu1  ;;  %3612 = vmatprep.subr.msk.bf16.mxu1 %vm593_vm0, %v1046_v35 }
  0xec   : > { %v4242_v40 = vpack.c.bf16 %v530_v37, %v527_v34  ;;  %v522_v41 = vadd.f32 %v4219_v21, %v521_v38  ;;  %v982_v34 = vpop.f32.mrf.mxu0 }
  0xed   : > { %v3360_v42 = vpop.f32.mrf.mxu1 }
  0xee   : > { %v4245_v43 = vpack.c.bf16 %v522_v41, %v519_v39  ;;  %1031 = vrot.lane.b32.xlu1 %v4242_v40, %s4027_s19  ;;  %v543_v46 = vadd.f32 %v3360_v42, %v4219_v21  ;;  %v3395_v35 = vpop.f32.mrf.mxu0 }
  0xef   : > { %v534_v44 = vpop.f32.mrf.mxu1 }
  0xf0   : > { %1029 = vrot.lane.b32.xlu0 %v4245_v43, %s4027_s19  ;;  %3378 = vmatprep.mubr.msk.bf16.mxu1 %vm593_vm0, %v4245_v43  ;;  %v535_v51 = vadd.f32 %v4219_v21, %v534_v44  ;;  %v985_v36 = vpop.f32.mrf.mxu0 }
  0xf1   : > { %v3361_v48 = vpop.f32.mrf.mxu1  ;;  %3379 = vmatmul.mubr.msk.bf16.gmra.mxu1 %vm593_vm0, %v4242_v40 }
  0xf2   : > { %v546_v49 = vadd.f32 %v3361_v48, %v4219_v21  ;;  %3403 = vmatpush3.bf16.xpose.msra.mxu1 %v1080_v45  ;;  %v3398_v37 = vpop.f32.mrf.mxu0  ;;  %v1014_v45 = vpack.c.bf16 %v3395_v35, %v3394_v33 }
  0xf3   : > { %v537_v50 = vpop.f32.mrf.mxu1  ;;  %3613 = vmatprep.subr.msk.bf16.mxu1 %vm593_vm0, %v1044_v47 }
  0xf4   : > { %v4260_v52 = vpack.c.bf16 %v546_v49, %v543_v46  ;;  %v538_v53 = vadd.f32 %v4219_v21, %v537_v50  ;;  %v998_v38 = vpop.f32.mrf.mxu0  ;;  %v1013_v46 = vpack.c.bf16 %v985_v36, %v982_v34 }
  0xf5   : > { %v3364_v54 = vpop.f32.mrf.mxu1 }
  0xf6   : > { %v4263_v55 = vpack.c.bf16 %v538_v53, %v535_v51  ;;  %1035 = vrot.lane.b32.xlu1 %v4260_v52, %s4027_s19  ;;  %v559_v60 = vadd.f32 %v3364_v54, %v4219_v21  ;;  %v3399_v39 = vpop.f32.mrf.mxu0 }
  0xf7   : > { %v550_v57 = vpop.f32.mrf.mxu1  ;;  %v1016_v41 = vpack.c.bf16 %v3399_v39, %v3398_v37 }
  0xf8   : > { %1033 = vrot.lane.b32.xlu0 %v4263_v55, %s4027_s19  ;;  %3382 = vmatprep.mubr.msk.bf16.mxu1 %vm593_vm0, %v4263_v55  ;;  %v551_v5 = vadd.f32 %v4219_v21, %v550_v57  ;;  %v1001_v42 = vpop.f32.mrf.mxu0 }
  0xf9   : > { %v3365_v62 = vpop.f32.mrf.mxu1  ;;  %3383 = vmatmul.mubr.msk.bf16.gmra.mxu1 %vm593_vm0, %v4260_v52  ;;  %v1015_v44 = vpack.c.bf16 %v1001_v42, %v998_v38 }
  0xfa   : > { %v562_v63 = vadd.f32 %v3365_v62, %v4219_v21  ;;  %3405 = vmatpush3.bf16.xpose.msra.mxu1 %v1077_v58 }
  0xfb   : > { %v553_v1 = vpop.f32.mrf.mxu1  ;;  %3614 = vmatprep.subr.msk.bf16.mxu1 %vm593_vm0, %v1042_v61 }
  0xfc   : > { %v4285_v6 = vpack.c.bf16 %v562_v63, %v559_v60  ;;  %v554_v7 = vadd.f32 %v4219_v21, %v553_v1 }
  0xfe   : > { %v4290_v8 = vpack.c.bf16 %v554_v7, %v551_v5  ;;  %1039 = vrot.lane.b32.xlu1 %v4285_v6, %s4027_s19 }
 0x100   : > { %5362 = vst [vmem:[#allocation3_spill] sm:$0xff] %v4290_v8  ;;  %1037 = vrot.lane.b32.xlu0 %v4290_v8, %s4027_s19  ;;  %3386 = vmatprep.mubr.msk.bf16.mxu1 %vm593_vm0, %v4290_v8 }
 0x101   : > { %3387 = vmatmul.mubr.msk.bf16.gmra.mxu1 %vm593_vm0, %v4285_v6 }
 0x102   : > { %1368 = vrot.lane.b32.xlu1 %v3703_v0, %s4027_s19  ;;  %3407 = vmatpush3.bf16.xpose.msra.mxu1 %v1074_v9 }
 0x103   : > { %3458 = vmatprep.subr.bf16.mxu1 %v1016_v41 }
 0x104   : > { %1366 = vrot.lane.b32.xlu0 %v4211_v18, %s4027_s19 }
 0x106   : > { %1372 = vrot.lane.b32.xlu1 %v3705_v11, %s4027_s19 }
 0x108   : > { %1370 = vrot.lane.b32.xlu0 %v3706_v4, %s4027_s19 }
 0x10a   : > { %1722 = vrot.lane.b32.xlu1 %v4148_v2, %s4028_s20 }
 0x10c   : > { %1720 = vrot.lane.b32.xlu0 %v4156_v3, %s4028_s20 }
 0x10e   : > { %1718 = vrot.lane.b32.xlu1 %v4177_v10, %s4028_s20 }
 0x110   : > { %1700 = vrot.lane.b32.xlu0 %v4227_v31, %s4028_s20 }
 0x112   : > { %1716 = vrot.lane.b32.xlu1 %v4196_v16, %s4028_s20 }
 0x116   : > { %1702 = vrot.lane.b32.xlu1 %v4224_v28, %s4028_s20 }
 0x158   : > { %v1028_v15 = vpop.permute.xlu1 %1027 }
 0x15a   : > { %v1026_v14 = vpop.permute.xlu0 %1025 }
 0x15b   : > { %3408 = vmatprep.mubr.msk.bf16.mxu1 %vm593_vm0, %v1026_v14 }
 0x15c   : > { %3409 = vmatmul.mubr.msk.bf16.vlgmr.msra.gmra.mxu1 %vm593_vm0, %v1028_v15 }
 0x15d   : > { %3459 = vmatpush3.bf16.msra.mxu1 %v1016_v41 }
 0x15e   : > { %3460 = vmatprep.subr.bf16.mxu1 %v1015_v44 }
 0x160   : > { %v1032_v3 = vpop.permute.xlu1 %1031 }
 0x161   : > { %3461 = vmatpush3.bf16.msra.mxu1 %v1015_v44 }
 0x162   : > { %v1030_v2 = vpop.permute.xlu0 %1029  ;;  %3462 = vmatprep.subr.bf16.mxu1 %v1014_v45 }
 0x163   : > { %3412 = vmatprep.mubr.msk.bf16.mxu1 %vm593_vm0, %v1030_v2 }
 0x164   : > { %3413 = vmatmul.mubr.msk.bf16.gmra.mxu1 %vm593_vm0, %v1032_v3 }
 0x165   : > { %3463 = vmatpush3.bf16.msra.mxu1 %v1014_v45 }
 0x166   : > { %3464 = vmatprep.subr.bf16.mxu1 %v1013_v46 }
 0x168   : > { %v1036_v17 = vpop.permute.xlu1 %1035 }
 0x169   : > { %3465 = vmatpush3.bf16.msra.mxu1 %v1013_v46 }
 0x16a   : > { %v1034_v10 = vpop.permute.xlu0 %1033 }
 0x16b   : > { %3416 = vmatprep.mubr.msk.bf16.mxu1 %vm593_vm0, %v1034_v10 }
 0x16c   : > { %3417 = vmatmul.mubr.msk.bf16.gmra.mxu1 %vm593_vm0, %v1036_v17 }
 0x170   : > { %v1040_v16 = vpop.permute.xlu1 %1039 }
 0x172   : > { %v1038_v18 = vpop.permute.xlu0 %1037 }
 0x173   : > { %3420 = vmatprep.mubr.msk.bf16.mxu1 %vm593_vm0, %v1038_v18 }
 0x174   : > { %3421 = vmatmul.mubr.msk.bf16.gmra.mxu1 %vm593_vm0, %v1040_v16  ;;  %v1369_v20 = vpop.permute.xlu1 %1368 }
 0x176   : > { %v1367_v19 = vpop.permute.xlu0 %1366 }
 0x177   : > { %3426 = vmatprep.mubr.msk.bf16.mxu0 %vm593_vm0, %v1367_v19 }
 0x178   : > { %3427 = vmatmul.mubr.msk.bf16.vlgmr.msra.gmra.mxu0 %vm593_vm0, %v1369_v20  ;;  %v1373_v22 = vpop.permute.xlu1 %1372 }
 0x17a   : > { %v1371_v21 = vpop.permute.xlu0 %1370 }
 0x17b   : > { %3430 = vmatprep.mubr.msk.bf16.mxu0 %vm593_vm0, %v1371_v21 }
 0x180   : > { %3431 = vmatmul.mubr.msk.bf16.gmra.mxu0 %vm593_vm0, %v1373_v22 }
 0x1a9   : > { %v4337_v23 = vpop.f32.mrf.mxu1 }
 0x1aa   : > { %v734_v24 = vsel %vm727_vm3, %v4337_v23, -inf }
 0x1ab   : > { %735 = vmax.xlane.f32.xlu0 %v734_v24  ;;  %v4341_v25 = vpop.f32.mrf.mxu1 }
 0x1ac   : > { %v728_v27 = vsel %vm727_vm3, %v4341_v25, -inf }
 0x1ad   : > { %v4343_v26 = vpop.f32.mrf.mxu1 }
 0x1ae   : > { %v737_v32 = vsel %vm727_vm3, %v4343_v26, -inf }
 0x1af   : > { %729 = vmax.xlane.f32.xlu0 %v728_v27  ;;  %v4347_v29 = vpop.f32.mrf.mxu1 }
 0x1b0   : > { %v731_v30 = vsel %vm727_vm3, %v4347_v29, -inf }
 0x1b1   : > { %732 = vmax.xlane.f32.xlu1 %v731_v30  ;;  %v4353_v47 = vpop.f32.mrf.mxu1 }
 0x1b3   : > { %738 = vmax.xlane.f32.xlu0 %v737_v32  ;;  %v4355_v48 = vpop.f32.mrf.mxu1 }
 0x1b5   : > { %v4357_v49 = vpop.f32.mrf.mxu1 }
 0x1b7   : > { %v4359_v50 = vpop.f32.mrf.mxu1 }
 0x1b9   : > { %v4361_v51 = vpop.f32.mrf.mxu1 }
 0x1bb   : > { %v4363_v53 = vpop.f32.mrf.mxu1 }
 0x1bd   : > { %v4365_v54 = vpop.f32.mrf.mxu1 }
 0x1bf   : > { %v4367_v56 = vpop.f32.mrf.mxu1 }
 0x1c1   : > { %v4369_v57 = vpop.f32.mrf.mxu1 }
 0x1c3   : > { %v4371_v58 = vpop.f32.mrf.mxu1 }
 0x1c5   : > { %v4373_v59 = vpop.f32.mrf.mxu1 }
 0x1c7   : > { %v4375_v60 = vpop.f32.mrf.mxu1 }
 0x21c   : > { %v4377_v61 = vpop.f32.mrf.mxu1 }
 0x21d   : > { %v1188_v62 = vsel %vm727_vm3, %v4377_v61, -inf }
 0x21e   : > { %1189 = vmax.xlane.f32.xlu0 %v1188_v62  ;;  %v4381_v63 = vpop.f32.mrf.mxu1 }
 0x21f   : > { %v1182_v1 = vsel %vm727_vm3, %v4381_v63, -inf }
 0x220   : > { %v4383_v0 = vpop.f32.mrf.mxu1 }
 0x221   : > { %v1191_v9 = vsel %vm727_vm3, %v4383_v0, -inf }
 0x222   : > { %1183 = vmax.xlane.f32.xlu0 %v1182_v1  ;;  %v4387_v4 = vpop.f32.mrf.mxu1 }
 0x223   : > { %v1185_v5 = vsel %vm727_vm3, %v4387_v4, -inf }
 0x224   : > { %1186 = vmax.xlane.f32.xlu1 %v1185_v5  ;;  %v4391_v7 = vpop.f32.mrf.mxu1 }
 0x225   : > { %v1200_v12 = vsel %vm727_vm3, %v4391_v7, -inf }
 0x226   : > { %1192 = vmax.xlane.f32.xlu0 %v1191_v9  ;;  %v4395_v11 = vpop.f32.mrf.mxu1 }
 0x227   : > { %v1194_v2 = vsel %vm727_vm3, %v4395_v11, -inf }
 0x228   : > { %1201 = vmax.xlane.f32.xlu1 %v1200_v12  ;;  %v4399_v13 = vpop.f32.mrf.mxu1  ;;  %v4445_v12 = vpop.permute.xlu1 %1722 }
 0x229   : > { %v1203_v14 = vsel %vm727_vm3, %v4399_v13, -inf }
 0x22a   : > { %1204 = vmax.xlane.f32.xlu0 %v1203_v14  ;;  %v4403_v15 = vpop.f32.mrf.mxu1  ;;  %v740_v14 = vsel %vm727_vm3, %v4355_v48, -inf }
 0x22b   : > { %v1197_v10 = vsel %vm727_vm3, %v4403_v15, -inf }
 0x22c   : > { %1195 = vmax.xlane.f32.xlu1 %v1194_v2  ;;  %v4407_v3 = vpop.f32.mrf.mxu1  ;;  %v743_v2 = vsel %vm727_vm3, %v4359_v50, -inf }
 0x22d   : > { %v1212_v16 = vsel %vm727_vm3, %v4407_v3, -inf }
 0x22e   : > { %1198 = vmax.xlane.f32.xlu0 %v1197_v10  ;;  %v4411_v17 = vpop.f32.mrf.mxu1  ;;  %v746_v10 = vsel %vm727_vm3, %v4353_v47, -inf }
 0x22f   : > { %v1206_v21 = vsel %vm727_vm3, %v4411_v17, -inf }
 0x230   : > { %1213 = vmax.xlane.f32.xlu1 %v1212_v16  ;;  %v4415_v18 = vpop.f32.mrf.mxu1  ;;  %v749_v16 = vsel %vm727_vm3, %v4357_v49, -inf }
 0x231   : > { %v1215_v19 = vsel %vm727_vm3, %v4415_v18, -inf }
 0x232   : > { %1216 = vmax.xlane.f32.xlu0 %v1215_v19  ;;  %v4419_v20 = vpop.f32.mrf.mxu1  ;;  %v4457_v19 = vpop.permute.xlu0 %1720 }
 0x233   : > { %v1209_v24 = vsel %vm727_vm3, %v4419_v20, -inf }
 0x234   : > { %1207 = vmax.xlane.f32.xlu1 %v1206_v21  ;;  %v4423_v22 = vpop.f32.mrf.mxu1 }
 0x235   : > { %v1224_v30 = vsel %vm727_vm3, %v4423_v22, -inf }
 0x236   : > { %1210 = vmax.xlane.f32.xlu0 %v1209_v24  ;;  %v4427_v27 = vpop.f32.mrf.mxu1  ;;  %v4459_v21 = vpop.permute.xlu0 %1700 }
 0x237   : > { %v1218_v36 = vsel %vm727_vm3, %v4427_v27, -inf }
 0x238   : > { %1225 = vmax.xlane.f32.xlu1 %v1224_v30  ;;  %v4431_v32 = vpop.f32.mrf.mxu1  ;;  %v3428_v34 = vpop.f32.mrf.mxu0 }
 0x239   : > { %v1227_v33 = vsel %vm727_vm3, %v4431_v32, -inf  ;;  %v4463_v30 = vpop.permute.xlu1 %1718 }
 0x23a   : > { %1228 = vmax.xlane.f32.xlu0 %v1227_v33  ;;  %v4435_v35 = vpop.f32.mrf.mxu1  ;;  %v1423_v37 = vpop.f32.mrf.mxu0 }
 0x23b   : > { %v1221_v38 = vsel %vm727_vm3, %v4435_v35, -inf  ;;  %v4461_v24 = vpop.xlane.xlu0 %735 }
 0x23c   : > { %1219 = vmax.xlane.f32.xlu1 %v1218_v36  ;;  %v3429_v39 = vpop.f32.mrf.mxu0 }
 0x23d   : > { %v1455_v5 = vpack.c.bf16 %v3429_v39, %v3428_v34  ;;  %v4467_v34 = vpop.permute.xlu1 %1716 }
 0x23e   : > { %1222 = vmax.xlane.f32.xlu0 %v1221_v38  ;;  %v1426_v41 = vpop.f32.mrf.mxu0 }
 0x23f   : > { %v1454_v9 = vpack.c.bf16 %v1426_v41, %v1423_v37  ;;  %v4465_v33 = vpop.xlane.xlu0 %729 }
 0x240   : > { %v3432_v42 = vpop.f32.mrf.mxu0 }
 0x241   : > { %v4471_v37 = vpop.permute.xlu1 %1702 }
 0x242   : > { %v1439_v44 = vpop.f32.mrf.mxu0 }
 0x243   : > { %v4469_v36 = vpop.xlane.xlu0 %738 }
 0x244   : > { %v3433_v45 = vpop.f32.mrf.mxu0 }
 0x245   : > { %v1457_v46 = vpack.c.bf16 %v3433_v45, %v3432_v42  ;;  %v4474_v41 = vpop.xlane.xlu1 %732 }
 0x246   : > { %v1442_v62 = vpop.f32.mrf.mxu0 }
 0x247   : > { %3434 = vmatprep.subr.bf16.mxu0 %v1457_v46  ;;  %v1456_v1 = vpack.c.bf16 %v1442_v62, %v1439_v44 }
 0x248   : > { %3435 = vmatpush3.bf16.msra.mxu0 %v1457_v46 }
 0x249   : > { %3436 = vmatprep.subr.bf16.mxu0 %v1456_v1 }
 0x24c   : > { %3437 = vmatpush3.bf16.msra.mxu0 %v1456_v1 }
 0x24d   : > { %1704 = vrot.lane.b32.xlu1 %v4245_v43, %s4028_s20  ;;  %3438 = vmatprep.subr.bf16.mxu0 %v1455_v5 }
 0x250   : > { %3439 = vmatpush3.bf16.msra.mxu0 %v1455_v5 }
 0x251   : > { %3440 = vmatprep.subr.bf16.mxu0 %v1454_v9 }
 0x254   : > { %1706 = vrot.lane.b32.xlu0 %v4242_v40, %s4028_s20  ;;  %3441 = vmatpush3.bf16.msra.mxu0 %v1454_v9 }
 0x255   : > { %3616 = vmatprep.subr.msk.bf16.mxu0 %vm593_vm0, %v4445_v12 }
 0x271   : > { %741 = vmax.xlane.f32.xlu1 %v740_v14 }
 0x273   : > { %744 = vmax.xlane.f32.xlu0 %v743_v2 }
 0x275   : > { %747 = vmax.xlane.f32.xlu1 %v746_v10 }
 0x277   : > { %750 = vmax.xlane.f32.xlu0 %v749_v16 }
 0x2a7   : > { %v1190_v38 = vpop.xlane.xlu0 %1189 }
 0x2a8   : > { %v1232_v39 = vsub.f32 %v4377_v61, %v1190_v38 }
 0x2aa   : > { %v1250_v42 = vmul.f32 1.442695, %v1232_v39 }
 0x2ab   : > { %v1184_v44 = vpop.xlane.xlu0 %1183 }
 0x2ac   : > { %3707 = vpow2.f32 %v1250_v42  ;;  %v1230_v45 = vsub.f32 %v4381_v63, %v1184_v44 }
 0x2ad   : > { %v1187_v46 = vpop.xlane.xlu1 %1186 }
 0x2ae   : > { %v1246_v62 = vmul.f32 1.442695, %v1230_v45  ;;  %v1231_v1 = vsub.f32 %v4387_v4, %v1187_v46 }
 0x2af   : > { %v1193_v5 = vpop.xlane.xlu0 %1192 }
 0x2b0   : > { %3709 = vpow2.f32 %v1246_v62  ;;  %v1233_v9 = vsub.f32 %v4383_v0, %v1193_v5  ;;  %v1248_v14 = vmul.f32 1.442695, %v1231_v1 }
 0x2b1   : > { %v1202_v2 = vpop.xlane.xlu1 %1201 }
 0x2b2   : > { %v1252_v10 = vmul.f32 1.442695, %v1233_v9  ;;  %v1236_v61 = vsub.f32 %v4391_v7, %v1202_v2 }
 0x2b3   : > { %v1205_v16 = vpop.xlane.xlu0 %1204 }
 0x2b4   : > { %3711 = vpow2.f32 %v1252_v10  ;;  %v1258_v38 = vmul.f32 1.442695, %v1236_v61  ;;  %v1237_v39 = vsub.f32 %v4399_v13, %v1205_v16 }
 0x2b5   : > { %3713 = vpow2.f32 %v1248_v14  ;;  %v1196_v63 = vpop.xlane.xlu1 %1195 }
 0x2b6   : > { %3715 = vpow2.f32 %v1258_v38  ;;  %v1260_v42 = vmul.f32 1.442695, %v1237_v39  ;;  %v1234_v4 = vsub.f32 %v4395_v11, %v1196_v63 }
 0x2b7   : > { %v1199_v44 = vpop.xlane.xlu0 %1198 }
 0x2b8   : > { %v1254_v45 = vmul.f32 1.442695, %v1234_v4  ;;  %v1235_v0 = vsub.f32 %v4403_v15, %v1199_v44  ;;  %3717 = vpow2.f32 %v1260_v42 }
 0x2b9   : > { %v4483_v46 = vpop.eup %3707  ;;  %v1214_v62 = vpop.xlane.xlu1 %1213 }
 0x2ba   : > { %3719 = vpow2.f32 %v1254_v45  ;;  %v1256_v7 = vmul.f32 1.442695, %v1235_v0  ;;  %v1240_v1 = vsub.f32 %v4407_v3, %v1214_v62  ;;  %v1284_v13 = vsel %vm727_vm3, %v4483_v46, 0.0 }
 0x2bb   : > { %v1217_v5 = vpop.xlane.xlu0 %1216  ;;  %1285 = vadd.xlane.f32.xlu1 %v1284_v13 }
 0x2bc   : > { %v1266_v9 = vmul.f32 1.442695, %v1240_v1  ;;  %v1241_v11 = vsub.f32 %v4415_v18, %v1217_v5  ;;  %3721 = vpow2.f32 %v1256_v7 }
 0x2bd   : > { %v4489_v14 = vpop.eup %3709  ;;  %v1208_v15 = vpop.xlane.xlu1 %1207 }
 0x2be   : > { %3723 = vpow2.f32 %v1266_v9  ;;  %v1268_v2 = vmul.f32 1.442695, %v1241_v11  ;;  %v1238_v10 = vsub.f32 %v4411_v17, %v1208_v15  ;;  %v1278_v61 = vsel %vm727_vm3, %v4489_v14, 0.0 }
 0x2bf   : > { %v1211_v3 = vpop.xlane.xlu0 %1210  ;;  %1279 = vadd.xlane.f32.xlu1 %v1278_v61 }
 0x2c0   : > { %v1262_v16 = vmul.f32 1.442695, %v1238_v10  ;;  %v1239_v38 = vsub.f32 %v4419_v20, %v1211_v3  ;;  %3725 = vpow2.f32 %v1268_v2 }
 0x2c1   : > { %v4495_v39 = vpop.eup %3711  ;;  %v1226_v18 = vpop.xlane.xlu1 %1225 }
 0x2c2   : > { %v4497_v63 = vpop.eup %3713  ;;  %3727 = vpow2.f32 %v1262_v16  ;;  %v1264_v42 = vmul.f32 1.442695, %v1239_v38  ;;  %v1244_v4 = vsub.f32 %v4423_v22, %v1226_v18  ;;  %v1287_v17 = vsel %vm727_vm3, %v4495_v39, 0.0 }
 0x2c3   : > { %v4502_v44 = vpop.eup %3715  ;;  %v1229_v45 = vpop.xlane.xlu0 %1228  ;;  %1288 = vadd.xlane.f32.xlu0 %v1287_v17  ;;  %v1281_v5 = vsel %vm727_vm3, %v4497_v63, 0.0 }
 0x2c4   : > { %v1274_v0 = vmul.f32 1.442695, %v1244_v4  ;;  %v1245_v20 = vsub.f32 %v4431_v32, %v1229_v45  ;;  %v1296_v62 = vsel %vm727_vm3, %v4502_v44, 0.0  ;;  %3729 = vpow2.f32 %v1264_v42 }
 0x2c5   : > { %1297 = vadd.xlane.f32.xlu1 %v1296_v62  ;;  %v1220_v7 = vpop.xlane.xlu1 %1219  ;;  %v4507_v1 = vpop.eup %3717 }
 0x2c6   : > { %3731 = vpow2.f32 %v1274_v0  ;;  %v1276_v22 = vmul.f32 1.442695, %v1245_v20  ;;  %v1242_v13 = vsub.f32 %v4427_v27, %v1220_v7  ;;  %v1299_v27 = vsel %vm727_vm3, %v4507_v1, 0.0 }
 0x2c7   : > { %v4512_v9 = vpop.eup %3719  ;;  %1282 = vadd.xlane.f32.xlu0 %v1281_v5  ;;  %v1223_v11 = vpop.xlane.xlu0 %1222 }
 0x2c8   : > { %v1270_v32 = vmul.f32 1.442695, %v1242_v13  ;;  %v1243_v15 = vsub.f32 %v4435_v35, %v1223_v11  ;;  %v1290_v2 = vsel %vm727_vm3, %v4512_v9, 0.0  ;;  %3733 = vpow2.f32 %v1276_v22 }
 0x2c9   : > { %1291 = vadd.xlane.f32.xlu1 %v1290_v2  ;;  %v4517_v10 = vpop.eup %3721  ;;  %v755_v2 = vsel %vm727_vm3, %v4367_v56, -inf }
 0x2ca   : > { %3735 = vpow2.f32 %v1270_v32  ;;  %v1272_v61 = vmul.f32 1.442695, %v1243_v15  ;;  %v1293_v38 = vsel %vm727_vm3, %v4517_v10, 0.0  ;;  %v752_v32 = vsel %vm727_vm3, %v4363_v53, -inf }
 0x2cb   : > { %v4521_v3 = vpop.eup %3723  ;;  %1300 = vadd.xlane.f32.xlu0 %v1299_v27  ;;  %v758_v15 = vsel %vm727_vm3, %v4361_v51, -inf  ;;  %v4571_v27 = vpop.permute.xlu1 %1704 }
 0x2cc   : > { %v1308_v16 = vsel %vm727_vm3, %v4521_v3, 0.0  ;;  %3737 = vpow2.f32 %v1272_v61  ;;  %v761_v61 = vsel %vm727_vm3, %v4365_v54, -inf }
 0x2cd   : > { %1309 = vadd.xlane.f32.xlu1 %v1308_v16  ;;  %v4525_v35 = vpop.eup %3725  ;;  %v776_v16 = vsub.f32 %v4341_v25, %v4465_v33  ;;  %v779_v25 = vsub.f32 %v4343_v26, %v4469_v36 }
 0x2ce   : > { %v1311_v17 = vsel %vm727_vm3, %v4525_v35, 0.0 }
 0x2cf   : > { %v4529_v18 = vpop.eup %3727  ;;  %1294 = vadd.xlane.f32.xlu0 %v1293_v38  ;;  %v4575_v38 = vpop.permute.xlu0 %1706 }
 0x2d0   : > { %v1302_v42 = vsel %vm727_vm3, %v4529_v18, 0.0 }
 0x2d1   : > { %1303 = vadd.xlane.f32.xlu1 %v1302_v42  ;;  %v4533_v4 = vpop.eup %3729 }
 0x2d2   : > { %v1305_v62 = vsel %vm727_vm3, %v4533_v4, 0.0 }
 0x2d3   : > { %v4537_v45 = vpop.eup %3731  ;;  %1312 = vadd.xlane.f32.xlu0 %v1311_v17  ;;  %v778_v17 = vsub.f32 %v4337_v23, %v4461_v24  ;;  %v798_v23 = vmul.f32 1.442695, %v779_v25 }
 0x2d4   : > { %v1320_v0 = vsel %vm727_vm3, %v4537_v45, 0.0 }
 0x2d5   : > { %1321 = vadd.xlane.f32.xlu1 %v1320_v0  ;;  %v4541_v20 = vpop.eup %3733  ;;  %v792_v0 = vmul.f32 1.442695, %v776_v16 }
 0x2d6   : > { %v1323_v13 = vsel %vm727_vm3, %v4541_v20, 0.0 }
 0x2d7   : > { %v4545_v7 = vpop.eup %3735  ;;  %1306 = vadd.xlane.f32.xlu0 %v1305_v62  ;;  %v777_v62 = vsub.f32 %v4347_v29, %v4474_v41  ;;  %3739 = vpow2.f32 %v792_v0 }
 0x2d8   : > { %v1314_v22 = vsel %vm727_vm3, %v4545_v7, 0.0 }
 0x2d9   : > { %1315 = vadd.xlane.f32.xlu1 %v1314_v22  ;;  %v4551_v5 = vpop.eup %3737 }
 0x2da   : > { %v1317_v11 = vsel %vm727_vm3, %v4551_v5, 0.0 }
 0x2db   : > { %1324 = vadd.xlane.f32.xlu0 %v1323_v13  ;;  %v796_v13 = vmul.f32 1.442695, %v778_v17 }
 0x2dd   : > { %3741 = vpow2.f32 %v796_v13 }
 0x2df   : > { %1318 = vadd.xlane.f32.xlu0 %v1317_v11 }
 0x2e4   : > { %v4591_v17 = vpop.eup %3739 }
 0x2ea   : > { %1708 = vrot.lane.b32.xlu1 %v4263_v55, %s4028_s20 }
 0x2f5   : > { %1710 = vrot.lane.b32.xlu0 %v4260_v52, %s4028_s20 }
 0x2fa   : > { %v742_v42 = vpop.xlane.xlu1 %741 }
 0x2fb   : > { %v780_v11 = vsub.f32 %v4355_v48, %v742_v42  ;;  %v764_v48 = vsel %vm727_vm3, %v4371_v58, -inf }
 0x2fc   : > { %v745_v22 = vpop.xlane.xlu0 %744 }
 0x2fd   : > { %v800_v33 = vmul.f32 1.442695, %v780_v11  ;;  %v781_v24 = vsub.f32 %v4359_v50, %v745_v22  ;;  %v4597_v22 = vpop.eup %3741  ;;  %v773_v11 = vsel %vm727_vm3, %v4373_v59, -inf }
 0x2fe   : > { %v830_v25 = vsel %vm727_vm3, %v4597_v22, 0.0 }
 0x2ff   : > { %v802_v26 = vmul.f32 1.442695, %v781_v24 }
 0x30e   : > { %753 = vmax.xlane.f32.xlu1 %v752_v32  ;;  %v748_v32 = vpop.xlane.xlu1 %747 }
 0x312   : > { %759 = vmax.xlane.f32.xlu1 %v758_v15  ;;  %v794_v15 = vmul.f32 1.442695, %v777_v62  ;;  %v824_v62 = vsel %vm727_vm3, %v4591_v17, 0.0 }
 0x314   : > { %756 = vmax.xlane.f32.xlu0 %v755_v2  ;;  %v782_v2 = vsub.f32 %v4353_v47, %v748_v32  ;;  %3743 = vpow2.f32 %v794_v15  ;;  %v770_v47 = vsel %vm727_vm3, %v4369_v57, -inf }
 0x315   : > { %3745 = vpow2.f32 %v800_v33 }
 0x316   : > { %v804_v16 = vmul.f32 1.442695, %v782_v2  ;;  %3747 = vpow2.f32 %v798_v23 }
 0x318   : > { %762 = vmax.xlane.f32.xlu0 %v761_v61  ;;  %v751_v61 = vpop.xlane.xlu0 %750  ;;  %3749 = vpow2.f32 %v804_v16 }
 0x319   : > { %v783_v41 = vsub.f32 %v4357_v49, %v751_v61  ;;  %3751 = vpow2.f32 %v802_v26  ;;  %v767_v49 = vsel %vm727_vm3, %v4375_v60, -inf }
 0x31b   : > { %v806_v36 = vmul.f32 1.442695, %v783_v41 }
 0x31d   : > { %3753 = vpow2.f32 %v806_v36 }
 0x321   : > { %v4601_v32 = vpop.eup %3743 }
 0x322   : > { %v4605_v33 = vpop.eup %3745  ;;  %v827_v61 = vsel %vm727_vm3, %v4601_v32, 0.0 }
 0x323   : > { %1712 = vrot.lane.b32.xlu1 %v4290_v8, %s4028_s20  ;;  %v4609_v23 = vpop.eup %3747 }
 0x325   : > { %v4613_v41 = vpop.eup %3749 }
 0x326   : > { %v4617_v26 = vpop.eup %3751 }
 0x32a   : > { %v4619_v36 = vpop.eup %3753 }
 0x32e   : > { %1714 = vrot.lane.b32.xlu0 %v4285_v6, %s4028_s20 }
 0x344   : > { %v1286_v29 = vpop.xlane.xlu1 %1285 }
 0x347   : > { %765 = vmax.xlane.f32.xlu1 %v764_v48  ;;  %v833_v48 = vsel %vm727_vm3, %v4609_v23, 0.0 }
 0x348   : > { %v1280_v42 = vpop.xlane.xlu1 %1279 }
 0x34b   : > { %771 = vmax.xlane.f32.xlu1 %v770_v47  ;;  %v842_v47 = vsel %vm727_vm3, %v4613_v41, 0.0 }
 0x34c   : > { %v1289_v50 = vpop.xlane.xlu0 %1288 }
 0x34d   : > { %768 = vmax.xlane.f32.xlu0 %v767_v49  ;;  %3755 = vrcp.f32 %v1289_v50 }
 0x34e   : > { %v1298_v0 = vpop.xlane.xlu1 %1297  ;;  %3757 = vrcp.f32 %v1280_v42 }
 0x34f   : > { %825 = vadd.xlane.f32.xlu1 %v824_v62  ;;  %3759 = vrcp.f32 %v1286_v29  ;;  %v836_v29 = vsel %vm727_vm3, %v4605_v33, 0.0 }
 0x350   : > { %v1283_v13 = vpop.xlane.xlu0 %1282 }
 0x351   : > { %3761 = vrcp.f32 %v1283_v13  ;;  %774 = vmax.xlane.f32.xlu0 %v773_v11 }
 0x352   : > { %v1292_v15 = vpop.xlane.xlu1 %1291 }
 0x353   : > { %831 = vadd.xlane.f32.xlu1 %v830_v25 }
 0x354   : > { %v1301_v2 = vpop.xlane.xlu0 %1300 }
 0x355   : > { %828 = vadd.xlane.f32.xlu0 %v827_v61  ;;  %3763 = vrcp.f32 %v1301_v2 }
 0x356   : > { %v1310_v24 = vpop.xlane.xlu1 %1309  ;;  %3765 = vrcp.f32 %v1292_v15 }
 0x357   : > { %837 = vadd.xlane.f32.xlu1 %v836_v29  ;;  %3767 = vrcp.f32 %v1298_v0  ;;  %v839_v0 = vsel %vm727_vm3, %v4617_v26, 0.0 }
 0x358   : > { %v1295_v16 = vpop.xlane.xlu0 %1294 }
 0x359   : > { %3769 = vrcp.f32 %v1295_v16  ;;  %834 = vadd.xlane.f32.xlu0 %v833_v48  ;;  %v845_v48 = vsel %vm727_vm3, %v4619_v36, 0.0 }
 0x35a   : > { %v1304_v42 = vpop.xlane.xlu1 %1303  ;;  %v3756_v50 = vpop.eup %3755 }
 0x35b   : > { %843 = vadd.xlane.f32.xlu1 %v842_v47  ;;  %v3758_v49 = vpop.eup %3757  ;;  %v1345_v15 = vmul.f32 %v3756_v50, %v4495_v39 }
 0x35c   : > { %v1313_v62 = vpop.xlane.xlu0 %1312  ;;  %v3760_v13 = vpop.eup %3759  ;;  %v1342_v2 = vmul.f32 %v3758_v49, %v4489_v14  ;;  %v1758_v14 = vsel %vm593_vm0, %v4445_v12, 0 }
 0x35d   : > { %840 = vadd.xlane.f32.xlu0 %v839_v0  ;;  %3771 = vrcp.f32 %v1313_v62  ;;  %v1344_v29 = vmul.f32 %v3760_v13, %v4483_v46 }
 0x35e   : > { %v3762_v11 = vpop.eup %3761  ;;  %v1322_v25 = vpop.xlane.xlu1 %1321  ;;  %3773 = vrcp.f32 %v1304_v42 }
 0x35f   : > { %v1343_v61 = vmul.f32 %v3762_v11, %v4497_v63  ;;  %3775 = vrcp.f32 %v1310_v24  ;;  %v1359_v0 = vpack.c.bf16 %v1345_v15, %v1344_v29 }
 0x360   : > { %v1307_v16 = vpop.xlane.xlu0 %1306 }
 0x361   : > { %3777 = vrcp.f32 %v1307_v16  ;;  %846 = vadd.xlane.f32.xlu0 %v845_v48  ;;  %v1358_v47 = vpack.c.bf16 %v1343_v61, %v1342_v2 }
 0x362   : > { %v3764_v8 = vpop.eup %3763  ;;  %v1316_v42 = vpop.xlane.xlu1 %1315 }
 0x363   : > { %3442 = vmatprep.mubr.msk.bf16.mxu0 %vm727_vm3, %v1358_v47  ;;  %v3766_v39 = vpop.eup %3765  ;;  %v1349_v50 = vmul.f32 %v3764_v8, %v4507_v1  ;;  %v1755_v8 = vsel %vm593_vm0, %v4457_v19, 0 }
 0x364   : > { %3443 = vmatmul.mubr.msk.bf16.vlgmr.msra.gmra.mxu0 %vm727_vm3, %v1359_v0  ;;  %v1325_v46 = vpop.xlane.xlu0 %1324  ;;  %v3768_v63 = vpop.eup %3767  ;;  %v1346_v49 = vmul.f32 %v3766_v39, %v4512_v9  ;;  %v1752_v0 = vsel %vm593_vm0, %v4463_v30, 0 }
 0x365   : > { %3483 = vmatpush3.bf16.xpose.msra.mxu0 %v1758_v14  ;;  %3779 = vrcp.f32 %v1325_v46  ;;  %v1348_v11 = vmul.f32 %v3768_v63, %v4502_v44 }
 0x366   : > { %v3770_v24 = vpop.eup %3769  ;;  %3617 = vmatprep.subr.msk.bf16.mxu0 %vm593_vm0, %v4457_v19  ;;  %3781 = vrcp.f32 %v1316_v42 }
 0x367   : > { %v1347_v62 = vmul.f32 %v3770_v24, %v4517_v10  ;;  %3783 = vrcp.f32 %v1322_v25  ;;  %v1361_v15 = vpack.c.bf16 %v1349_v50, %v1348_v11 }
 0x368   : > { %v1319_v13 = vpop.xlane.xlu0 %1318 }
 0x369   : > { %3785 = vrcp.f32 %v1319_v13  ;;  %v1360_v12 = vpack.c.bf16 %v1347_v62, %v1346_v49 }
 0x36a   : > { %v3772_v2 = vpop.eup %3771 }
 0x36b   : > { %3446 = vmatprep.mubr.msk.bf16.mxu0 %vm727_vm3, %v1360_v12  ;;  %v3774_v61 = vpop.eup %3773  ;;  %v1353_v44 = vmul.f32 %v3772_v2, %v4525_v35 }
 0x36c   : > { %3447 = vmatmul.mubr.msk.bf16.gmra.mxu0 %vm727_vm3, %v1361_v15  ;;  %v3776_v1 = vpop.eup %3775  ;;  %v1350_v10 = vmul.f32 %v3774_v61, %v4529_v18 }
 0x36d   : > { %3485 = vmatpush3.bf16.xpose.msra.mxu0 %v1755_v8  ;;  %v1352_v29 = vmul.f32 %v3776_v1, %v4521_v3 }
 0x36e   : > { %v3778_v9 = vpop.eup %3777  ;;  %3618 = vmatprep.subr.msk.bf16.mxu0 %vm593_vm0, %v4463_v30  ;;  %v1749_v30 = vsel %vm593_vm0, %v4467_v34, 0 }
 0x36f   : > { %v1351_v25 = vmul.f32 %v3778_v9, %v4533_v4  ;;  %v1363_v48 = vpack.c.bf16 %v1353_v44, %v1352_v29 }
 0x371   : > { %v1362_v16 = vpack.c.bf16 %v1351_v25, %v1350_v10 }
 0x372   : > { %v3780_v47 = vpop.eup %3779 }
 0x373   : > { %3450 = vmatprep.mubr.msk.bf16.mxu0 %vm727_vm3, %v1362_v16  ;;  %v3782_v19 = vpop.eup %3781  ;;  %v1357_v18 = vmul.f32 %v3780_v47, %v4541_v20  ;;  %v1711_v20 = vpop.permute.xlu0 %1710 }
 0x374   : > { %3451 = vmatmul.mubr.msk.bf16.gmra.mxu0 %vm727_vm3, %v1363_v48  ;;  %v3784_v39 = vpop.eup %3783  ;;  %v1354_v3 = vmul.f32 %v3782_v19, %v4545_v7 }
 0x375   : > { %3487 = vmatpush3.bf16.xpose.msra.mxu0 %v1752_v0  ;;  %v1356_v42 = vmul.f32 %v3784_v39, %v4537_v45  ;;  %v1709_v45 = vpop.permute.xlu1 %1708 }
 0x376   : > { %v3786_v35 = vpop.eup %3785  ;;  %3619 = vmatprep.subr.msk.bf16.mxu0 %vm593_vm0, %v4467_v34 }
 0x377   : > { %v1355_v4 = vmul.f32 %v3786_v35, %v4551_v5  ;;  %v1365_v46 = vpack.c.bf16 %v1357_v18, %v1356_v42 }
 0x379   : > { %v1364_v14 = vpack.c.bf16 %v1355_v4, %v1354_v3 }
 0x37b   : > { %3454 = vmatprep.mubr.msk.bf16.mxu0 %vm727_vm3, %v1364_v14 }
 0x37c   : > { %3455 = vmatmul.mubr.msk.bf16.gmra.mxu0 %vm727_vm3, %v1365_v46 }
 0x37d   : > { %3489 = vmatpush3.bf16.xpose.msra.mxu0 %v1749_v30  ;;  %3490 = vmatprep.mubr.msk.bf16.mxu0 %vm593_vm0, %v4459_v21 }
 0x384   : > { %3491 = vmatmul.mubr.msk.bf16.vlgmr.msra.gmra.mxu0 %vm593_vm0, %v4471_v37 }
 0x385   : > { %3494 = vmatprep.mubr.msk.bf16.mxu0 %vm593_vm0, %v4571_v27 }
 0x38c   : > { %3495 = vmatmul.mubr.msk.bf16.gmra.mxu0 %vm593_vm0, %v4575_v38 }
 0x38d   : > { %3498 = vmatprep.mubr.msk.bf16.mxu0 %vm593_vm0, %v1709_v45 }
 0x394   : > { %3499 = vmatmul.mubr.msk.bf16.gmra.mxu0 %vm593_vm0, %v1711_v20 }
 0x397   : > { %v754_v34 = vpop.xlane.xlu1 %753 }
 0x398   : > { %v784_v7 = vsub.f32 %v4363_v53, %v754_v34 }
 0x39a   : > { %v808_v5 = vmul.f32 1.442695, %v784_v7 }
 0x39b   : > { %v760_v21 = vpop.xlane.xlu1 %759 }
 0x39c   : > { %3787 = vpow2.f32 %v808_v5  ;;  %v786_v37 = vsub.f32 %v4361_v51, %v760_v21 }
 0x39d   : > { %v757_v63 = vpop.xlane.xlu0 %756 }
 0x39e   : > { %v812_v24 = vmul.f32 1.442695, %v786_v37  ;;  %v785_v27 = vsub.f32 %v4367_v56, %v757_v63 }
 0x39f   : > { %v1713_v50 = vpop.permute.xlu1 %1712 }
 0x3a0   : > { %3789 = vpow2.f32 %v812_v24  ;;  %v810_v38 = vmul.f32 1.442695, %v785_v27  ;;  %3502 = vmatprep.mubr.msk.bf16.mxu0 %vm593_vm0, %v1713_v50 }
 0x3a1   : > { %v763_v49 = vpop.xlane.xlu0 %762 }
 0x3a2   : > { %3791 = vpow2.f32 %v810_v38  ;;  %v787_v62 = vsub.f32 %v4365_v54, %v763_v49 }
 0x3a4   : > { %v814_v13 = vmul.f32 1.442695, %v787_v62 }
 0x3a5   : > { %v1715_v53 = vpop.permute.xlu0 %1714 }
 0x3a6   : > { %3793 = vpow2.f32 %v814_v13  ;;  %3503 = vmatmul.mubr.msk.bf16.gmra.mxu0 %vm593_vm0, %v1715_v53 }
 0x3a9   : > { %v4681_v11 = vpop.eup %3787 }
 0x3aa   : > { %v848_v51 = vsel %vm727_vm3, %v4681_v11, 0.0 }
 0x3ab   : > { %849 = vadd.xlane.f32.xlu1 %v848_v51 }
 0x3ad   : > { %v4685_v56 = vpop.eup %3789 }
 0x3ae   : > { %v854_v12 = vsel %vm727_vm3, %v4685_v56, 0.0 }
 0x3af   : > { %v4689_v15 = vpop.eup %3791  ;;  %855 = vadd.xlane.f32.xlu1 %v854_v12 }
 0x3b0   : > { %v851_v54 = vsel %vm727_vm3, %v4689_v15, 0.0 }
 0x3b1   : > { %852 = vadd.xlane.f32.xlu0 %v851_v54  ;;  %v4729_v54 = vld [vmem:[%s4208_s10] sm:$0xff]  }
 0x3b3   : > { %v4693_v2 = vpop.eup %3793 }
 0x3b4   : > { %v857_v61 = vsel %vm727_vm3, %v4693_v2, 0.0 }
 0x3b5   : > { %858 = vadd.xlane.f32.xlu0 %v857_v61 }
 0x3d0   : > { %v766_v8 = vpop.xlane.xlu1 %765 }
 0x3d1   : > { %v788_v1 = vsub.f32 %v4371_v58, %v766_v8 }
 0x3d3   : > { %v816_v9 = vmul.f32 1.442695, %v788_v1 }
 0x3d4   : > { %v772_v44 = vpop.xlane.xlu1 %771 }
 0x3d5   : > { %3795 = vpow2.f32 %v816_v9  ;;  %v790_v10 = vsub.f32 %v4369_v57, %v772_v44 }
 0x3d6   : > { %v769_v25 = vpop.xlane.xlu0 %768 }
 0x3d7   : > { %v820_v29 = vmul.f32 1.442695, %v790_v10  ;;  %v789_v16 = vsub.f32 %v4375_v60, %v769_v25 }
 0x3d8   : > { %v826_v48 = vpop.xlane.xlu1 %825 }
 0x3d9   : > { %3797 = vpow2.f32 %v820_v29  ;;  %v818_v47 = vmul.f32 1.442695, %v789_v16 }
 0x3da   : > { %v775_v19 = vpop.xlane.xlu0 %774 }
 0x3db   : > { %3799 = vpow2.f32 %v818_v47  ;;  %v791_v0 = vsub.f32 %v4373_v59, %v775_v19 }
 0x3dc   : > { %v832_v39 = vpop.xlane.xlu1 %831  ;;  %3801 = vrcp.f32 %v826_v48 }
 0x3dd   : > { %v822_v35 = vmul.f32 1.442695, %v791_v0 }
 0x3de   : > { %v829_v58 = vpop.xlane.xlu0 %828 }
 0x3df   : > { %3803 = vpow2.f32 %v822_v35 }
 0x3e0   : > { %3805 = vrcp.f32 %v829_v58  ;;  %v838_v18 = vpop.xlane.xlu1 %837 }
 0x3e1   : > { %3807 = vrcp.f32 %v832_v39 }
 0x3e2   : > { %v4701_v57 = vpop.eup %3795  ;;  %v835_v3 = vpop.xlane.xlu0 %834 }
 0x3e3   : > { %3809 = vrcp.f32 %v835_v3  ;;  %v860_v60 = vsel %vm727_vm3, %v4701_v57, 0.0 }
 0x3e4   : > { %861 = vadd.xlane.f32.xlu1 %v860_v60  ;;  %3811 = vrcp.f32 %v838_v18  ;;  %v844_v59 = vpop.xlane.xlu1 %843 }
 0x3e6   : > { %v4705_v4 = vpop.eup %3797  ;;  %v841_v42 = vpop.xlane.xlu0 %840 }
 0x3e7   : > { %3813 = vrcp.f32 %v841_v42  ;;  %v866_v14 = vsel %vm727_vm3, %v4705_v4, 0.0 }
 0x3e8   : > { %v4709_v46 = vpop.eup %3799  ;;  %867 = vadd.xlane.f32.xlu1 %v866_v14  ;;  %3815 = vrcp.f32 %v844_v59 }
 0x3e9   : > { %v863_v30 = vsel %vm727_vm3, %v4709_v46, 0.0  ;;  %v3802_v20 = vpop.eup %3801 }
 0x3ea   : > { %864 = vadd.xlane.f32.xlu0 %v863_v30  ;;  %v847_v45 = vpop.xlane.xlu0 %846  ;;  %v888_v37 = vmul.f32 %v3802_v20, %v4591_v17 }
 0x3eb   : > { %3817 = vrcp.f32 %v847_v45 }
 0x3ec   : > { %v4713_v34 = vpop.eup %3803 }
 0x3ed   : > { %v3806_v7 = vpop.eup %3805  ;;  %v869_v5 = vsel %vm727_vm3, %v4713_v34, 0.0 }
 0x3ee   : > { %v3808_v21 = vpop.eup %3807  ;;  %870 = vadd.xlane.f32.xlu0 %v869_v5  ;;  %v889_v63 = vmul.f32 %v3806_v7, %v4601_v32 }
 0x3ef   : > { %v890_v50 = vmul.f32 %v3808_v21, %v4597_v22 }
 0x3f0   : > { %v3810_v24 = vpop.eup %3809  ;;  %v904_v27 = vpack.c.bf16 %v889_v63, %v888_v37 }
 0x3f1   : > { %v891_v38 = vmul.f32 %v3810_v24, %v4609_v23  ;;  %v3812_v49 = vpop.eup %3811 }
 0x3f2   : > { %3466 = vmatprep.mubr.msk.bf16.mxu1 %vm727_vm3, %v904_v27  ;;  %v892_v17 = vmul.f32 %v3812_v49, %v4605_v33  ;;  %v4735_v33 = vld [vmem:[%s4208_s10 + $0x10] sm:$0xff]  }
 0x3f3   : > { %v905_v62 = vpack.c.bf16 %v891_v38, %v890_v50 }
 0x3f4   : > { %v3814_v13 = vpop.eup %3813 }
 0x3f5   : > { %3467 = vmatmul.mubr.msk.bf16.vlgmr.msra.gmra.mxu1 %vm727_vm3, %v905_v62  ;;  %v893_v32 = vmul.f32 %v3814_v13, %v4617_v26  ;;  %v3816_v53 = vpop.eup %3815  ;;  %v4740_v26 = vld [vmem:[%s4208_s10 + $0x18] sm:$0xff]  }
 0x3f6   : > { %v894_v22 = vmul.f32 %v3816_v53, %v4613_v41  ;;  %v4745_v41 = vld [vmem:[%s4208_s10 + $0x8] sm:$0xff]  }
 0x3f7   : > { %v906_v51 = vpack.c.bf16 %v893_v32, %v892_v17 }
 0x3f8   : > { %v3818_v12 = vpop.eup %3817 }
 0x3f9   : > { %3470 = vmatprep.mubr.msk.bf16.mxu1 %vm727_vm3, %v906_v51  ;;  %v895_v23 = vmul.f32 %v3818_v12, %v4619_v36  ;;  %2041 = vrot.lane.b32.xlu1 %v4729_v54, %s4028_s20  ;;  %v378_v36 = vld [vmem:[%s5357_s5 + $0x8] sm:$0xf] }
 0x3fa   : > { %3620 = vmatprep.subr.msk.bf16.mxu1 %vm944_vm2, %v378_v36  ;;  %v2062_v8 = vsel %vm944_vm2, %v378_v36, 0 }
 0x3fb   : > { %v907_v61 = vpack.c.bf16 %v895_v23, %v894_v22  ;;  %3507 = vmatpush3.bf16.msra.mxu1 %v2062_v8 }
 0x3fd   : > { %3471 = vmatmul.mubr.msk.bf16.gmra.mxu1 %vm727_vm3, %v907_v61  ;;  %2045 = vrot.lane.b32.xlu1 %v4735_v33, %s4028_s20 }
 0x401   : > { %2047 = vrot.lane.b32.xlu1 %v4740_v26, %s4028_s20 }
 0x404   : > { %2043 = vrot.lane.b32.xlu0 %v4745_v41, %s4028_s20  ;;  %s2923_s20 = sadd.s32 (%p4116_p5), %s4009_s26, %s3199_s18 }
 0x405   : > { %s3200_s24 = sshll.u32 (%p4116_p5), %s2923_s20, 2 }
 0x424   : > { %v4754_v1 = vpop.f32.mrf.mxu0 }
 0x426   : > { %v4756_v9 = vpop.f32.mrf.mxu0 }
 0x428   : > { %v4758_v44 = vpop.f32.mrf.mxu0 }
 0x42a   : > { %v4760_v10 = vpop.f32.mrf.mxu0 }
 0x42c   : > { %v4762_v25 = vpop.f32.mrf.mxu0 }
 0x42e   : > { %v4764_v29 = vpop.f32.mrf.mxu0 }
 0x430   : > { %v4766_v16 = vpop.f32.mrf.mxu0 }
 0x432   : > { %v4768_v48 = vpop.f32.mrf.mxu0 }
 0x434   : > { %v850_v47 = vpop.xlane.xlu1 %849  ;;  %v4770_v19 = vpop.f32.mrf.mxu0 }
 0x435   : > { %3819 = vrcp.f32 %v850_v47 }
 0x436   : > { %v4772_v0 = vpop.f32.mrf.mxu0 }
 0x438   : > { %v4774_v39 = vpop.f32.mrf.mxu0  ;;  %v856_v35 = vpop.xlane.xlu1 %855 }
 0x43a   : > { %v4776_v58 = vpop.f32.mrf.mxu0  ;;  %v853_v18 = vpop.xlane.xlu0 %852 }
 0x43b   : > { %3821 = vrcp.f32 %v853_v18 }
 0x43c   : > { %v4778_v3 = vpop.f32.mrf.mxu0  ;;  %3823 = vrcp.f32 %v856_v35 }
 0x43e   : > { %v4780_v60 = vpop.f32.mrf.mxu0  ;;  %v859_v59 = vpop.xlane.xlu0 %858 }
 0x43f   : > { %3825 = vrcp.f32 %v859_v59 }
 0x440   : > { %v4782_v42 = vpop.f32.mrf.mxu0 }
 0x442   : > { %v4784_v14 = vpop.f32.mrf.mxu0  ;;  %v3820_v20 = vpop.eup %3819 }
 0x443   : > { %v896_v63 = vmul.f32 %v3820_v20, %v4681_v11 }
 0x444   : > { %v4786_v30 = vpop.f32.mrf.mxu0 }
 0x445   : > { %v1863_v45 = vsel %vm727_vm3, %v4786_v30, -inf }
 0x446   : > { %v4790_v7 = vpop.f32.mrf.mxu0  ;;  %1864 = vmax.xlane.f32.xlu0 %v1863_v45 }
 0x447   : > { %v1857_v37 = vsel %vm727_vm3, %v4790_v7, -inf }
 0x448   : > { %v3822_v5 = vpop.eup %3821  ;;  %v4792_v21 = vpop.f32.mrf.mxu0 }
 0x449   : > { %v897_v24 = vmul.f32 %v3822_v5, %v4689_v15  ;;  %v3824_v27 = vpop.eup %3823  ;;  %v1866_v17 = vsel %vm727_vm3, %v4792_v21, -inf }
 0x44a   : > { %v4798_v50 = vpop.f32.mrf.mxu0  ;;  %1858 = vmax.xlane.f32.xlu0 %v1857_v37  ;;  %v898_v11 = vmul.f32 %v3824_v27, %v4685_v56 }
 0x44b   : > { %v1860_v38 = vsel %vm727_vm3, %v4798_v50, -inf  ;;  %v908_v49 = vpack.c.bf16 %v897_v24, %v896_v63 }
 0x44c   : > { %v3826_v62 = vpop.eup %3825  ;;  %1861 = vmax.xlane.f32.xlu1 %v1860_v38  ;;  %v4802_v13 = vpop.f32.mrf.mxu0 }
 0x44d   : > { %3474 = vmatprep.mubr.msk.bf16.mxu1 %vm727_vm3, %v908_v49  ;;  %v899_v15 = vmul.f32 %v3826_v62, %v4693_v2  ;;  %v1875_v53 = vsel %vm727_vm3, %v4802_v13, -inf }
 0x44e   : > { %v4809_v32 = vpop.f32.mrf.mxu0  ;;  %1867 = vmax.xlane.f32.xlu0 %v1866_v17 }
 0x44f   : > { %v909_v51 = vpack.c.bf16 %v899_v15, %v898_v11  ;;  %v1869_v23 = vsel %vm727_vm3, %v4809_v32, -inf }
 0x450   : > { %1876 = vmax.xlane.f32.xlu1 %v1875_v53  ;;  %v4813_v12 = vpop.f32.mrf.mxu0  ;;  %v3967_v53 = vld [vmem:[%s4145_s14 + $0x18] sm:$0xff]  }
 0x451   : > { %3475 = vmatmul.mubr.msk.bf16.gmra.mxu1 %vm727_vm3, %v909_v51  ;;  %v1878_v8 = vsel %vm727_vm3, %v4813_v12, -inf }
 0x452   : > { %v4816_v22 = vpop.f32.mrf.mxu0 }
 0x453   : > { %v1872_v56 = vsel %vm727_vm3, %v4816_v22, -inf }
 0x454   : > { %1870 = vmax.xlane.f32.xlu1 %v1869_v23  ;;  %v4822_v2 = vpop.f32.mrf.mxu0  ;;  %1873 = vmax.xlane.f32.xlu0 %v1872_v56 }
 0x455   : > { %v1887_v36 = vsel %vm727_vm3, %v4822_v2, -inf }
 0x456   : > { %v4824_v61 = vpop.f32.mrf.mxu0 }
 0x457   : > { %v1881_v18 = vsel %vm727_vm3, %v4824_v61, -inf }
 0x458   : > { %1888 = vmax.xlane.f32.xlu1 %v1887_v36  ;;  %v4830_v47 = vpop.f32.mrf.mxu0  ;;  %1879 = vmax.xlane.f32.xlu0 %v1878_v8 }
 0x459   : > { %v1890_v45 = vsel %vm727_vm3, %v4830_v47, -inf }
 0x45a   : > { %v4832_v35 = vpop.f32.mrf.mxu0 }
 0x45b   : > { %v1884_v59 = vsel %vm727_vm3, %v4832_v35, -inf }
 0x45c   : > { %1882 = vmax.xlane.f32.xlu1 %v1881_v18  ;;  %1885 = vmax.xlane.f32.xlu0 %v1884_v59 }
 0x460   : > { %1891 = vmax.xlane.f32.xlu0 %v1890_v45 }
 0x466   : > { %v4840_v20 = vpop.f32.mrf.mxu0 }
 0x467   : > { %v1899_v5 = vsel %vm727_vm3, %v4840_v20, -inf }
 0x468   : > { %1900 = vmax.xlane.f32.xlu1 %v1899_v5  ;;  %v4844_v37 = vpop.f32.mrf.mxu0 }
 0x469   : > { %v1893_v24 = vsel %vm727_vm3, %v4844_v37, -inf }
 0x46a   : > { %v4846_v63 = vpop.f32.mrf.mxu0 }
 0x46b   : > { %v1902_v62 = vsel %vm727_vm3, %v4846_v63, -inf }
 0x46c   : > { %1894 = vmax.xlane.f32.xlu1 %v1893_v24  ;;  %v4850_v27 = vpop.f32.mrf.mxu0 }
 0x46d   : > { %v862_v38 = vpop.xlane.xlu1 %861  ;;  %v1896_v49 = vsel %vm727_vm3, %v4850_v27, -inf }
 0x46e   : > { %1897 = vmax.xlane.f32.xlu0 %v1896_v49  ;;  %3827 = vrcp.f32 %v862_v38 }
 0x471   : > { %v868_v17 = vpop.xlane.xlu1 %867 }
 0x472   : > { %1903 = vmax.xlane.f32.xlu0 %v1902_v62 }
 0x473   : > { %v865_v11 = vpop.xlane.xlu0 %864 }
 0x474   : > { %3829 = vrcp.f32 %v865_v11 }
 0x475   : > { %3831 = vrcp.f32 %v868_v17  ;;  %v2042_v38 = vpop.permute.xlu1 %2041 }
 0x477   : > { %v871_v15 = vpop.xlane.xlu0 %870 }
 0x478   : > { %3833 = vrcp.f32 %v871_v15 }
 0x479   : > { %v2046_v62 = vpop.permute.xlu1 %2045 }
 0x47b   : > { %v3828_v51 = vpop.eup %3827  ;;  %v2044_v49 = vpop.permute.xlu0 %2043 }
 0x47c   : > { %v900_v56 = vmul.f32 %v3828_v51, %v4701_v57 }
 0x47d   : > { %2292 = vrot.lane.b32.xlu1 %v3967_v53, %s4029_s22  ;;  %v2048_v57 = vpop.permute.xlu1 %2047 }
 0x481   : > { %v3830_v23 = vpop.eup %3829 }
 0x482   : > { %v901_v36 = vmul.f32 %v3830_v23, %v4709_v46  ;;  %v3832_v8 = vpop.eup %3831 }
 0x483   : > { %v902_v45 = vmul.f32 %v3832_v8, %v4705_v4 }
 0x484   : > { %v910_v18 = vpack.c.bf16 %v901_v36, %v900_v56 }
 0x485   : > { %v3834_v59 = vpop.eup %3833 }
 0x486   : > { %3478 = vmatprep.mubr.msk.bf16.mxu1 %vm727_vm3, %v910_v18  ;;  %v903_v5 = vmul.f32 %v3834_v59, %v4713_v34 }
 0x488   : > { %v911_v24 = vpack.c.bf16 %v903_v5, %v902_v45 }
 0x48a   : > { %3479 = vmatmul.mubr.msk.bf16.gmra.mxu1 %vm727_vm3, %v911_v24 }
 0x48b   : > { %3508 = vmatprep.mubr.msk.bf16.mxu1 %vm593_vm0, %v2042_v38 }
 0x492   : > { %3509 = vmatmul.mubr.msk.bf16.vlgmr.msra.gmra.mxu1 %vm593_vm0, %v2044_v49 }
 0x493   : > { %3512 = vmatprep.mubr.msk.bf16.mxu1 %vm593_vm0, %v2046_v62 }
 0x49a   : > { %3513 = vmatmul.mubr.msk.bf16.gmra.mxu1 %vm593_vm0, %v2048_v57 }
 0x4cf   : > { %v1865_v46 = vpop.xlane.xlu0 %1864 }
 0x4d0   : > { %v1907_v4 = vsub.f32 %v4786_v30, %v1865_v46 }
 0x4d2   : > { %v1925_v17 = vmul.f32 1.442695, %v1907_v4 }
 0x4d3   : > { %v1859_v34 = vpop.xlane.xlu0 %1858 }
 0x4d4   : > { %3835 = vpow2.f32 %v1925_v17  ;;  %v1905_v11 = vsub.f32 %v4790_v7, %v1859_v34 }
 0x4d5   : > { %v1862_v15 = vpop.xlane.xlu1 %1861 }
 0x4d6   : > { %v1921_v53 = vmul.f32 1.442695, %v1905_v11  ;;  %v1906_v51 = vsub.f32 %v4798_v50, %v1862_v15 }
 0x4d7   : > { %v1868_v23 = vpop.xlane.xlu0 %1867 }
 0x4d8   : > { %3837 = vpow2.f32 %v1921_v53  ;;  %v1908_v56 = vsub.f32 %v4792_v21, %v1868_v23  ;;  %v1923_v36 = vmul.f32 1.442695, %v1906_v51 }
 0x4d9   : > { %v1877_v8 = vpop.xlane.xlu1 %1876 }
 0x4da   : > { %v1927_v18 = vmul.f32 1.442695, %v1908_v56  ;;  %v1911_v59 = vsub.f32 %v4802_v13, %v1877_v8 }
 0x4dc   : > { %3839 = vpow2.f32 %v1927_v18  ;;  %v1933_v30 = vmul.f32 1.442695, %v1911_v59 }
 0x4dd   : > { %3841 = vpow2.f32 %v1923_v36  ;;  %v1871_v45 = vpop.xlane.xlu1 %1870  ;;  %v1874_v5 = vpop.xlane.xlu0 %1873 }
 0x4de   : > { %3843 = vpow2.f32 %v1933_v30  ;;  %v1909_v7 = vsub.f32 %v4809_v32, %v1871_v45  ;;  %v1910_v50 = vsub.f32 %v4816_v22, %v1874_v5 }
 0x4e0   : > { %v1929_v24 = vmul.f32 1.442695, %v1909_v7  ;;  %v1931_v32 = vmul.f32 1.442695, %v1910_v50 }
 0x4e1   : > { %v4874_v38 = vpop.eup %3835  ;;  %v1889_v49 = vpop.xlane.xlu1 %1888 }
 0x4e2   : > { %v1880_v21 = vpop.xlane.xlu0 %1879  ;;  %3845 = vpow2.f32 %v1929_v24  ;;  %v1915_v62 = vsub.f32 %v4822_v2, %v1889_v49  ;;  %v1959_v57 = vsel %vm727_vm3, %v4874_v38, 0.0 }
 0x4e3   : > { %v1912_v13 = vsub.f32 %v4813_v12, %v1880_v21  ;;  %1960 = vadd.xlane.f32.xlu1 %v1959_v57 }
 0x4e4   : > { %v1941_v46 = vmul.f32 1.442695, %v1915_v62 }
 0x4e5   : > { %v1935_v4 = vmul.f32 1.442695, %v1912_v13  ;;  %v4881_v17 = vpop.eup %3837  ;;  %v1883_v34 = vpop.xlane.xlu1 %1882 }
 0x4e6   : > { %v1886_v11 = vpop.xlane.xlu0 %1885  ;;  %3847 = vpow2.f32 %v1941_v46  ;;  %v1913_v22 = vsub.f32 %v4824_v61, %v1883_v34  ;;  %v1953_v15 = vsel %vm727_vm3, %v4881_v17, 0.0 }
 0x4e7   : > { %3849 = vpow2.f32 %v1935_v4  ;;  %1954 = vadd.xlane.f32.xlu1 %v1953_v15  ;;  %v1914_v53 = vsub.f32 %v4832_v35, %v1886_v11 }
 0x4e8   : > { %v1937_v12 = vmul.f32 1.442695, %v1913_v22  ;;  %3851 = vpow2.f32 %v1931_v32 }
 0x4e9   : > { %v4886_v2 = vpop.eup %3839  ;;  %v1939_v59 = vmul.f32 1.442695, %v1914_v53 }
 0x4ea   : > { %v1892_v51 = vpop.xlane.xlu0 %1891  ;;  %v4889_v23 = vpop.eup %3841  ;;  %3853 = vpow2.f32 %v1937_v12  ;;  %v1962_v61 = vsel %vm727_vm3, %v4886_v2, 0.0 }
 0x4eb   : > { %v1916_v56 = vsub.f32 %v4830_v47, %v1892_v51  ;;  %v4894_v36 = vpop.eup %3843  ;;  %1963 = vadd.xlane.f32.xlu0 %v1962_v61  ;;  %v1956_v35 = vsel %vm727_vm3, %v4889_v23, 0.0 }
 0x4ec   : > { %v1971_v18 = vsel %vm727_vm3, %v4894_v36, 0.0 }
 0x4ed   : > { %v1943_v8 = vmul.f32 1.442695, %v1916_v56  ;;  %1972 = vadd.xlane.f32.xlu1 %v1971_v18 }
 0x4ef   : > { %3855 = vpow2.f32 %v1943_v8  ;;  %v4900_v30 = vpop.eup %3845  ;;  %1957 = vadd.xlane.f32.xlu0 %v1956_v35 }
 0x4f0   : > { %v1965_v47 = vsel %vm727_vm3, %v4900_v30, 0.0  ;;  %3857 = vpow2.f32 %v1939_v59 }
 0x4f1   : > { %v1901_v45 = vpop.xlane.xlu1 %1900  ;;  %1966 = vadd.xlane.f32.xlu1 %v1965_v47 }
 0x4f2   : > { %v1919_v5 = vsub.f32 %v4840_v20, %v1901_v45 }
 0x4f3   : > { %v4905_v7 = vpop.eup %3847 }
 0x4f4   : > { %v4907_v24 = vpop.eup %3849  ;;  %v1949_v50 = vmul.f32 1.442695, %v1919_v5  ;;  %v1983_v49 = vsel %vm727_vm3, %v4905_v7, 0.0 }
 0x4f5   : > { %v1895_v21 = vpop.xlane.xlu1 %1894  ;;  %1984 = vadd.xlane.f32.xlu1 %v1983_v49  ;;  %v1974_v62 = vsel %vm727_vm3, %v4907_v24, 0.0  ;;  %v4913_v13 = vpop.eup %3851  ;;  %v3968_v49 = vld [vmem:[%s4145_s14 + $0x8] sm:$0xff]  }
 0x4f6   : > { %3859 = vpow2.f32 %v1949_v50  ;;  %v1917_v57 = vsub.f32 %v4844_v37, %v1895_v21  ;;  %1975 = vadd.xlane.f32.xlu0 %v1974_v62  ;;  %v1968_v34 = vsel %vm727_vm3, %v4913_v13, 0.0  ;;  %v4959_v21 = vpop.f32.mrf.mxu1  ;;  %v3969_v62 = vld [vmem:[%s4145_s14] sm:$0xff]  }
 0x4f7   : > { %v4916_v20 = vpop.eup %3853  ;;  %v1898_v46 = vpop.xlane.xlu0 %1897 }
 0x4f8   : > { %v1945_v4 = vmul.f32 1.442695, %v1917_v57  ;;  %v1977_v32 = vsel %vm727_vm3, %v4916_v20, 0.0  ;;  %v1918_v22 = vsub.f32 %v4850_v27, %v1898_v46  ;;  %v4963_v57 = vpop.f32.mrf.mxu1 }
 0x4f9   : > { %1978 = vadd.xlane.f32.xlu1 %v1977_v32  ;;  %v4922_v11 = vpop.permute.xlu1 %2292 }
 0x4fa   : > { %3861 = vpow2.f32 %v1945_v4  ;;  %1969 = vadd.xlane.f32.xlu0 %v1968_v34  ;;  %3622 = vmatprep.subr.msk.bf16.mxu1 %vm593_vm0, %v4922_v11  ;;  %v4929_v37 = vsel %vm593_vm0, %v4922_v11, 0  ;;  %v1947_v27 = vmul.f32 1.442695, %v1918_v22  ;;  %v4967_v46 = vpop.f32.mrf.mxu1  ;;  %v3970_v4 = vld [vmem:[%s4145_s14 + $0x10] sm:$0xff]  }
 0x4fb   : > { %v1904_v12 = vpop.xlane.xlu0 %1903  ;;  %3602 = vmatpush3.bf16.xpose.msra.mxu1 %v4929_v37 }
 0x4fc   : > { %v4931_v15 = vpop.eup %3855  ;;  %v1920_v53 = vsub.f32 %v4846_v63, %v1904_v12  ;;  %v4973_v32 = vpop.f32.mrf.mxu1 }
 0x4fd   : > { %v1986_v51 = vsel %vm727_vm3, %v4931_v15, 0.0  ;;  %v4937_v56 = vpop.eup %3857 }
 0x4fe   : > { %v1951_v61 = vmul.f32 1.442695, %v1920_v53  ;;  %1987 = vadd.xlane.f32.xlu0 %v1986_v51  ;;  %v1980_v8 = vsel %vm727_vm3, %v4937_v56, 0.0  ;;  %v4979_v34 = vpop.f32.mrf.mxu1 }
 0x500   : > { %3863 = vpow2.f32 %v1951_v61 }
 0x501   : > { %3865 = vpow2.f32 %v1947_v27 }
 0x502   : > { %1981 = vadd.xlane.f32.xlu0 %v1980_v8 }
 0x503   : > { %v4941_v18 = vpop.eup %3859 }
 0x504   : > { %v1995_v63 = vsel %vm727_vm3, %v4941_v18, 0.0 }
 0x505   : > { %1996 = vadd.xlane.f32.xlu1 %v1995_v63 }
 0x507   : > { %v4945_v59 = vpop.eup %3861 }
 0x508   : > { %v1989_v35 = vsel %vm727_vm3, %v4945_v59, 0.0 }
 0x509   : > { %1990 = vadd.xlane.f32.xlu1 %v1989_v35 }
 0x50d   : > { %v4949_v47 = vpop.eup %3863 }
 0x50e   : > { %v1998_v45 = vsel %vm727_vm3, %v4949_v47, 0.0  ;;  %v4953_v5 = vpop.eup %3865 }
 0x50f   : > { %1999 = vadd.xlane.f32.xlu0 %v1998_v45  ;;  %v1992_v50 = vsel %vm727_vm3, %v4953_v5, 0.0 }
 0x513   : > { %1993 = vadd.xlane.f32.xlu0 %v1992_v50 }
 0x51a   : > { %2288 = vrot.lane.b32.xlu1 %v3968_v49, %s4029_s22 }
 0x51e   : > { %2286 = vrot.lane.b32.xlu1 %v3969_v62, %s4029_s22 }
 0x522   : > { %2272 = vrot.lane.b32.xlu1 %v4224_v28, %s4029_s22  ;;  %v4985_v28 = vpop.f32.mrf.mxu1 }
 0x526   : > { %2276 = vrot.lane.b32.xlu1 %v4242_v40, %s4029_s22  ;;  %v4991_v40 = vpop.f32.mrf.mxu1 }
 0x529   : > { %2290 = vrot.lane.b32.xlu0 %v3970_v4, %s4029_s22 }
 0x52a   : > { %2280 = vrot.lane.b32.xlu1 %v4260_v52, %s4029_s22  ;;  %v4997_v52 = vpop.f32.mrf.mxu1 }
 0x52d   : > { %2270 = vrot.lane.b32.xlu0 %v4227_v31, %s4029_s22  ;;  %v5363_v31 = vld [vmem:[#allocation3_spill] sm:$0xff] }
 0x52e   : > { %2284 = vrot.lane.b32.xlu1 %v4285_v6, %s4029_s22  ;;  %5364 = vst [vmem:[#allocation3_spill] sm:$0xff] %v4997_v52  ;;  %v4999_v6 = vpop.f32.mrf.mxu1 }
 0x531   : > { %2274 = vrot.lane.b32.xlu0 %v4245_v43, %s4029_s22  ;;  %v5003_v43 = vpop.f32.mrf.mxu1 }
 0x532   : > { %2613 = vrot.lane.b32.xlu1 %v4745_v41, %s4029_s22 }
 0x535   : > { %2278 = vrot.lane.b32.xlu0 %v4263_v55, %s4029_s22  ;;  %v5007_v55 = vpop.f32.mrf.mxu1 }
 0x536   : > { %2617 = vrot.lane.b32.xlu1 %v4740_v26, %s4029_s22 }
 0x537   : > { %v5009_v41 = vpop.f32.mrf.mxu1 }
 0x539   : > { %2282 = vrot.lane.b32.xlu0 %v5363_v31, %s4029_s22 }
 0x53d   : > { %2611 = vrot.lane.b32.xlu0 %v4729_v54, %s4029_s22 }
 0x541   : > { %2615 = vrot.lane.b32.xlu0 %v4735_v33, %s4029_s22  ;;  %s2925_s22 = scalar_lea.vmem (%p4116_p5), %s5359_s7, %s3200_s24 }
 0x54a   : > { %v5011_v26 = vpop.f32.mrf.mxu1 }
 0x54c   : > { %v5013_v22 = vpop.f32.mrf.mxu1 }
 0x54e   : > { %v5015_v12 = vpop.f32.mrf.mxu1 }
 0x550   : > { %v5017_v53 = vpop.f32.mrf.mxu1 }
 0x552   : > { %v3510_v51 = vpop.f32.mrf.mxu1 }
 0x554   : > { %v2098_v27 = vpop.f32.mrf.mxu1 }
 0x556   : > { %v3511_v54 = vpop.f32.mrf.mxu1 }
 0x557   : > { %v2130_v49 = vpack.c.bf16 %v3511_v54, %v3510_v51 }
 0x558   : > { %v2101_v61 = vpop.f32.mrf.mxu1 }
 0x559   : > { %v2129_v62 = vpack.c.bf16 %v2101_v61, %v2098_v27 }
 0x55a   : > { %v3514_v8 = vpop.f32.mrf.mxu1 }
 0x55c   : > { %v2114_v63 = vpop.f32.mrf.mxu1 }
 0x55e   : > { %v3515_v35 = vpop.f32.mrf.mxu1 }
 0x55f   : > { %v2132_v33 = vpack.c.bf16 %v3515_v35, %v3514_v8 }
 0x560   : > { %v2117_v45 = vpop.f32.mrf.mxu1 }
 0x561   : > { %3516 = vmatprep.subr.bf16.mxu0 %v2132_v33  ;;  %v2131_v50 = vpack.c.bf16 %v2117_v45, %v2114_v63 }
 0x562   : > { %3517 = vmatpush3.bf16.msra.mxu0 %v2132_v33 }
 0x563   : > { %3518 = vmatprep.subr.bf16.mxu0 %v2131_v50 }
 0x566   : > { %3519 = vmatpush3.bf16.msra.mxu0 %v2131_v50 }
 0x567   : > { %3520 = vmatprep.subr.bf16.mxu0 %v2130_v49 }
 0x56a   : > { %3521 = vmatpush3.bf16.msra.mxu0 %v2130_v49 }
 0x56b   : > { %3522 = vmatprep.subr.bf16.mxu0 %v2129_v62 }
 0x56c   : > { %v1961_v4 = vpop.xlane.xlu1 %1960 }
 0x56e   : > { %3523 = vmatpush3.bf16.msra.mxu0 %v2129_v62 }
 0x56f   : > { %3621 = vmatprep.subr.msk.bf16.mxu0 %vm593_vm0, %v4922_v11 }
 0x570   : > { %v1955_v31 = vpop.xlane.xlu1 %1954 }
 0x574   : > { %v1964_v52 = vpop.xlane.xlu0 %1963 }
 0x575   : > { %3867 = vrcp.f32 %v1964_v52 }
 0x576   : > { %v1973_v8 = vpop.xlane.xlu1 %1972  ;;  %3869 = vrcp.f32 %v1955_v31 }
 0x577   : > { %3871 = vrcp.f32 %v1961_v4 }
 0x578   : > { %v1958_v63 = vpop.xlane.xlu0 %1957 }
 0x579   : > { %3873 = vrcp.f32 %v1958_v63 }
 0x57a   : > { %v1967_v51 = vpop.xlane.xlu1 %1966 }
 0x57e   : > { %v1985_v35 = vpop.xlane.xlu1 %1984 }
 0x57f   : > { %v1976_v54 = vpop.xlane.xlu0 %1975 }
 0x580   : > { %3875 = vrcp.f32 %v1976_v54 }
 0x581   : > { %3877 = vrcp.f32 %v1967_v51 }
 0x582   : > { %v3868_v27 = vpop.eup %3867  ;;  %3879 = vrcp.f32 %v1973_v8  ;;  %v1979_v52 = vpop.xlane.xlu1 %1978 }
 0x583   : > { %v1970_v61 = vpop.xlane.xlu0 %1969  ;;  %v3870_v33 = vpop.eup %3869  ;;  %v2020_v50 = vmul.f32 %v3868_v27, %v4886_v2 }
 0x584   : > { %3881 = vrcp.f32 %v1970_v61  ;;  %v3872_v45 = vpop.eup %3871  ;;  %v2017_v62 = vmul.f32 %v3870_v33, %v4881_v17 }
 0x585   : > { %v2019_v31 = vmul.f32 %v3872_v45, %v4874_v38 }
 0x586   : > { %v3874_v11 = vpop.eup %3873 }
 0x587   : > { %v1988_v49 = vpop.xlane.xlu0 %1987  ;;  %v2018_v4 = vmul.f32 %v3874_v11, %v4889_v23  ;;  %v2034_v51 = vpack.c.bf16 %v2020_v50, %v2019_v31 }
 0x588   : > { %3883 = vrcp.f32 %v1988_v49 }
 0x589   : > { %v2033_v63 = vpack.c.bf16 %v2018_v4, %v2017_v62  ;;  %3885 = vrcp.f32 %v1979_v52 }
 0x58a   : > { %3887 = vrcp.f32 %v1985_v35 }
 0x58b   : > { %v1982_v8 = vpop.xlane.xlu0 %1981  ;;  %3524 = vmatprep.mubr.msk.bf16.mxu0 %vm727_vm3, %v2033_v63 }
 0x58c   : > { %3889 = vrcp.f32 %v1982_v8  ;;  %3525 = vmatmul.mubr.msk.bf16.vlgmr.msra.gmra.mxu0 %vm727_vm3, %v2034_v51 }
 0x58d   : > { %3541 = vmatpush3.bf16.xpose.msra.mxu0 %v4929_v37  ;;  %v3876_v2 = vpop.eup %3875 }
 0x58e   : > { %v3878_v54 = vpop.eup %3877  ;;  %v2024_v23 = vmul.f32 %v3876_v2, %v4907_v24  ;;  %v1997_v38 = vpop.xlane.xlu1 %1996 }
 0x58f   : > { %v3880_v17 = vpop.eup %3879  ;;  %v2021_v61 = vmul.f32 %v3878_v54, %v4900_v30 }
 0x590   : > { %v2023_v35 = vmul.f32 %v3880_v17, %v4894_v36 }
 0x591   : > { %v3882_v27 = vpop.eup %3881 }
 0x592   : > { %v2022_v33 = vmul.f32 %v3882_v27, %v4913_v13  ;;  %v2036_v11 = vpack.c.bf16 %v2024_v23, %v2023_v35  ;;  %v1991_v49 = vpop.xlane.xlu1 %1990 }
 0x594   : > { %v2035_v45 = vpack.c.bf16 %v2022_v33, %v2021_v61 }
 0x595   : > { %v3884_v50 = vpop.eup %3883 }
 0x596   : > { %3528 = vmatprep.mubr.msk.bf16.mxu0 %vm727_vm3, %v2035_v45  ;;  %v3886_v52 = vpop.eup %3885  ;;  %v2028_v24 = vmul.f32 %v3884_v50, %v4931_v15  ;;  %v2289_v15 = vpop.permute.xlu1 %2288 }
 0x597   : > { %3529 = vmatmul.mubr.msk.bf16.gmra.mxu0 %vm727_vm3, %v2036_v11  ;;  %v3888_v37 = vpop.eup %3887  ;;  %v2025_v30 = vmul.f32 %v3886_v52, %v4916_v20  ;;  %v2322_v2 = vsel %vm593_vm0, %v2289_v15, 0 }
 0x598   : > { %v2000_v62 = vpop.xlane.xlu0 %1999  ;;  %v2027_v36 = vmul.f32 %v3888_v37, %v4905_v7 }
 0x599   : > { %v3890_v4 = vpop.eup %3889  ;;  %3891 = vrcp.f32 %v2000_v62  ;;  %v379_v62 = vld [vmem:[%s5357_s5 + $0xc] sm:$0xf] }
 0x59a   : > { %v2026_v13 = vmul.f32 %v3890_v4, %v4937_v56  ;;  %3893 = vrcp.f32 %v1991_v49  ;;  %v2038_v51 = vpack.c.bf16 %v2028_v24, %v2027_v36  ;;  %v2632_v24 = vsel %vm944_vm2, %v379_v62, 0 }
 0x59b   : > { %3895 = vrcp.f32 %v1997_v38  ;;  %v2287_v38 = vpop.permute.xlu1 %2286 }
 0x59c   : > { %v1994_v31 = vpop.xlane.xlu0 %1993  ;;  %v2037_v63 = vpack.c.bf16 %v2026_v13, %v2025_v30  ;;  %v2319_v52 = vsel %vm593_vm0, %v2287_v38, 0 }
 0x59d   : > { %3897 = vrcp.f32 %v1994_v31  ;;  %v1646_v31 = vadd.f32 %v4959_v21, %v4754_v1 }
 0x59e   : > { %3532 = vmatprep.mubr.msk.bf16.mxu0 %vm727_vm3, %v2037_v63 }
 0x59f   : > { %3533 = vmatmul.mubr.msk.bf16.gmra.mxu0 %vm727_vm3, %v2038_v51  ;;  %v1638_v51 = vadd.f32 %v4963_v57, %v4756_v9  ;;  %v1662_v9 = vadd.f32 %v4979_v34, %v4762_v25  ;;  %v1654_v57 = vadd.f32 %v4985_v28, %v4764_v29  ;;  %v1678_v25 = vadd.f32 %v4999_v6, %v4770_v19 }
 0x5a0   : > { %v2291_v8 = vpop.permute.xlu0 %2290  ;;  %v1670_v29 = vadd.f32 %v5003_v43, %v4772_v0  ;;  %v1694_v0 = vadd.f32 %v5011_v26, %v4778_v3  ;;  %v1686_v43 = vadd.f32 %v5013_v22, %v4780_v60 }
 0x5a1   : > { %3623 = vmatprep.subr.msk.bf16.mxu0 %vm593_vm0, %v2291_v8  ;;  %3624 = vmatprep.subr.msk.bf16.mxu1 %vm593_vm0, %v2291_v8  ;;  %v2325_v20 = vsel %vm593_vm0, %v2291_v8, 0 }
 0x5a2   : > { %3543 = vmatpush3.bf16.xpose.msra.mxu0 %v2325_v20  ;;  %3603 = vmatpush3.bf16.xpose.msra.mxu1 %v2325_v20 }
 0x5a3   : > { %3625 = vmatprep.subr.msk.bf16.mxu0 %vm593_vm0, %v2289_v15  ;;  %3626 = vmatprep.subr.msk.bf16.mxu1 %vm593_vm0, %v2289_v15  ;;  %v1649_v15 = vadd.f32 %v4967_v46, %v4758_v44  ;;  %v1665_v46 = vadd.f32 %v4991_v40, %v4766_v16  ;;  %v1681_v16 = vadd.f32 %v5007_v55, %v4774_v39 }
 0x5a4   : > { %v2271_v7 = vpop.permute.xlu0 %2270  ;;  %v1697_v55 = vadd.f32 %v5015_v12, %v4782_v42 }
 0x5a6   : > { %v3892_v56 = vpop.eup %3891 }
 0x5a7   : > { %v3894_v54 = vpop.eup %3893  ;;  %v2032_v61 = vmul.f32 %v3892_v56, %v4949_v47  ;;  %v2273_v47 = vpop.permute.xlu1 %2272 }
 0x5a8   : > { %v2275_v17 = vpop.permute.xlu0 %2274  ;;  %v3896_v27 = vpop.eup %3895  ;;  %v2029_v33 = vmul.f32 %v3894_v54, %v4945_v59 }
 0x5a9   : > { %3552 = vmatprep.mubr.msk.bf16.mxu1 %vm593_vm0, %v2275_v17  ;;  %v2031_v45 = vmul.f32 %v3896_v27, %v4941_v18 }
 0x5aa   : > { %v3898_v23 = vpop.eup %3897  ;;  %3545 = vmatpush3.bf16.xpose.msra.mxu0 %v2322_v2  ;;  %3604 = vmatpush3.bf16.xpose.msra.mxu1 %v2322_v2  ;;  %v1641_v2 = vadd.f32 %v4973_v32, %v4760_v10 }
 0x5ab   : > { %v2030_v35 = vmul.f32 %v3898_v23, %v4953_v5  ;;  %3627 = vmatprep.subr.msk.bf16.mxu0 %vm593_vm0, %v2287_v38  ;;  %3628 = vmatprep.subr.msk.bf16.mxu1 %vm593_vm0, %v2287_v38  ;;  %v2040_v50 = vpack.c.bf16 %v2032_v61, %v2031_v45  ;;  %v2277_v59 = vpop.permute.xlu1 %2276 }
 0x5ac   : > { %v2279_v5 = vpop.permute.xlu0 %2278 }
 0x5ad   : > { %v2039_v11 = vpack.c.bf16 %v2030_v35, %v2029_v33  ;;  %v1673_v35 = vadd.f32 %v5009_v41, %v4776_v58  ;;  %v1689_v41 = vadd.f32 %v5017_v53, %v4784_v14 }
 0x5af   : > { %3536 = vmatprep.mubr.msk.bf16.mxu0 %vm727_vm3, %v2039_v11  ;;  %v2281_v18 = vpop.permute.xlu1 %2280 }
 0x5b0   : > { %3537 = vmatmul.mubr.msk.bf16.gmra.mxu0 %vm727_vm3, %v2040_v50  ;;  %v2283_v37 = vpop.permute.xlu0 %2282 }
 0x5b1   : > { %3548 = vmatprep.mubr.msk.bf16.mxu0 %vm593_vm0, %v2271_v7 }
 0x5b2   : > { %3547 = vmatpush3.bf16.xpose.msra.mxu0 %v2319_v52  ;;  %3605 = vmatpush3.bf16.xpose.msra.mxu1 %v2319_v52 }
 0x5b3   : > { %v2285_v49 = vpop.permute.xlu1 %2284  ;;  %3629 = vmatprep.subr.msk.bf16.mxu0 %vm944_vm2, %v379_v62 }
 0x5b4   : > { %v2612_v4 = vpop.permute.xlu0 %2611 }
 0x5b7   : > { %v2614_v30 = vpop.permute.xlu1 %2613 }
 0x5b8   : > { %v2616_v13 = vpop.permute.xlu0 %2615 }
 0x5b9   : > { %3549 = vmatmul.mubr.msk.bf16.vlgmr.msra.gmra.mxu0 %vm593_vm0, %v2273_v47  ;;  %3553 = vmatmul.mubr.msk.bf16.vlgmr.msra.gmra.mxu1 %vm593_vm0, %v2277_v59 }
 0x5ba   : > { %3556 = vmatprep.mubr.msk.bf16.mxu1 %vm593_vm0, %v2279_v5  ;;  %3566 = vmatprep.mubr.msk.bf16.mxu0 %vm593_vm0, %v2612_v4 }
 0x5bb   : > { %3565 = vmatpush3.bf16.msra.mxu0 %v2632_v24  ;;  %v2618_v36 = vpop.permute.xlu1 %2617 }
 0x5c1   : > { %3557 = vmatmul.mubr.msk.bf16.gmra.mxu1 %vm593_vm0, %v2281_v18  ;;  %3567 = vmatmul.mubr.msk.bf16.vlgmr.msra.gmra.mxu0 %vm593_vm0, %v2614_v30 }
 0x5c2   : > { %3560 = vmatprep.mubr.msk.bf16.mxu1 %vm593_vm0, %v2283_v37  ;;  %3570 = vmatprep.mubr.msk.bf16.mxu0 %vm593_vm0, %v2616_v13 }
 0x5c9   : > { %3561 = vmatmul.mubr.msk.bf16.gmra.mxu1 %vm593_vm0, %v2285_v49  ;;  %3571 = vmatmul.mubr.msk.bf16.gmra.mxu0 %vm593_vm0, %v2618_v36 }
 0x64c   : > { %v3526_v63 = vpop.f32.mrf.mxu0 }
 0x64d   : > { %v5076_v8 = vadd.f32 %v3526_v63, %v1646_v31 }
 0x64e   : > { %v2191_v20 = vpop.f32.mrf.mxu0 }
 0x64f   : > { %v5080_v7 = vadd.f32 %v2191_v20, %v1638_v51 }
 0x650   : > { %v3527_v56 = vpop.f32.mrf.mxu0 }
 0x651   : > { %v5084_v54 = vadd.f32 %v3527_v56, %v1649_v15 }
 0x652   : > { %v2194_v17 = vpop.f32.mrf.mxu0 }
 0x653   : > { %v5086_v1 = vadd.f32 %v2194_v17, %v1641_v2 }
 0x657   : > { %v3530_v21 = vpop.f32.mrf.mxu0 }
 0x658   : > { %v5092_v27 = vadd.f32 %v3530_v21, %v1662_v9 }
 0x659   : > { %v2207_v44 = vpop.f32.mrf.mxu0 }
 0x65a   : > { %v5096_v23 = vadd.f32 %v2207_v44, %v1654_v57 }
 0x65b   : > { %v3531_v10 = vpop.f32.mrf.mxu0 }
 0x65c   : > { %v5098_v32 = vadd.f32 %v3531_v10, %v1665_v46 }
 0x65d   : > { %v5100_v38 = vpop.f32.mrf.mxu0 }
 0x65f   : > { %v3534_v34 = vpop.f32.mrf.mxu0 }
 0x660   : > { %v5106_v28 = vadd.f32 %v3534_v34, %v1678_v25 }
 0x661   : > { %v2223_v61 = vpop.f32.mrf.mxu0 }
 0x662   : > { %v5110_v40 = vadd.f32 %v2223_v61, %v1670_v29 }
 0x663   : > { %v3535_v33 = vpop.f32.mrf.mxu0 }
 0x664   : > { %v5114_v45 = vadd.f32 %v3535_v33, %v1681_v16 }
 0x665   : > { %v2226_v11 = vpop.f32.mrf.mxu0 }
 0x666   : > { %v5116_v19 = vadd.f32 %v2226_v11, %v1673_v35 }
 0x670   : > { %v3538_v6 = vpop.f32.mrf.mxu0 }
 0x671   : > { %v5122_v50 = vadd.f32 %v3538_v6, %v1694_v0 }
 0x672   : > { %v2239_v39 = vpop.f32.mrf.mxu0 }
 0x673   : > { %v5126_v52 = vadd.f32 %v2239_v39, %v1686_v43 }
 0x674   : > { %v3539_v58 = vpop.f32.mrf.mxu0 }
 0x675   : > { %v5130_v47 = vadd.f32 %v3539_v58, %v1697_v55 }
 0x676   : > { %v2242_v59 = vpop.f32.mrf.mxu0 }
 0x677   : > { %v5132_v3 = vadd.f32 %v2242_v59, %v1689_v41 }
 0x679   : > { %v5134_v26 = vpop.f32.mrf.mxu0  ;;  %v5136_v60 = vpop.f32.mrf.mxu1 }
 0x67a   : > { %v2433_v37 = vsel %vm727_vm3, %v5134_v26, -inf  ;;  %v2445_v31 = vsel %vm727_vm3, %v5136_v60, -inf }
 0x67b   : > { %v5138_v22 = vpop.f32.mrf.mxu0  ;;  %v5140_v5 = vpop.f32.mrf.mxu1 }
 0x67c   : > { %v2427_v42 = vsel %vm727_vm3, %v5138_v22, -inf  ;;  %v2439_v30 = vsel %vm727_vm3, %v5140_v5, -inf }
 0x67d   : > { %2428 = vmax.xlane.f32.xlu0 %v2427_v42  ;;  %v5144_v12 = vpop.f32.mrf.mxu0  ;;  %v5146_v14 = vpop.f32.mrf.mxu1 }
 0x67e   : > { %v2436_v24 = vsel %vm727_vm3, %v5144_v12, -inf  ;;  %v2448_v20 = vsel %vm727_vm3, %v5146_v14, -inf }
 0x67f   : > { %v5148_v53 = vpop.f32.mrf.mxu0  ;;  %v5150_v18 = vpop.f32.mrf.mxu1 }
 0x680   : > { %v2430_v49 = vsel %vm727_vm3, %v5148_v53, -inf  ;;  %v2442_v63 = vsel %vm727_vm3, %v5150_v18, -inf }
 0x681   : > { %2434 = vmax.xlane.f32.xlu0 %v2433_v37  ;;  %2431 = vmax.xlane.f32.xlu1 %v2430_v49  ;;  %v5156_v62 = vpop.f32.mrf.mxu1  ;;  %v3568_v34 = vpop.f32.mrf.mxu0 }
 0x682   : > { %v2457_v2 = vsel %vm727_vm3, %v5156_v62, -inf }
 0x683   : > { %v5158_v4 = vpop.f32.mrf.mxu1  ;;  %v2668_v29 = vpop.f32.mrf.mxu0 }
 0x684   : > { %v2451_v15 = vsel %vm727_vm3, %v5158_v4, -inf }
 0x685   : > { %2437 = vmax.xlane.f32.xlu0 %v2436_v24  ;;  %2440 = vmax.xlane.f32.xlu1 %v2439_v30  ;;  %v5164_v13 = vpop.f32.mrf.mxu1  ;;  %v3569_v61 = vpop.f32.mrf.mxu0 }
 0x686   : > { %v2460_v21 = vsel %vm727_vm3, %v5164_v13, -inf  ;;  %v2700_v39 = vpack.c.bf16 %v3569_v61, %v3568_v34 }
 0x687   : > { %v5166_v36 = vpop.f32.mrf.mxu1  ;;  %v2671_v16 = vpop.f32.mrf.mxu0 }
 0x688   : > { %v2454_v17 = vsel %vm727_vm3, %v5166_v36, -inf  ;;  %v2699_v55 = vpack.c.bf16 %v2671_v16, %v2668_v29 }
 0x689   : > { %2446 = vmax.xlane.f32.xlu1 %v2445_v31  ;;  %2443 = vmax.xlane.f32.xlu0 %v2442_v63  ;;  %v5172_v51 = vpop.f32.mrf.mxu1  ;;  %v3572_v33 = vpop.f32.mrf.mxu0 }
 0x68a   : > { %v2469_v10 = vsel %vm727_vm3, %v5172_v51, -inf }
 0x68b   : > { %v5178_v56 = vpop.f32.mrf.mxu1  ;;  %v2684_v35 = vpop.f32.mrf.mxu0 }
 0x68c   : > { %v2463_v57 = vsel %vm727_vm3, %v5178_v56, -inf }
 0x68d   : > { %2449 = vmax.xlane.f32.xlu0 %v2448_v20  ;;  %2452 = vmax.xlane.f32.xlu1 %v2451_v15  ;;  %v5184_v9 = vpop.f32.mrf.mxu1  ;;  %v3573_v11 = vpop.f32.mrf.mxu0 }
 0x68e   : > { %v2472_v25 = vsel %vm727_vm3, %v5184_v9, -inf  ;;  %v2702_v0 = vpack.c.bf16 %v3573_v11, %v3572_v33 }
 0x68f   : > { %v5190_v44 = vpop.f32.mrf.mxu1  ;;  %v2687_v6 = vpop.f32.mrf.mxu0 }
 0x690   : > { %v2466_v46 = vsel %vm727_vm3, %v5190_v44, -inf  ;;  %3574 = vmatprep.subr.bf16.mxu0 %v2702_v0  ;;  %v2701_v43 = vpack.c.bf16 %v2687_v6, %v2684_v35 }
 0x691   : > { %2458 = vmax.xlane.f32.xlu1 %v2457_v2  ;;  %2455 = vmax.xlane.f32.xlu0 %v2454_v17 }
 0x692   : > { %3575 = vmatpush3.bf16.msra.mxu0 %v2702_v0 }
 0x693   : > { %3576 = vmatprep.subr.bf16.mxu0 %v2701_v43 }
 0x695   : > { %2461 = vmax.xlane.f32.xlu0 %v2460_v21  ;;  %2464 = vmax.xlane.f32.xlu1 %v2463_v57 }
 0x696   : > { %3577 = vmatpush3.bf16.msra.mxu0 %v2701_v43 }
 0x697   : > { %3578 = vmatprep.subr.bf16.mxu0 %v2700_v39 }
 0x699   : > { %2470 = vmax.xlane.f32.xlu1 %v2469_v10  ;;  %2467 = vmax.xlane.f32.xlu0 %v2466_v46 }
 0x69a   : > { %3579 = vmatpush3.bf16.msra.mxu0 %v2700_v39 }
 0x69b   : > { %3580 = vmatprep.subr.bf16.mxu0 %v2699_v55 }
 0x69d   : > { %2473 = vmax.xlane.f32.xlu0 %v2472_v25 }
 0x69e   : > { %3581 = vmatpush3.bf16.msra.mxu0 %v2699_v55 }
 0x706   : > { %v2429_v58 = vpop.xlane.xlu0 %2428 }
 0x707   : > { %v2475_v41 = vsub.f32 %v5138_v22, %v2429_v58 }
 0x709   : > { %v2491_v59 = vmul.f32 1.442695, %v2475_v41 }
 0x70a   : > { %v2432_v42 = vpop.xlane.xlu1 %2431  ;;  %v2435_v37 = vpop.xlane.xlu0 %2434 }
 0x70b   : > { %3899 = vpow2.f32 %v2491_v59  ;;  %v2476_v49 = vsub.f32 %v5148_v53, %v2432_v42  ;;  %v2477_v24 = vsub.f32 %v5134_v26, %v2435_v37 }
 0x70d   : > { %v2493_v30 = vmul.f32 1.442695, %v2476_v49  ;;  %v2495_v31 = vmul.f32 1.442695, %v2477_v24 }
 0x70e   : > { %v2441_v63 = vpop.xlane.xlu1 %2440  ;;  %v2438_v20 = vpop.xlane.xlu0 %2437 }
 0x70f   : > { %3901 = vpow2.f32 %v2493_v30  ;;  %v2479_v15 = vsub.f32 %v5140_v5, %v2441_v63  ;;  %v2478_v2 = vsub.f32 %v5144_v12, %v2438_v20 }
 0x710   : > { %3903 = vpow2.f32 %v2495_v31 }
 0x711   : > { %v2499_v17 = vmul.f32 1.442695, %v2479_v15  ;;  %v2497_v22 = vmul.f32 1.442695, %v2478_v2 }
 0x712   : > { %v2447_v21 = vpop.xlane.xlu1 %2446  ;;  %v2444_v57 = vpop.xlane.xlu0 %2443 }
 0x713   : > { %3905 = vpow2.f32 %v2499_v17  ;;  %v2481_v46 = vsub.f32 %v5136_v60, %v2447_v21  ;;  %v2480_v53 = vsub.f32 %v5150_v18, %v2444_v57 }
 0x714   : > { %3907 = vpow2.f32 %v2497_v22 }
 0x715   : > { %v2503_v26 = vmul.f32 1.442695, %v2481_v46  ;;  %v2501_v10 = vmul.f32 1.442695, %v2480_v53 }
 0x716   : > { %v2453_v25 = vpop.xlane.xlu1 %2452  ;;  %v2450_v34 = vpop.xlane.xlu0 %2449 }
 0x717   : > { %3909 = vpow2.f32 %v2503_v26  ;;  %v2483_v5 = vsub.f32 %v5158_v4, %v2453_v25  ;;  %v2482_v12 = vsub.f32 %v5146_v14, %v2450_v34 }
 0x718   : > { %v5207_v29 = vpop.eup %3899  ;;  %3911 = vpow2.f32 %v2501_v10 }
 0x719   : > { %v2507_v61 = vmul.f32 1.442695, %v2483_v5  ;;  %v2505_v16 = vmul.f32 1.442695, %v2482_v12  ;;  %v2523_v60 = vsel %vm727_vm3, %v5207_v29, 0.0 }
 0x71a   : > { %v2459_v33 = vpop.xlane.xlu1 %2458  ;;  %2524 = vadd.xlane.f32.xlu1 %v2523_v60  ;;  %v2456_v18 = vpop.xlane.xlu0 %2455 }
 0x71b   : > { %3913 = vpow2.f32 %v2507_v61  ;;  %v2485_v35 = vsub.f32 %v5156_v62, %v2459_v33  ;;  %v2484_v11 = vsub.f32 %v5166_v36, %v2456_v18 }
 0x71c   : > { %v5213_v0 = vpop.eup %3901  ;;  %3915 = vpow2.f32 %v2505_v16 }
 0x71d   : > { %v5215_v14 = vpop.eup %3903  ;;  %v2511_v4 = vmul.f32 1.442695, %v2485_v35  ;;  %v2509_v6 = vmul.f32 1.442695, %v2484_v11  ;;  %v2526_v43 = vsel %vm727_vm3, %v5213_v0, 0.0 }
 0x71e   : > { %v2465_v39 = vpop.xlane.xlu1 %2464  ;;  %2527 = vadd.xlane.f32.xlu0 %v2526_v43  ;;  %v2529_v55 = vsel %vm727_vm3, %v5215_v14, 0.0  ;;  %v2462_v58 = vpop.xlane.xlu0 %2461 }
 0x71f   : > { %3917 = vpow2.f32 %v2511_v4  ;;  %v2487_v62 = vsub.f32 %v5178_v56, %v2465_v39  ;;  %2530 = vadd.xlane.f32.xlu1 %v2529_v55  ;;  %v2486_v36 = vsub.f32 %v5164_v13, %v2462_v58 }
 0x720   : > { %v5223_v41 = vpop.eup %3905  ;;  %3919 = vpow2.f32 %v2509_v6 }
 0x721   : > { %v5225_v59 = vpop.eup %3907  ;;  %v2515_v42 = vmul.f32 1.442695, %v2487_v62  ;;  %v2513_v37 = vmul.f32 1.442695, %v2486_v36  ;;  %v2535_v49 = vsel %vm727_vm3, %v5223_v41, 0.0 }
 0x722   : > { %v2471_v24 = vpop.xlane.xlu1 %2470  ;;  %v2532_v30 = vsel %vm727_vm3, %v5225_v59, 0.0  ;;  %v2468_v31 = vpop.xlane.xlu0 %2467 }
 0x723   : > { %3921 = vpow2.f32 %v2515_v42  ;;  %v2489_v56 = vsub.f32 %v5172_v51, %v2471_v24  ;;  %2536 = vadd.xlane.f32.xlu1 %v2535_v49  ;;  %2533 = vadd.xlane.f32.xlu0 %v2532_v30  ;;  %v2488_v13 = vsub.f32 %v5190_v44, %v2468_v31 }
 0x724   : > { %v5233_v63 = vpop.eup %3909  ;;  %3923 = vpow2.f32 %v2513_v37 }
 0x725   : > { %v5235_v20 = vpop.eup %3911  ;;  %v2519_v15 = vmul.f32 1.442695, %v2489_v56  ;;  %v2517_v2 = vmul.f32 1.442695, %v2488_v13  ;;  %v2541_v17 = vsel %vm727_vm3, %v5233_v63, 0.0 }
 0x726   : > { %v2538_v22 = vsel %vm727_vm3, %v5235_v20, 0.0  ;;  %v2474_v21 = vpop.xlane.xlu0 %2473 }
 0x727   : > { %3925 = vpow2.f32 %v2519_v15  ;;  %2542 = vadd.xlane.f32.xlu1 %v2541_v17  ;;  %2539 = vadd.xlane.f32.xlu0 %v2538_v22  ;;  %v2490_v51 = vsub.f32 %v5184_v9, %v2474_v21 }
 0x728   : > { %v5242_v44 = vpop.eup %3913  ;;  %3927 = vpow2.f32 %v2517_v2 }
 0x729   : > { %v5244_v57 = vpop.eup %3915  ;;  %v2521_v46 = vmul.f32 1.442695, %v2490_v51  ;;  %v2547_v53 = vsel %vm727_vm3, %v5242_v44, 0.0 }
 0x72a   : > { %v2544_v26 = vsel %vm727_vm3, %v5244_v57, 0.0 }
 0x72b   : > { %3929 = vpow2.f32 %v2521_v46  ;;  %2548 = vadd.xlane.f32.xlu1 %v2547_v53  ;;  %2545 = vadd.xlane.f32.xlu0 %v2544_v26 }
 0x72c   : > { %v5250_v10 = vpop.eup %3917 }
 0x72d   : > { %v5252_v25 = vpop.eup %3919  ;;  %v2553_v9 = vsel %vm727_vm3, %v5250_v10, 0.0 }
 0x72e   : > { %v2550_v34 = vsel %vm727_vm3, %v5252_v25, 0.0 }
 0x72f   : > { %2554 = vadd.xlane.f32.xlu1 %v2553_v9  ;;  %2551 = vadd.xlane.f32.xlu0 %v2550_v34 }
 0x730   : > { %v5258_v5 = vpop.eup %3921 }
 0x731   : > { %v5260_v12 = vpop.eup %3923  ;;  %v2559_v61 = vsel %vm727_vm3, %v5258_v5, 0.0 }
 0x732   : > { %v2556_v16 = vsel %vm727_vm3, %v5260_v12, 0.0 }
 0x733   : > { %2560 = vadd.xlane.f32.xlu1 %v2559_v61  ;;  %2557 = vadd.xlane.f32.xlu0 %v2556_v16 }
 0x734   : > { %v5266_v60 = vpop.eup %3925 }
 0x735   : > { %v5268_v33 = vpop.eup %3927  ;;  %v2565_v18 = vsel %vm727_vm3, %v5266_v60, 0.0 }
 0x736   : > { %v2562_v35 = vsel %vm727_vm3, %v5268_v33, 0.0 }
 0x737   : > { %2566 = vadd.xlane.f32.xlu1 %v2565_v18  ;;  %2563 = vadd.xlane.f32.xlu0 %v2562_v35 }
 0x738   : > { %v5274_v11 = vpop.eup %3929 }
 0x739   : > { %v2568_v4 = vsel %vm727_vm3, %v5274_v11, 0.0 }
 0x73b   : > { %2569 = vadd.xlane.f32.xlu0 %v2568_v4 }
 0x7a3   : > { %v2525_v6 = vpop.xlane.xlu1 %2524 }
 0x7a4   : > { %3931 = vrcp.f32 %v2525_v6 }
 0x7a7   : > { %v2528_v43 = vpop.xlane.xlu0 %2527 }
 0x7a8   : > { %v2531_v39 = vpop.xlane.xlu1 %2530  ;;  %3933 = vrcp.f32 %v2528_v43 }
 0x7a9   : > { %3935 = vrcp.f32 %v2531_v39 }
 0x7ac   : > { %v2537_v55 = vpop.xlane.xlu1 %2536  ;;  %v2534_v58 = vpop.xlane.xlu0 %2533 }
 0x7ad   : > { %3937 = vrcp.f32 %v2534_v58 }
 0x7ae   : > { %3939 = vrcp.f32 %v2537_v55 }
 0x7b0   : > { %v2543_v62 = vpop.xlane.xlu1 %2542  ;;  %v2540_v36 = vpop.xlane.xlu0 %2539 }
 0x7b1   : > { %3941 = vrcp.f32 %v2540_v36  ;;  %v3932_v42 = vpop.eup %3931 }
 0x7b2   : > { %3943 = vrcp.f32 %v2543_v62  ;;  %v2587_v30 = vmul.f32 %v3932_v42, %v5207_v29 }
 0x7b4   : > { %v2549_v37 = vpop.xlane.xlu1 %2548  ;;  %v2546_v49 = vpop.xlane.xlu0 %2545 }
 0x7b5   : > { %v3934_v24 = vpop.eup %3933  ;;  %3945 = vrcp.f32 %v2546_v49 }
 0x7b6   : > { %v2588_v31 = vmul.f32 %v3934_v24, %v5213_v0  ;;  %3947 = vrcp.f32 %v2549_v37  ;;  %v3936_v2 = vpop.eup %3935 }
 0x7b7   : > { %v2589_v22 = vmul.f32 %v3936_v2, %v5215_v14 }
 0x7b8   : > { %v2555_v56 = vpop.xlane.xlu1 %2554  ;;  %v2552_v13 = vpop.xlane.xlu0 %2551  ;;  %v2603_v15 = vpack.c.bf16 %v2588_v31, %v2587_v30 }
 0x7b9   : > { %3949 = vrcp.f32 %v2552_v13 }
 0x7ba   : > { %3582 = vmatprep.mubr.msk.bf16.mxu0 %vm727_vm3, %v2603_v15  ;;  %v3938_v17 = vpop.eup %3937  ;;  %3951 = vrcp.f32 %v2555_v56 }
 0x7bb   : > { %v2590_v21 = vmul.f32 %v3938_v17, %v5225_v59  ;;  %v3940_v53 = vpop.eup %3939 }
 0x7bc   : > { %v2561_v51 = vpop.xlane.xlu1 %2560  ;;  %v2558_v46 = vpop.xlane.xlu0 %2557  ;;  %v2591_v34 = vmul.f32 %v3940_v53, %v5223_v41 }
 0x7bd   : > { %v2604_v29 = vpack.c.bf16 %v2590_v21, %v2589_v22  ;;  %3953 = vrcp.f32 %v2558_v46 }
 0x7be   : > { %v3942_v0 = vpop.eup %3941  ;;  %3955 = vrcp.f32 %v2561_v51 }
 0x7bf   : > { %3583 = vmatmul.mubr.msk.bf16.vlgmr.msra.gmra.mxu0 %vm727_vm3, %v2604_v29  ;;  %v2592_v61 = vmul.f32 %v3942_v0, %v5235_v20  ;;  %v3944_v16 = vpop.eup %3943  ;;  %v5365_v29 = vld [vmem:[#allocation3_spill] sm:$0xff] }
 0x7c0   : > { %v2567_v26 = vpop.xlane.xlu1 %2566  ;;  %v2564_v9 = vpop.xlane.xlu0 %2563  ;;  %v2593_v35 = vmul.f32 %v3944_v16, %v5233_v63  ;;  %v1657_v0 = vadd.f32 %v5365_v29, %v4768_v48 }
 0x7c1   : > { %3957 = vrcp.f32 %v2564_v9  ;;  %v2605_v14 = vpack.c.bf16 %v2592_v61, %v2591_v34 }
 0x7c2   : > { %v3946_v59 = vpop.eup %3945  ;;  %3959 = vrcp.f32 %v2567_v26 }
 0x7c3   : > { %3586 = vmatprep.mubr.msk.bf16.mxu0 %vm727_vm3, %v2605_v14  ;;  %v2594_v4 = vmul.f32 %v3946_v59, %v5244_v57  ;;  %v3948_v6 = vpop.eup %3947 }
 0x7c4   : > { %v2570_v18 = vpop.xlane.xlu0 %2569  ;;  %v2595_v41 = vmul.f32 %v3948_v6, %v5242_v44 }
 0x7c5   : > { %3961 = vrcp.f32 %v2570_v18  ;;  %v2606_v43 = vpack.c.bf16 %v2594_v4, %v2593_v35 }
 0x7c6   : > { %v3950_v39 = vpop.eup %3949 }
 0x7c7   : > { %3587 = vmatmul.mubr.msk.bf16.gmra.mxu0 %vm727_vm3, %v2606_v43  ;;  %v2596_v20 = vmul.f32 %v3950_v39, %v5252_v25  ;;  %v3952_v55 = vpop.eup %3951 }
 0x7c8   : > { %v2597_v36 = vmul.f32 %v3952_v55, %v5250_v10 }
 0x7c9   : > { %v2607_v58 = vpack.c.bf16 %v2596_v20, %v2595_v41 }
 0x7ca   : > { %v3954_v62 = vpop.eup %3953 }
 0x7cb   : > { %3590 = vmatprep.mubr.msk.bf16.mxu0 %vm727_vm3, %v2607_v58  ;;  %v2598_v63 = vmul.f32 %v3954_v62, %v5260_v12  ;;  %v3956_v57 = vpop.eup %3955 }
 0x7cc   : > { %v2599_v24 = vmul.f32 %v3956_v57, %v5258_v5  ;;  %v3193_v5 = vld [vmem:[%s5358_s6] ss:$0 sm:$0xff] }
 0x7cd   : > { %v2608_v42 = vpack.c.bf16 %v2598_v63, %v2597_v36 }
 0x7ce   : > { %v3958_v37 = vpop.eup %3957 }
 0x7cf   : > { %v3960_v49 = vpop.eup %3959  ;;  %3591 = vmatmul.mubr.msk.bf16.gmra.mxu0 %vm727_vm3, %v2608_v42  ;;  %v2600_v44 = vmul.f32 %v3958_v37, %v5268_v33 }
 0x7d0   : > { %v2601_v31 = vmul.f32 %v3960_v49, %v5266_v60 }
 0x7d1   : > { %v2609_v30 = vpack.c.bf16 %v2600_v44, %v2599_v24 }
 0x7d2   : > { %v3962_v25 = vpop.eup %3961 }
 0x7d3   : > { %v2602_v56 = vmul.f32 %v3962_v25, %v5274_v11  ;;  %3594 = vmatprep.mubr.msk.bf16.mxu0 %vm727_vm3, %v2609_v30 }
 0x7d5   : > { %v2610_v10 = vpack.c.bf16 %v2602_v56, %v2601_v31 }
 0x7d7   : > { %3595 = vmatmul.mubr.msk.bf16.gmra.mxu0 %vm727_vm3, %v2610_v10 }
 0x87f   : > { %v3584_v12 = vpop.f32.mrf.mxu0 }
 0x880   : > { %v2826_v22 = vadd.f32 %v3584_v12, %v5076_v8 }
 0x881   : > { %v2761_v13 = vpop.f32.mrf.mxu0 }
 0x882   : > { %v2824_v15 = vadd.f32 %v2761_v13, %v5080_v7  ;;  %v2849_v46 = vadd.f32 %v3193_v5, %v2826_v22 }
 0x883   : > { %v3585_v33 = vpop.f32.mrf.mxu0 }
 0x884   : > { %v2847_v2 = vadd.f32 %v3193_v5, %v2824_v15  ;;  %v2827_v53 = vadd.f32 %v3585_v33, %v5084_v54 }
 0x885   : > { %v2764_v17 = vpop.f32.mrf.mxu0 }
 0x886   : > { %v2825_v60 = vadd.f32 %v2764_v17, %v5086_v1  ;;  %2863 = vxpose.xlu1.b32.start [1/16] (narrow) %v2847_v2, 32  ;;  %v2850_v26 = vadd.f32 %v3193_v5, %v2827_v53  ;;  %v2259_v1 = vadd.f32 %v5100_v38, %v1657_v0 }
 0x887   : > { %v3588_v11 = vpop.f32.mrf.mxu0 }
 0x888   : > { %v2848_v21 = vadd.f32 %v3193_v5, %v2825_v60  ;;  %v2830_v14 = vadd.f32 %v3588_v11, %v5092_v27 }
 0x889   : > { %v2777_v51 = vpop.f32.mrf.mxu0 }
 0x88a   : > { %2864 = vxpose.xlu1.b32.cont [2/16] (narrow) %v2848_v21, 32  ;;  %v2828_v9 = vadd.f32 %v2777_v51, %v5096_v23  ;;  %v2853_v18 = vadd.f32 %v3193_v5, %v2830_v14 }
 0x88b   : > { %v3589_v7 = vpop.f32.mrf.mxu0 }
 0x88c   : > { %v2851_v61 = vadd.f32 %v3193_v5, %v2828_v9  ;;  %v2831_v35 = vadd.f32 %v3589_v7, %v5098_v32 }
 0x88d   : > { %v2780_v34 = vpop.f32.mrf.mxu0 }
 0x88e   : > { %2865 = vxpose.xlu1.b32.cont [3/16] (narrow) %v2849_v46, 32  ;;  %v2829_v8 = vadd.f32 %v2780_v34, %v2259_v1  ;;  %v2854_v4 = vadd.f32 %v3193_v5, %v2831_v35 }
 0x88f   : > { %v3592_v16 = vpop.f32.mrf.mxu0 }
 0x890   : > { %v2852_v59 = vadd.f32 %v3193_v5, %v2829_v8  ;;  %v2834_v27 = vadd.f32 %v3592_v16, %v5106_v28 }
 0x891   : > { %v2793_v54 = vpop.f32.mrf.mxu0 }
 0x892   : > { %2866 = vxpose.xlu1.b32.cont [4/16] (narrow) %v2850_v26, 32  ;;  %v2832_v23 = vadd.f32 %v2793_v54, %v5110_v40  ;;  %v2857_v55 = vadd.f32 %v3193_v5, %v2834_v27 }
 0x893   : > { %v3593_v48 = vpop.f32.mrf.mxu0 }
 0x894   : > { %v2855_v38 = vadd.f32 %v3193_v5, %v2832_v23  ;;  %v2835_v32 = vadd.f32 %v3593_v48, %v5114_v45 }
 0x895   : > { %v2796_v6 = vpop.f32.mrf.mxu0 }
 0x896   : > { %2867 = vxpose.xlu1.b32.cont [5/16] (narrow) %v2851_v61, 32  ;;  %v2833_v43 = vadd.f32 %v2796_v6, %v5116_v19  ;;  %v2858_v62 = vadd.f32 %v3193_v5, %v2835_v32 }
 0x897   : > { %v3596_v39 = vpop.f32.mrf.mxu0 }
 0x898   : > { %v2856_v41 = vadd.f32 %v3193_v5, %v2833_v43  ;;  %v2838_v28 = vadd.f32 %v3596_v39, %v5122_v50 }
 0x899   : > { %v2809_v20 = vpop.f32.mrf.mxu0 }
 0x89a   : > { %2868 = vxpose.xlu1.b32.cont [6/16] (narrow) %v2852_v59, 32  ;;  %v2836_v40 = vadd.f32 %v2809_v20, %v5126_v52  ;;  %v2861_v42 = vadd.f32 %v3193_v5, %v2838_v28 }
 0x89b   : > { %v3597_v58 = vpop.f32.mrf.mxu0 }
 0x89c   : > { %v2859_v63 = vadd.f32 %v3193_v5, %v2836_v40  ;;  %v2839_v37 = vadd.f32 %v3597_v58, %v5130_v47 }
 0x89d   : > { %v2812_v36 = vpop.f32.mrf.mxu0 }
 0x89e   : > { %2869 = vxpose.xlu1.b32.cont [7/16] (narrow) %v2853_v18, 32  ;;  %v2837_v19 = vadd.f32 %v2812_v36, %v5132_v3  ;;  %v2862_v45 = vadd.f32 %v3193_v5, %v2839_v37 }
 0x8a0   : > { %v2860_v57 = vadd.f32 %v3193_v5, %v2837_v19 }
 0x8a2   : > { %2870 = vxpose.xlu1.b32.cont [8/16] (narrow) %v2854_v4, 32 }
 0x8a6   : > { %2871 = vxpose.xlu1.b32.cont [9/16] (narrow) %v2855_v38, 32 }
 0x8aa   : > { %2872 = vxpose.xlu1.b32.cont [10/16] (narrow) %v2856_v41, 32 }
 0x8ae   : > { %2873 = vxpose.xlu1.b32.cont [11/16] (narrow) %v2857_v55, 32 }
 0x8b2   : > { %2874 = vxpose.xlu1.b32.cont [12/16] (narrow) %v2858_v62, 32 }
 0x8b6   : > { %2875 = vxpose.xlu1.b32.cont [13/16] (narrow) %v2859_v63, 32 }
 0x8ba   : > { %2876 = vxpose.xlu1.b32.cont [14/16] (narrow) %v2860_v57, 32 }
 0x8be   : > { %2877 = vxpose.xlu1.b32.cont [15/16] (narrow) %v2861_v42, 32 }
 0x8c2   : > { %2878 = vxpose.xlu1.b32.end [16/16] (narrow) %v2862_v45, 32 }
 0x902   : > { %v2879_v49 = vpop.trf.xlu1 }
 0x906   : > { %v2880_v52 = vpop.trf.xlu1 }
 0x907   : > { %v3212_v24 = vpack.c.bf16 %v2880_v52, %v2879_v49 }
 0x909   : > { %3213 = vst [vmem:[%s322_s17] sm:$0xff] %v3212_v24  }
 0x90a   : > { %v2881_v44 = vpop.trf.xlu1 }
 0x90d   : > { %2921 = sbr.rel (!%p4116_p5) target bundleno = 2330 (0x91a), region = 52 }
 0x90e   : > { %v2882_v3 = vpop.trf.xlu1 }
 0x90f   : > { %v3217_v25 = vpack.c.bf16 %v2882_v3, %v2881_v44 }
 0x910   : > { %v2942_v50 = vld [vmem:[%s322_s17] sm:$0xf] (%p4116_p5)  ;;  %v2944_v47 = vld [vmem:[%s322_s17 + $0x4] sm:$0xf] (%p4116_p5) }
 0x911   : > { %3219 = vst [vmem:[%s322_s17 + $0x8] sm:$0xff] %v3217_v25   ;;  %2943 = vst [vmem:[%s2925_s22] sm:$0xf] (%p4116_p5), %v2942_v50 }
 0x912   : > { %2945 = vst [vmem:[%s2925_s22 + $0x8] sm:$0xf] %v2944_v47 }
 0x918   : > { %v2946_v30 = vld [vmem:[%s322_s17 + $0x8] sm:$0xf]  ;;  %v2948_v31 = vld [vmem:[%s322_s17 + $0xc] sm:$0xf] }
 0x919   : > { %2947 = vst [vmem:[%s2925_s22 + $0x10] sm:$0xf] %v2946_v30  ;;  %2949 = vst [vmem:[%s2925_s22 + $0x18] sm:$0xf] %v2948_v31 }
 0x91a PF: > { %s17_s30 = sadd.s32 1, %s4025_s30   ;;  %s5366_s24 = smov %s4005_s25 }
 0x91b   : > { %p14_p11 = scmp.ge.s32.totalorder %s17_s30, 6   ;;  %s5367_s25 = smov %s4127_s16 }
 0x91c   : > { %s5368_s26 = smov %s4017_s28  ;;  %s5369_s27 = smov %s4021_s29 }
 0x91d   : > { %s5370_s28 = smov %s5373_s8  ;;  %s5371_s29 = smov %s5377_s9 }
 0x91e   :  { %16 = sbr.rel (!%p14_p11) target bundleno = 4 (0x4), region = 125 }

</bundles_post_ra>
